<compile_context>
chip_gen: v7x
topology: tpu7x:2x2x1
jax: 0.10.0
libtpu: 0.0.40
codegen_flags: <defaults>
</compile_context>

<pallas_src>
import functools
import math

import jax
import jax.numpy as jnp
from jax.experimental import pallas as pl
from jax.experimental.pallas import tpu as pltpu

# --- module hyper-parameters (TorchMelSpectrogram.__init__ defaults) -------------------
FILTER_LENGTH = 1024          # n_fft
HOP_LENGTH = 256
WIN_LENGTH = 1024             # == n_fft
N_MELS = 80
MEL_FMIN = 0.0
MEL_FMAX = 8000.0
SAMPLE_RATE = 22050
N_FREQS = FILTER_LENGTH // 2 + 1       # onesided rfft bins = 513
RATIO = FILTER_LENGTH // HOP_LENGTH    # 4 hop-chunks per frame
TAIL_ROWS = 8                          # >= RATIO-1, sublane-aligned tail block

LANE = 128
MIN_TM = 128                                               # lane-dense transposed output
N_MELS_PAD = ((N_MELS + LANE - 1) // LANE) * LANE          # 128


def _round_up(x, m):
    return ((x + m - 1) // m) * m


def _kept_freq_bins():
    # First rfft bin with freq >= mel_fmax has an exactly-zero filterbank row, so the
    # frequency axis can be truncated there (rounded up to a lane multiple) with NO
    # numerical change.  Default config: 372 -> 384 (= 3*128) instead of 513 -> 640.
    cutoff = int(math.ceil(MEL_FMAX * FILTER_LENGTH / SAMPLE_RATE))
    cutoff = min(max(cutoff, 1), N_FREQS)
    return min(_round_up(cutoff, LANE), _round_up(N_FREQS, LANE))


N_FREQS_KEEP = _kept_freq_bins()                            # 384 for default config


# ---------------------------- constant / parameter setup ------------------------------
def _hz_to_mel_htk(f):
    return 2595.0 * jnp.log10(1.0 + f / 700.0)


def _mel_to_hz_htk(m):
    return 700.0 * (10.0 ** (m / 2595.0) - 1.0)


def make_mel_filterbank():
    # Mirrors torchaudio.functional.melscale_fbanks(mel_scale='htk', norm='slaney'),
    # truncated to N_FREQS_KEEP frequency rows and zero-padded to N_MELS_PAD columns.
    all_freqs = jnp.linspace(0.0, SAMPLE_RATE / 2.0, N_FREQS)
    m_min = _hz_to_mel_htk(jnp.asarray(MEL_FMIN, jnp.float32))
    m_max = _hz_to_mel_htk(jnp.asarray(MEL_FMAX, jnp.float32))
    m_pts = jnp.linspace(m_min, m_max, N_MELS + 2)
    f_pts = _mel_to_hz_htk(m_pts)                               # (n_mels+2,)
    f_diff = f_pts[1:] - f_pts[:-1]                             # (n_mels+1,)
    slopes = f_pts[None, :] - all_freqs[:, None]                # (n_freqs, n_mels+2)
    down_slopes = -slopes[:, :-2] / f_diff[:-1]
    up_slopes = slopes[:, 2:] / f_diff[1:]
    fb = jnp.maximum(0.0, jnp.minimum(down_slopes, up_slopes))  # (n_freqs, n_mels)
    enorm = 2.0 / (f_pts[2:N_MELS + 2] - f_pts[:N_MELS])        # slaney area norm
    fb = fb * enorm[None, :]

    keep = min(N_FREQS_KEEP, N_FREQS)
    out = jnp.zeros((N_FREQS_KEEP, N_MELS_PAD), jnp.float32)
    out = out.at[:keep, :N_MELS].set(fb[:keep])
    return out.astype(jnp.bfloat16)                             # (NF_keep, 128)


def make_windowed_dft():
    # Real/imag DFT bases with the periodic Hann window pre-folded into the rows:
    # (w * x) @ C == x @ (diag(w) C).  cos|sin concatenated -> shared RHS for the MXU.
    assert WIN_LENGTH == FILTER_LENGTH
    n = jnp.arange(FILTER_LENGTH, dtype=jnp.float32)
    k = jnp.arange(N_FREQS_KEEP, dtype=jnp.float32)
    ang = 2.0 * math.pi * n[:, None] * k[None, :] / FILTER_LENGTH
    win = 0.5 * (1.0 - jnp.cos(2.0 * math.pi * n / WIN_LENGTH))       # hann, periodic
    dft = jnp.concatenate([jnp.cos(ang), jnp.sin(ang)], axis=1)       # (n_fft, 2*NF_keep)
    return (win[:, None] * dft).astype(jnp.bfloat16)


# ----------------------------------- Pallas kernel -------------------------------------
def mel_kernel(cmain_ref, ctail_ref, dft_ref, fb_ref, inv_norms_ref, out_ref):
    # cmain_ref    : (TM, 256)           bf16  hop-chunks t*TM .. t*TM+TM-1
    # ctail_ref    : (8, 256)            bf16  hop-chunks t*TM+TM .. +7 (first RATIO-1 used)
    # dft_ref      : (n_fft, 2*NF_keep)  bf16  hann-windowed [cos | sin] basis
    # fb_ref       : (NF_keep, 128)      bf16  mel filterbank (lane-padded)
    # inv_norms_ref: (1, 128)            f32   1/mel_norms (lane-padded with 1s)
    # out_ref      : (80, TM)            f32   pre-transposed mel tile
    nf = fb_ref.shape[0]

    # STFT of the frame tile as 4 shifted K=256 MXU matmuls accumulated in f32:
    # frame[i] = chunks[i] ++ chunks[i+1] ++ chunks[i+2] ++ chunks[i+3].
    spec = jnp.dot(cmain_ref[...], dft_ref[0:HOP_LENGTH, :],
                   preferred_element_type=jnp.float32)              # (TM, 2*NF)
    for s in range(1, RATIO):
        lhs = jnp.concatenate([cmain_ref[s:, :], ctail_ref[:s, :]], axis=0)   # (TM, 256)
        spec = spec + jnp.dot(lhs, dft_ref[s * HOP_LENGTH:(s + 1) * HOP_LENGTH, :],
                              preferred_element_type=jnp.float32)

    re = spec[:, :nf]                                               # lane-aligned slices
    im = spec[:, nf:]
    power = (re * re + im * im).astype(jnp.bfloat16)                # |X|^2 (power=2)
    mel = jnp.dot(power, fb_ref[...],
                  preferred_element_type=jnp.float32)               # MXU, (TM, 128)
    mel = jnp.log(jnp.maximum(mel, 1e-5)) * inv_norms_ref[...]      # log(clamp) / norms
    # Pre-transpose on the XLU (slack under the MXU-bound loop); lane axis = TM (128k).
    out_ref[...] = jnp.transpose(mel)[:out_ref.shape[0], :]


# ------------------------------------- wrapper ------------------------------------------
def _pick_tm(n_frames, batch, tm_max):
    tm_max = max(MIN_TM, _round_up(tm_max, MIN_TM))
    n_tiles = max(1, math.ceil(n_frames / tm_max))
    if batch == 1:
        # v7x has 2 TensorCores: keep >= 2 grid programs when a single clip has enough work.
        n_tiles = max(n_tiles, min(2, math.ceil(n_frames / MIN_TM)))
    return _round_up(math.ceil(n_frames / n_tiles), MIN_TM)


@functools.partial(jax.jit, static_argnames=("tm_max",))
def torch_mel_spectrogram(audio, mel_norms, *, tm_max=1024):
    """audio: (B, T) or (B, 1, T) float32. Returns (B, n_mels, n_frames) like PyTorch."""
    if audio.ndim == 3:
        audio = jnp.squeeze(audio, axis=1)
    assert audio.ndim == 2
    audio = audio.astype(jnp.float32)
    B, T = audio.shape

    # center=True STFT: reflect-pad by n_fft//2.
    pad = FILTER_LENGTH // 2
    padded = jnp.pad(audio, ((0, 0), (pad, pad)), mode="reflect")
    L = padded.shape[1]
    n_frames = 1 + (L - FILTER_LENGTH) // HOP_LENGTH

    tm = _pick_tm(n_frames, B, tm_max)
    n_tiles = math.ceil(n_frames / tm)
    n_frames_pad = n_tiles * tm

    # Hop-chunk view: (B, n_chunks, 256) bf16 (a free reshape; no 4x frame copy).
    n_chunks = n_frames_pad + TAIL_ROWS
    l_needed = n_chunks * HOP_LENGTH
    chunks = jnp.pad(padded.astype(jnp.bfloat16), ((0, 0), (0, max(0, l_needed - L))))
    chunks = chunks[:, :l_needed].reshape(B, n_chunks, HOP_LENGTH)
    # Per-tile 8-row tail (chunks rows (t+1)*tm .. +7); tiny gather, keeps every block aligned.
    tail_idx = (jnp.arange(n_tiles)[:, None] + 1) * tm + jnp.arange(TAIL_ROWS)[None, :]
    tails = chunks[:, tail_idx, :]                                    # (B, n_tiles, 8, 256)

    dft = make_windowed_dft()                                         # const-folds under jit
    fb = make_mel_filterbank()
    inv_norms = 1.0 / mel_norms.astype(jnp.float32).reshape(N_MELS)
    inv_norms = jnp.pad(inv_norms, (0, N_MELS_PAD - N_MELS),
                        constant_values=1.0).reshape(1, N_MELS_PAD)   # (1, 128) f32

    out = pl.pallas_call(
        mel_kernel,
        out_shape=jax.ShapeDtypeStruct((B, N_MELS, n_frames_pad), jnp.float32),
        grid_spec=pltpu.PrefetchScalarGridSpec(
            num_scalar_prefetch=0,
            grid=(B, n_tiles),
            in_specs=[
                pl.BlockSpec((None, tm, HOP_LENGTH), lambda b, t: (b, t, 0)),
                pl.BlockSpec((None, None, TAIL_ROWS, HOP_LENGTH), lambda b, t: (b, t, 0, 0)),
                pl.BlockSpec((FILTER_LENGTH, 2 * N_FREQS_KEEP), lambda b, t: (0, 0)),
                pl.BlockSpec((N_FREQS_KEEP, N_MELS_PAD), lambda b, t: (0, 0)),
                pl.BlockSpec((1, N_MELS_PAD), lambda b, t: (0, 0)),
            ],
            out_specs=pl.BlockSpec((None, N_MELS, tm), lambda b, t: (b, 0, t)),
        ),
        compiler_params=pltpu.CompilerParams(
            dimension_semantics=("parallel", "parallel"),
            vmem_limit_bytes=32 * 1024 * 1024,
        ),
    )(chunks, tails, dft, fb, inv_norms)

    # Output is already (B, n_mel_channels, n_frames_pad); just drop frame padding.
    if n_frames_pad == n_frames:
        return out
    return out[:, :, :n_frames]


# --------------------------------------- main -------------------------------------------
if __name__ == "__main__":
    key = jax.random.PRNGKey(0)
    k_audio, k_norms = jax.random.split(key)

    # Small, module-consistent input: (B=2, 1, T=2048) waveform -> 9 STFT frames.
    x = 0.1 * jax.random.normal(k_audio, (2, 1, 2048), dtype=jnp.float32)

    # Deterministic stand-in for torch.load(mel_norms.pth): positive per-mel scales.
    # TODO(synk): real mel_norms come from a .pth checkpoint; synthesized here instead.
    mel_norms = jax.random.uniform(k_norms, (N_MELS,), minval=0.5, maxval=2.0,
                                   dtype=jnp.float32)

    mel = torch_mel_spectrogram(x, mel_norms)
    jax.block_until_ready(mel)
    assert mel.shape == (2, N_MELS, 9), mel.shape
    print("KERNEL_OK")
</pallas_src>

<mosaic_0001>
module attributes {stable_mosaic.version = 11 : i64} {
  func.func @mel_kernel(%arg0: i32, %arg1: i32, %arg2: memref<1x128x256xbf16, #tpu.memory_space<vmem>>, %arg3: memref<1x1x8x256xbf16, #tpu.memory_space<vmem>>, %arg4: memref<1024x768xbf16, #tpu.memory_space<vmem>>, %arg5: memref<384x128xbf16, #tpu.memory_space<vmem>>, %arg6: memref<1x128xf32, #tpu.memory_space<vmem>>, %arg7: memref<1x80x128xf32, #tpu.memory_space<vmem>>) attributes {dimension_semantics = [#tpu.dimension_semantics<parallel>, #tpu.dimension_semantics<parallel>], iteration_bounds = array<i64: 2, 1>, scalar_prefetch = 0 : i64, scratch_operands = 0 : i64, tpu.core_type = #tpu.core_type<tc>, window_params = [{transform_indices = @transform_0, window_bounds = array<i64: 1, 128, 256>}, {transform_indices = @transform_1, window_bounds = array<i64: 1, 1, 8, 256>}, {pipeline_mode = #tpu.pipeline_mode<synchronous>, transform_indices = @transform_2, window_bounds = array<i64: 1024, 768>}, {pipeline_mode = #tpu.pipeline_mode<synchronous>, transform_indices = @transform_3, window_bounds = array<i64: 384, 128>}, {pipeline_mode = #tpu.pipeline_mode<synchronous>, transform_indices = @transform_4, window_bounds = array<i64: 1, 128>}, {transform_indices = @transform_5, window_bounds = array<i64: 1, 80, 128>}]} {
    %c0 = arith.constant 0 : index
    %c0_0 = arith.constant 0 : index
    %c0_1 = arith.constant 0 : index
    %0 = vector.load %arg2[%c0, %c0_0, %c0_1] : memref<1x128x256xbf16, #tpu.memory_space<vmem>>, vector<1x128x256xbf16>
    %1 = vector.shape_cast %0 : vector<1x128x256xbf16> to vector<128x256xbf16>
    %c0_2 = arith.constant 0 : index
    %c0_3 = arith.constant 0 : index
    %2 = vector.load %arg4[%c0_2, %c0_3] : memref<1024x768xbf16, #tpu.memory_space<vmem>>, vector<256x768xbf16>
    %cst = arith.constant dense<0.000000e+00> : vector<128x768xf32>
    %3 = tpu.matmul %1, %2, %cst {dimension_numbers = #tpu.dot_dimension_numbers<[1], [0], [0], [1], [0, 0, 1, 1], [], []>} : vector<128x256xbf16>, vector<256x768xbf16>, vector<128x768xf32> -> vector<128x768xf32>
    %c0_4 = arith.constant 0 : index
    %c1 = arith.constant 1 : index
    %c0_5 = arith.constant 0 : index
    %4 = vector.load %arg2[%c0_4, %c1, %c0_5] : memref<1x128x256xbf16, #tpu.memory_space<vmem>>, vector<1x127x256xbf16>
    %5 = vector.shape_cast %4 : vector<1x127x256xbf16> to vector<127x256xbf16>
    %c0_6 = arith.constant 0 : index
    %c0_7 = arith.constant 0 : index
    %c0_8 = arith.constant 0 : index
    %c0_9 = arith.constant 0 : index
    %6 = vector.load %arg3[%c0_6, %c0_7, %c0_8, %c0_9] : memref<1x1x8x256xbf16, #tpu.memory_space<vmem>>, vector<1x1x1x256xbf16>
    %7 = vector.shape_cast %6 : vector<1x1x1x256xbf16> to vector<1x256xbf16>
    %8 = tpu.concatenate %5, %7 in 0 : vector<127x256xbf16>, vector<1x256xbf16> -> vector<128x256xbf16>
    %c256 = arith.constant 256 : index
    %c0_10 = arith.constant 0 : index
    %9 = vector.load %arg4[%c256, %c0_10] : memref<1024x768xbf16, #tpu.memory_space<vmem>>, vector<256x768xbf16>
    %cst_11 = arith.constant dense<0.000000e+00> : vector<128x768xf32>
    %10 = tpu.matmul %8, %9, %cst_11 {dimension_numbers = #tpu.dot_dimension_numbers<[1], [0], [0], [1], [0, 0, 1, 1], [], []>} : vector<128x256xbf16>, vector<256x768xbf16>, vector<128x768xf32> -> vector<128x768xf32>
    %11 = arith.addf %3, %10 : vector<128x768xf32>
    %c0_12 = arith.constant 0 : index
    %c2 = arith.constant 2 : index
    %c0_13 = arith.constant 0 : index
    %12 = vector.load %arg2[%c0_12, %c2, %c0_13] : memref<1x128x256xbf16, #tpu.memory_space<vmem>>, vector<1x126x256xbf16>
    %13 = vector.shape_cast %12 : vector<1x126x256xbf16> to vector<126x256xbf16>
    %c0_14 = arith.constant 0 : index
    %c0_15 = arith.constant 0 : index
    %c0_16 = arith.constant 0 : index
    %c0_17 = arith.constant 0 : index
    %14 = vector.load %arg3[%c0_14, %c0_15, %c0_16, %c0_17] : memref<1x1x8x256xbf16, #tpu.memory_space<vmem>>, vector<1x1x2x256xbf16>
    %15 = vector.shape_cast %14 : vector<1x1x2x256xbf16> to vector<2x256xbf16>
    %16 = tpu.concatenate %13, %15 in 0 : vector<126x256xbf16>, vector<2x256xbf16> -> vector<128x256xbf16>
    %c512 = arith.constant 512 : index
    %c0_18 = arith.constant 0 : index
    %17 = vector.load %arg4[%c512, %c0_18] : memref<1024x768xbf16, #tpu.memory_space<vmem>>, vector<256x768xbf16>
    %cst_19 = arith.constant dense<0.000000e+00> : vector<128x768xf32>
    %18 = tpu.matmul %16, %17, %cst_19 {dimension_numbers = #tpu.dot_dimension_numbers<[1], [0], [0], [1], [0, 0, 1, 1], [], []>} : vector<128x256xbf16>, vector<256x768xbf16>, vector<128x768xf32> -> vector<128x768xf32>
    %19 = arith.addf %11, %18 : vector<128x768xf32>
    %c0_20 = arith.constant 0 : index
    %c3 = arith.constant 3 : index
    %c0_21 = arith.constant 0 : index
    %20 = vector.load %arg2[%c0_20, %c3, %c0_21] : memref<1x128x256xbf16, #tpu.memory_space<vmem>>, vector<1x125x256xbf16>
    %21 = vector.shape_cast %20 : vector<1x125x256xbf16> to vector<125x256xbf16>
    %c0_22 = arith.constant 0 : index
    %c0_23 = arith.constant 0 : index
    %c0_24 = arith.constant 0 : index
    %c0_25 = arith.constant 0 : index
    %22 = vector.load %arg3[%c0_22, %c0_23, %c0_24, %c0_25] : memref<1x1x8x256xbf16, #tpu.memory_space<vmem>>, vector<1x1x3x256xbf16>
    %23 = vector.shape_cast %22 : vector<1x1x3x256xbf16> to vector<3x256xbf16>
    %24 = tpu.concatenate %21, %23 in 0 : vector<125x256xbf16>, vector<3x256xbf16> -> vector<128x256xbf16>
    %c768 = arith.constant 768 : index
    %c0_26 = arith.constant 0 : index
    %25 = vector.load %arg4[%c768, %c0_26] : memref<1024x768xbf16, #tpu.memory_space<vmem>>, vector<256x768xbf16>
    %cst_27 = arith.constant dense<0.000000e+00> : vector<128x768xf32>
    %26 = tpu.matmul %24, %25, %cst_27 {dimension_numbers = #tpu.dot_dimension_numbers<[1], [0], [0], [1], [0, 0, 1, 1], [], []>} : vector<128x256xbf16>, vector<256x768xbf16>, vector<128x768xf32> -> vector<128x768xf32>
    %27 = arith.addf %19, %26 : vector<128x768xf32>
    %28 = vector.extract_strided_slice %27 {offsets = [0, 0], sizes = [128, 384], strides = [1, 1]} : vector<128x768xf32> to vector<128x384xf32>
    %29 = vector.extract_strided_slice %27 {offsets = [0, 384], sizes = [128, 384], strides = [1, 1]} : vector<128x768xf32> to vector<128x384xf32>
    %30 = arith.mulf %28, %28 : vector<128x384xf32>
    %31 = arith.mulf %29, %29 : vector<128x384xf32>
    %32 = arith.addf %30, %31 : vector<128x384xf32>
    %33 = arith.truncf %32 : vector<128x384xf32> to vector<128x384xbf16>
    %c0_28 = arith.constant 0 : index
    %c0_29 = arith.constant 0 : index
    %34 = vector.load %arg5[%c0_28, %c0_29] : memref<384x128xbf16, #tpu.memory_space<vmem>>, vector<384x128xbf16>
    %cst_30 = arith.constant dense<0.000000e+00> : vector<128x128xf32>
    %35 = tpu.matmul %33, %34, %cst_30 {dimension_numbers = #tpu.dot_dimension_numbers<[1], [0], [0], [1], [0, 0, 1, 1], [], []>} : vector<128x384xbf16>, vector<384x128xbf16>, vector<128x128xf32> -> vector<128x128xf32>
    %cst_31 = arith.constant 9.99999974E-6 : f32
    %36 = vector.broadcast %cst_31 : f32 to vector<128x128xf32>
    %37 = arith.maximumf %35, %36 : vector<128x128xf32>
    %38 = math.log %37 : vector<128x128xf32>
    %c0_32 = arith.constant 0 : index
    %c0_33 = arith.constant 0 : index
    %39 = vector.load %arg6[%c0_32, %c0_33] : memref<1x128xf32, #tpu.memory_space<vmem>>, vector<1x128xf32>
    %40 = vector.broadcast %39 : vector<1x128xf32> to vector<128x128xf32>
    %41 = arith.mulf %38, %40 : vector<128x128xf32>
    %42 = tpu.transpose %41, [1, 0] : vector<128x128xf32> -> vector<128x128xf32>
    %43 = vector.extract_strided_slice %42 {offsets = [0, 0], sizes = [80, 128], strides = [1, 1]} : vector<128x128xf32> to vector<80x128xf32>
    %c0_34 = arith.constant 0 : index
    %c0_35 = arith.constant 0 : index
    %c0_36 = arith.constant 0 : index
    %44 = vector.load %arg7[%c0_34, %c0_35, %c0_36] : memref<1x80x128xf32, #tpu.memory_space<vmem>>, vector<1x80x128xf32>
    %45 = vector.shape_cast %44 : vector<1x80x128xf32> to vector<80x128xf32>
    %46 = vector.shape_cast %43 : vector<80x128xf32> to vector<1x80x128xf32>
    tpu.vector_store %arg7[%c0_34, %c0_35, %c0_36], %46 {strides = array<i32>} : memref<1x80x128xf32, #tpu.memory_space<vmem>>, vector<1x80x128xf32>,
    return
  }
  func.func @transform_0(%arg0: i32, %arg1: i32) -> (i32, i32, i32) {
    %c0_i32 = arith.constant 0 : i32
    %c0_i32_0 = arith.constant 0 : i32
    return %arg0, %arg1, %c0_i32 : i32, i32, i32
  }
  func.func @transform_1(%arg0: i32, %arg1: i32) -> (i32, i32, i32, i32) {
    %c0_i32 = arith.constant 0 : i32
    %c0_i32_0 = arith.constant 0 : i32
    %c0_i32_1 = arith.constant 0 : i32
    return %arg0, %arg1, %c0_i32, %c0_i32_0 : i32, i32, i32, i32
  }
  func.func @transform_2(%arg0: i32, %arg1: i32) -> (i32, i32) {
    %c0_i32 = arith.constant 0 : i32
    %c0_i32_0 = arith.constant 0 : i32
    %c0_i32_1 = arith.constant 0 : i32
    return %c0_i32, %c0_i32_0 : i32, i32
  }
  func.func @transform_3(%arg0: i32, %arg1: i32) -> (i32, i32) {
    %c0_i32 = arith.constant 0 : i32
    %c0_i32_0 = arith.constant 0 : i32
    %c0_i32_1 = arith.constant 0 : i32
    return %c0_i32, %c0_i32_0 : i32, i32
  }
  func.func @transform_4(%arg0: i32, %arg1: i32) -> (i32, i32) {
    %c0_i32 = arith.constant 0 : i32
    %c0_i32_0 = arith.constant 0 : i32
    %c0_i32_1 = arith.constant 0 : i32
    return %c0_i32, %c0_i32_0 : i32, i32
  }
  func.func @transform_5(%arg0: i32, %arg1: i32) -> (i32, i32, i32) {
    %c0_i32 = arith.constant 0 : i32
    %c0_i32_0 = arith.constant 0 : i32
    return %arg0, %c0_i32, %arg1 : i32, i32, i32
  }
}

</mosaic_0001>

<bundles_post_ra>
// kernel: torch_mel_spectrogram.1
= control target key start
LH: loop header
LB: loop body
LE: loop exit
PB: predicated region body
PF: predicated region fallthrough
CT: control target
= control target key end

     0   :  { %s6986_s18 = smov 0   ;;  %s6988_s19 = smov 0   ;;  %s9304_s0 = inlined_call_operand.vmem [shape: bf16[2,136,256], index: 0, kind: input, shape index: {}]   ;;  %s9305_s1 = inlined_call_operand.vmem [shape: bf16[2,1,8,256], index: 1, kind: input, shape index: {}]   ;;  %s9306_s2 = inlined_call_operand.vmem [shape: bf16[1024,768], index: 2, kind: input, shape index: {}]   ;;  %s9307_s3 = inlined_call_operand.vmem [shape: bf16[384,128], index: 3, kind: input, shape index: {}]   ;;  %s9308_s4 = inlined_call_operand.vmem [shape: f32[1,128], index: 4, kind: input, shape index: {}]   ;;  %s9309_s5 = inlined_call_operand.vmem [shape: f32[2,80,128], index: 5, kind: output, shape index: {}]  }
   0x1   :  { %s6990_s20 = smov 0  }
   0x2 LB: > { %s27_s21 = sadd.s32 1, %s6950_s19  ;;  %p5391_p0 = scmp.ge.s32.totalorder %s6954_s20, 1  ;;  %s6954_s20 = sphi %s6990_s20, %s15_s20   ;;  %s6950_s19 = sphi %s6988_s19, %s9393_s19   ;;  %s6946_s18 = sphi %s6986_s18, %s9392_s18  }
   0x3   : > { %p29_p1 = scmp.ge.s32.totalorder %s27_s21, 2  ;;  %p235_p2 = scmp.lt.s32.totalorder %s6954_s20, 3 }
   0x5   : > { %s9395_s21 = smov (%p29_p1, %s27_s21), 0  ;;  %p236_p3 = pnand %p5391_p0, %p235_p2 }
   0x7   : > { %239 = sbr.rel (%p236_p3) target bundleno = 1146 (0x47a), region = 40 }
   0xe   : > { %v6256_v0 = vld [vmem:[%s9306_s2 + $0x304] ss:$24 sps:$4 sm:$0xff]   ;;  %v6258_v1 = vld [vmem:[%s9306_s2 + $0x314] ss:$24 sps:$4 sm:$0xff]   ;;  %v6260_v2 = vld [vmem:[%s9306_s2 + $0x300] ss:$24 sps:$4 sm:$0xff]  }
   0xf   : > { %1239 = vmatprep.subr.bf16.mxu1 %v6256_v0  ;;  %v6261_v3 = vld [vmem:[%s9306_s2 + $0x310] ss:$24 sps:$4 sm:$0xff]   ;;  %1465 = vmatprep.subr.bf16.mxu0 %v6258_v1  ;;  %v6262_v4 = vld [vmem:[%s9306_s2 + $0x334] ss:$24 sps:$4 sm:$0xff]   ;;  %v6264_v5 = vld [vmem:[%s9306_s2 + $0x344] ss:$24 sps:$4 sm:$0xff]  }
  0x10   : > { %1240 = vmatpush1.bf16.msra.mxu1 %v6260_v2  ;;  %1466 = vmatpush1.bf16.msra.mxu0 %v6261_v3  ;;  %v6266_v6 = vld [vmem:[%s9306_s2 + $0x330] ss:$24 sps:$4 sm:$0xff]   ;;  %v6267_v7 = vld [vmem:[%s9306_s2 + $0x340] ss:$24 sps:$4 sm:$0xff]   ;;  %v6268_v8 = vld [vmem:[%s9306_s2 + $0x364] ss:$24 sps:$4 sm:$0xff]  }
  0x11   : > { %1241 = vmatprep.subr.bf16.mxu1 %v6262_v4  ;;  %1467 = vmatprep.subr.bf16.mxu0 %v6264_v5  ;;  %v6270_v9 = vld [vmem:[%s9306_s2 + $0x374] ss:$24 sps:$4 sm:$0xff]   ;;  %v6272_v10 = vld [vmem:[%s9306_s2 + $0x360] ss:$24 sps:$4 sm:$0xff]   ;;  %v6273_v11 = vld [vmem:[%s9306_s2 + $0x370] ss:$24 sps:$4 sm:$0xff]  }
  0x12   : > { %v6274_v12 = vld [vmem:[%s9306_s2 + $0x394] ss:$24 sps:$4 sm:$0xff]   ;;  %v6276_v13 = vld [vmem:[%s9306_s2 + $0x3a4] ss:$24 sps:$4 sm:$0xff]   ;;  %v6278_v14 = vld [vmem:[%s9306_s2 + $0x390] ss:$24 sps:$4 sm:$0xff]  }
  0x13   : > { %v6279_v15 = vld [vmem:[%s9306_s2 + $0x3a0] ss:$24 sps:$4 sm:$0xff]   ;;  %v6280_v16 = vld [vmem:[%s9306_s2 + $0x3c4] ss:$24 sps:$4 sm:$0xff]   ;;  %v6282_v17 = vld [vmem:[%s9306_s2 + $0x3d4] ss:$24 sps:$4 sm:$0xff]  }
  0x14   : > { %1242 = vmatpush1.bf16.msra.mxu1 %v6266_v6  ;;  %1468 = vmatpush1.bf16.msra.mxu0 %v6267_v7  ;;  %v6284_v18 = vld [vmem:[%s9306_s2 + $0x3c0] ss:$24 sps:$4 sm:$0xff]   ;;  %v6285_v19 = vld [vmem:[%s9306_s2 + $0x3d0] ss:$24 sps:$4 sm:$0xff]   ;;  %v6286_v20 = vld [vmem:[%s9306_s2 + $0x3f4] ss:$24 sps:$4 sm:$0xff]  }
  0x15   : > { %1243 = vmatprep.subr.bf16.mxu1 %v6268_v8  ;;  %1469 = vmatprep.subr.bf16.mxu0 %v6270_v9  ;;  %v6288_v21 = vld [vmem:[%s9306_s2 + $0x404] ss:$24 sps:$4 sm:$0xff]   ;;  %v6290_v22 = vld [vmem:[%s9306_s2 + $0x3f0] ss:$24 sps:$4 sm:$0xff]   ;;  %v6291_v23 = vld [vmem:[%s9306_s2 + $0x400] ss:$24 sps:$4 sm:$0xff]  }
  0x16   : > { %v6292_v24 = vld [vmem:[%s9306_s2 + $0x424] ss:$24 sps:$4 sm:$0xff]   ;;  %v6294_v25 = vld [vmem:[%s9306_s2 + $0x434] ss:$24 sps:$4 sm:$0xff]   ;;  %v6296_v26 = vld [vmem:[%s9306_s2 + $0x420] ss:$24 sps:$4 sm:$0xff]  }
  0x17   : > { %v6297_v27 = vld [vmem:[%s9306_s2 + $0x430] ss:$24 sps:$4 sm:$0xff]   ;;  %v6298_v28 = vld [vmem:[%s9306_s2 + $0x454] ss:$24 sps:$4 sm:$0xff]   ;;  %v6300_v29 = vld [vmem:[%s9306_s2 + $0x464] ss:$24 sps:$4 sm:$0xff]  }
  0x18   : > { %1244 = vmatpush1.bf16.msra.mxu1 %v6272_v10  ;;  %1470 = vmatpush1.bf16.msra.mxu0 %v6273_v11  ;;  %v6302_v30 = vld [vmem:[%s9306_s2 + $0x450] ss:$24 sps:$4 sm:$0xff]   ;;  %p291_p4 = scmp.lt.s32.totalorder %s6946_s18, 1  ;;  %v6303_v31 = vld [vmem:[%s9306_s2 + $0x460] ss:$24 sps:$4 sm:$0xff]   ;;  %vm659_vm1 = vcmask 1047552  }
  0x19   : > { %1245 = vmatprep.subr.bf16.mxu1 %v6274_v12  ;;  %1471 = vmatprep.subr.bf16.mxu0 %v6276_v13  ;;  %v6304_v32 = vld [vmem:[%s9306_s2 + $0x484] ss:$24 sps:$4 sm:$0xff]   ;;  %v6306_v33 = vld [vmem:[%s9306_s2 + $0x494] ss:$24 sps:$4 sm:$0xff]   ;;  %v6308_v34 = vld [vmem:[%s9306_s2 + $0x480] ss:$24 sps:$4 sm:$0xff]  }
  0x1a   : > { %v6309_v35 = vld [vmem:[%s9306_s2 + $0x490] ss:$24 sps:$4 sm:$0xff]   ;;  %s9397_s18 = smov (!%p291_p4, %s6946_s18), 1  ;;  %v6310_v36 = vld [vmem:[%s9306_s2 + $0x4b4] ss:$24 sps:$4 sm:$0xff]   ;;  %vm2419_vm3 = vcmask 1046528  }
  0x1b   : > { %v6312_v37 = vld [vmem:[%s9306_s2 + $0x4c4] ss:$24 sps:$4 sm:$0xff]   ;;  %v6314_v38 = vld [vmem:[%s9306_s2 + $0x4b0] ss:$24 sps:$4 sm:$0xff]   ;;  %s6230_s12 = smul.u32 136, %s9397_s18  ;;  %s5829_s17 = sshll.u32 %s9397_s18, 3 }
  0x1c   : > { %1246 = vmatpush1.bf16.msra.mxu1 %v6278_v14  ;;  %1472 = vmatpush1.bf16.msra.mxu0 %v6279_v15  ;;  %v6315_v39 = vld [vmem:[%s9306_s2 + $0x4c0] ss:$24 sps:$4 sm:$0xff]   ;;  %v6316_v40 = vld [vmem:[%s9306_s2 + $0x4e4] ss:$24 sps:$4 sm:$0xff]   ;;  %v6318_v41 = vld [vmem:[%s9306_s2 + $0x4f4] ss:$24 sps:$4 sm:$0xff]   ;;  %s7485_s28 = scalar_lea.vmem %s9305_s1, %s5829_s17 }
  0x1d   : > { %1247 = vmatprep.subr.bf16.mxu1 %v6280_v16  ;;  %1473 = vmatprep.subr.bf16.mxu0 %v6282_v17  ;;  %v6320_v42 = vld [vmem:[%s9306_s2 + $0x4e0] ss:$24 sps:$4 sm:$0xff]   ;;  %v6321_v43 = vld [vmem:[%s9306_s2 + $0x4f0] ss:$24 sps:$4 sm:$0xff]   ;;  %s7146_s29 = scalar_lea.vmem %s9304_s0, %s6230_s12  ;;  %v6322_v44 = vld [vmem:[%s9306_s2 + $0x514] ss:$24 sps:$4 sm:$0xff]  }
  0x1e   : > { %v6324_v45 = vld [vmem:[%s9306_s2 + $0x524] ss:$24 sps:$4 sm:$0xff]   ;;  %v6326_v46 = vld [vmem:[%s9306_s2 + $0x510] ss:$24 sps:$4 sm:$0xff]   ;;  %v6327_v49 = vld [vmem:[%s9306_s2 + $0x520] ss:$24 sps:$4 sm:$0xff]  }
  0x1f   : > { %v324_v47 = vld [vmem:[%s7146_s29] sm:$0xff]  ;;  %v325_v48 = vld [vmem:[%s7146_s29 + $0x8] sm:$0xff]  ;;  %v7165_v51 = vld [vmem:[%s7146_s29 + $0x14] ss:$8 sps:$4 sm:$0xff]   ;;  %vm501_vm0 = vsmask.f32 7424 }
  0x20   : > { %1248 = vmatpush1.bf16.msra.mxu1 %v6284_v18  ;;  %1474 = vmatpush1.bf16.msra.mxu0 %v6285_v19  ;;  %v7162_v50 = vcombine.high %v324_v47, %v325_v48  ;;  %v6328_v52 = vld [vmem:[%s9306_s2 + $0x544] ss:$24 sps:$4 sm:$0xff]   ;;  %v6330_v53 = vld [vmem:[%s9306_s2 + $0x554] ss:$24 sps:$4 sm:$0xff]   ;;  %v522_v56 = vshll.u32 %v7165_v51, 16  ;;  %v7184_v61 = vcombine.low %v324_v47, %v325_v48  ;;  %v534_v17 = vshrl.u32 %v7165_v51, 16  ;;  %vm7578_vm2 = vmand %vm659_vm1, %vm501_vm0 }
  0x21   : > { %1249 = vmatprep.subr.bf16.mxu1 %v6286_v20  ;;  %1475 = vmatprep.subr.bf16.mxu0 %v6288_v21  ;;  %v6332_v57 = vld [vmem:[%s9306_s2 + $0x540] ss:$24 sps:$4 sm:$0xff]   ;;  %v6333_v58 = vld [vmem:[%s9306_s2 + $0x550] ss:$24 sps:$4 sm:$0xff]   ;;  %v6334_v62 = vld [vmem:[%s9306_s2 + $0x574] ss:$24 sps:$4 sm:$0xff]  }
  0x22   : > { %v515_v54 = vshrl.u32 %v7162_v50, 16  ;;  %v517_v55 = vshll.u32 %v7162_v50, 16  ;;  %v524_v60 = vrot.slane %v522_v56, 1  ;;  %v6336_v63 = vld [vmem:[%s9306_s2 + $0x584] ss:$24 sps:$4 sm:$0xff]   ;;  %v505_v5 = vshll.u32 %v7184_v61, 16 }
  0x23   : > { %v6338_v0 = vld [vmem:[%s9306_s2 + $0x570] ss:$24 sps:$4 sm:$0xff]   ;;  %v6339_v2 = vld [vmem:[%s9306_s2 + $0x580] ss:$24 sps:$4 sm:$0xff]   ;;  %v6340_v6 = vld [vmem:[%s9306_s2 + $0x5a4] ss:$24 sps:$4 sm:$0xff]  }
  0x24   : > { %1250 = vmatpush1.bf16.msra.mxu1 %v6290_v22  ;;  %1476 = vmatpush1.bf16.msra.mxu0 %v6291_v23  ;;  %v519_v59 = vrot.slane %v517_v55, 1  ;;  %v7202_v4 = vld [vmem:[%s7146_s29 + $0x10] ss:$8 sps:$4 sm:$0xff]   ;;  %v6342_v7 = vld [vmem:[%s9306_s2 + $0x5b4] ss:$24 sps:$4 sm:$0xff]   ;;  %v503_v11 = vshrl.u32 %v7184_v61, 16 }
  0x25   : > { %1251 = vmatprep.subr.bf16.mxu1 %v6292_v24  ;;  %1477 = vmatprep.subr.bf16.mxu0 %v6294_v25  ;;  %v6344_v8 = vld [vmem:[%s9306_s2 + $0x5a0] ss:$24 sps:$4 sm:$0xff]   ;;  %v7217_v9 = vld [vmem:[%s7146_s29 + $0x24] ss:$8 sps:$4 sm:$0xff]   ;;  %v6345_v10 = vld [vmem:[%s9306_s2 + $0x5b0] ss:$24 sps:$4 sm:$0xff]  }
  0x26   : > { %v520_v1 = vor.u32 %v519_v59, %v515_v54  ;;  %v507_v12 = vrot.slane %v505_v5, 1  ;;  %v510_v13 = vshll.u32 %v7202_v4, 16  ;;  %v6346_v14 = vld [vmem:[%s9306_s2 + $0x5d4] ss:$24 sps:$4 sm:$0xff]   ;;  %v6348_v15 = vld [vmem:[%s9306_s2 + $0x5e4] ss:$24 sps:$4 sm:$0xff]  }
  0x27   : > { %v6350_v16 = vld [vmem:[%s9306_s2 + $0x5d0] ss:$24 sps:$4 sm:$0xff]   ;;  %v9332_v18 = vshll.u32 %v7217_v9, 16  ;;  %v6351_v19 = vld [vmem:[%s9306_s2 + $0x5e0] ss:$24 sps:$4 sm:$0xff]   ;;  %s6231_s8 = smul.u32 80, %s9397_s18 }
  0x28   : > { %1252 = vmatpush1.bf16.msra.mxu1 %v6296_v26  ;;  %1478 = vmatpush1.bf16.msra.mxu0 %v6297_v27  ;;  %v7199_v3 = vsel %vm501_vm0, %v520_v1, %v524_v60  ;;  %v508_v20 = vor.u32 %v507_v12, %v503_v11  ;;  %v512_v21 = vrot.slane %v510_v13, 1  ;;  %v7241_v22 = vld [vmem:[%s7146_s29 + $0x20] ss:$8 sps:$4 sm:$0xff]   ;;  %v6359_v23 = vld [vmem:[%s9306_s2 + $0x30c] ss:$24 sps:$4 sm:$0xff]   ;;  %v536_v26 = vor.u32 %v534_v17, %v524_v60 }
  0x29   : > { %1253 = vmatprep.subr.bf16.mxu1 %v6298_v28  ;;  %1479 = vmatprep.subr.bf16.mxu0 %v6300_v29  ;;  %v6362_v24 = vld [vmem:[%s9306_s2 + $0x4] ss:$24 sps:$4 sm:$0xff]   ;;  %v6357_v25 = vld [vmem:[%s9306_s2 + $0x308] ss:$24 sps:$4 sm:$0xff]   ;;  %v540_v27 = vrot.slane %v9332_v18, 1  ;;  %s322_s11 = scalar_lea.vmem %s9309_s5, %s6231_s8 }
  0x2a   : > { %1271 = vmatprep.mubr.bf16.mxu1 %v7199_v3  ;;  %1497 = vmatprep.mubr.bf16.mxu0 %v7199_v3  ;;  %v7257_v28 = vld [vmem:[%s7146_s29 + $0x34] ss:$8 sps:$4 sm:$0xff]   ;;  %v7260_v29 = vsel %vm501_vm0, %v508_v20, %v512_v21  ;;  %v7309_v48 = vld [vmem:[%s7146_s29 + $0x44] ss:$8 sps:$4 sm:$0xff]   ;;  %v6381_v59 = vld [vmem:[%s9306_s2 + $0x90] ss:$24 sps:$4 sm:$0xff]  }
  0x2b   : > { %v6380_v55 = vld [vmem:[%s9306_s2 + $0x39c] ss:$24 sps:$4 sm:$0xff]   ;;  %v7346_v5 = vld [vmem:[%s7146_s29 + $0x40] ss:$8 sps:$4 sm:$0xff]   ;;  %vm3487_vm4 = vsmask.f32 6400 }
  0x2c   : > { %1254 = vmatpush1.bf16.msra.mxu1 %v6302_v30  ;;  %1480 = vmatpush1.bf16.msra.mxu0 %v6303_v31  ;;  %v6360_v30 = vld [vmem:[%s9306_s2] ss:$24 sps:$4 sm:$0xff]   ;;  %v526_v31 = vshrl.u32 %v7202_v4, 16  ;;  %v7364_v12 = vld [vmem:[%s7146_s29 + $0x54] ss:$8 sps:$4 sm:$0xff]   ;;  %vm8701_vm5 = vmand %vm2419_vm3, %vm3487_vm4 }
  0x2d   : > { %1255 = vmatprep.subr.bf16.mxu1 %v6304_v32  ;;  %1481 = vmatprep.subr.bf16.mxu0 %v6306_v33  ;;  %v9330_v32 = vshll.u32 %v7241_v22, 16  ;;  %v6365_v33 = vld [vmem:[%s9306_s2 + $0x33c] ss:$24 sps:$4 sm:$0xff]  }
  0x2e   : > { %v6398_v20 = vld [vmem:[%s9306_s2 + $0xf4] ss:$24 sps:$4 sm:$0xff]  }
  0x30   : > { %1256 = vmatpush1.bf16.msra.mxu1 %v6308_v34  ;;  %1482 = vmatpush1.bf16.msra.mxu0 %v6309_v35  ;;  %v6368_v34 = vld [vmem:[%s9306_s2 + $0x34] ss:$24 sps:$4 sm:$0xff]   ;;  %v6363_v35 = vld [vmem:[%s9306_s2 + $0x338] ss:$24 sps:$4 sm:$0xff]  }
  0x31   : > { %1257 = vmatprep.subr.bf16.mxu1 %v6310_v36  ;;  %1483 = vmatprep.subr.bf16.mxu0 %v6312_v37  ;;  %v6366_v36 = vld [vmem:[%s9306_s2 + $0x30] ss:$24 sps:$4 sm:$0xff]   ;;  %v7282_v37 = vsel %vm501_vm0, %v536_v26, %v540_v27  ;;  %v9325_v26 = vshrl.u32 %v7309_v48, 16 }
  0x34   : > { %1258 = vmatpush1.bf16.msra.mxu1 %v6314_v38  ;;  %1484 = vmatpush1.bf16.msra.mxu0 %v6315_v39  ;;  %v9333_v38 = vshrl.u32 %v7217_v9, 16  ;;  %v9328_v39 = vshll.u32 %v7257_v28, 16 }
  0x35   : > { %1259 = vmatprep.subr.bf16.mxu1 %v6316_v40  ;;  %1485 = vmatprep.subr.bf16.mxu0 %v6318_v41  ;;  %v528_v40 = vor.u32 %v526_v31, %v512_v21  ;;  %v532_v41 = vrot.slane %v9330_v32, 1  ;;  %v6393_v21 = vld [vmem:[%s9306_s2 + $0x3f8] ss:$24 sps:$4 sm:$0xff]  }
  0x36   : > { %v556_v47 = vrot.slane %v9328_v39, 1  ;;  %v6739_v39 = vld [vmem:[%s9306_s2 + $0x850] ss:$24 sps:$4 sm:$0xff]  }
  0x38   : > { %1260 = vmatpush1.bf16.msra.mxu1 %v6320_v42  ;;  %1486 = vmatpush1.bf16.msra.mxu0 %v6321_v43  ;;  %v6374_v42 = vld [vmem:[%s9306_s2 + $0x36c] ss:$24 sps:$4 sm:$0xff]   ;;  %v7294_v43 = vld [vmem:[%s7146_s29 + $0x30] ss:$8 sps:$4 sm:$0xff]  }
  0x39   : > { %1261 = vmatprep.subr.bf16.mxu1 %v6322_v44  ;;  %1487 = vmatprep.subr.bf16.mxu0 %v6324_v45  ;;  %v6377_v44 = vld [vmem:[%s9306_s2 + $0x64] ss:$24 sps:$4 sm:$0xff]   ;;  %v6372_v45 = vld [vmem:[%s9306_s2 + $0x368] ss:$24 sps:$4 sm:$0xff]   ;;  %v9326_v54 = vshll.u32 %v7294_v43, 16 }
  0x3b   : > { %v548_v1 = vrot.slane %v9326_v54, 1  ;;  %v6741_v54 = vld [vmem:[%s9306_s2 + $0x854] ss:$24 sps:$4 sm:$0xff]  }
  0x3c   : > { %1262 = vmatpush1.bf16.msra.mxu1 %v6326_v46  ;;  %1488 = vmatpush1.bf16.msra.mxu0 %v6327_v49  ;;  %v552_v46 = vor.u32 %v9333_v38, %v540_v27  ;;  %v7312_v49 = vsel %vm501_vm0, %v528_v40, %v532_v41  ;;  %v9318_v27 = vshll.u32 %v7364_v12, 16  ;;  %v6405_v40 = vld [vmem:[%s9306_s2 + $0x120] ss:$24 sps:$4 sm:$0xff]  }
  0x3d   : > { %1263 = vmatprep.subr.bf16.mxu1 %v6328_v52  ;;  %1489 = vmatprep.subr.bf16.mxu0 %v6330_v53  ;;  %v6375_v52 = vld [vmem:[%s9306_s2 + $0x60] ss:$24 sps:$4 sm:$0xff]   ;;  %v9331_v53 = vshrl.u32 %v7241_v22, 16 }
  0x3e   : > { %v7334_v60 = vsel %vm501_vm0, %v552_v46, %v556_v47  ;;  %v6410_v46 = vld [vmem:[%s9306_s2 + $0x45c] ss:$24 sps:$4 sm:$0xff]   ;;  %v6754_v38 = vld [vmem:[%s9306_s2 + $0xba8] ss:$24 sps:$4 sm:$0xff]  }
  0x40   : > { %1264 = vmatpush1.bf16.msra.mxu1 %v6332_v57  ;;  %1490 = vmatpush1.bf16.msra.mxu0 %v6333_v58  ;;  %v6383_v57 = vld [vmem:[%s9306_s2 + $0x94] ss:$24 sps:$4 sm:$0xff]   ;;  %v6378_v58 = vld [vmem:[%s9306_s2 + $0x398] ss:$24 sps:$4 sm:$0xff]  }
  0x41   : > { %1265 = vmatprep.subr.bf16.mxu1 %v6334_v62  ;;  %1491 = vmatprep.subr.bf16.mxu0 %v6336_v63  ;;  %v9329_v62 = vshrl.u32 %v7257_v28, 16  ;;  %v9324_v63 = vshll.u32 %v7309_v48, 16 }
  0x43   : > { %v572_v11 = vrot.slane %v9324_v63, 1 }
  0x44   : > { %1266 = vmatpush1.bf16.msra.mxu1 %v6338_v0  ;;  %1492 = vmatpush1.bf16.msra.mxu0 %v6339_v2  ;;  %v544_v0 = vor.u32 %v9331_v53, %v532_v41  ;;  %v6389_v2 = vld [vmem:[%s9306_s2 + $0x3cc] ss:$24 sps:$4 sm:$0xff]   ;;  %v3509_v53 = vrot.slane %v522_v56, 2 }
  0x45   : > { %1267 = vmatprep.subr.bf16.mxu1 %v6340_v6  ;;  %1493 = vmatprep.subr.bf16.mxu0 %v6342_v7  ;;  %v6392_v6 = vld [vmem:[%s9306_s2 + $0xc4] ss:$24 sps:$4 sm:$0xff]   ;;  %v6387_v7 = vld [vmem:[%s9306_s2 + $0x3c8] ss:$24 sps:$4 sm:$0xff]   ;;  %v584_v41 = vor.u32 %v9325_v26, %v572_v11 }
  0x46   : > { %v6756_v56 = vld [vmem:[%s9306_s2 + $0xbac] ss:$24 sps:$4 sm:$0xff]  }
  0x48   : > { %1268 = vmatpush1.bf16.msra.mxu1 %v6344_v8  ;;  %1494 = vmatpush1.bf16.msra.mxu0 %v6345_v10  ;;  %v6390_v8 = vld [vmem:[%s9306_s2 + $0xc0] ss:$24 sps:$4 sm:$0xff]   ;;  %v568_v10 = vor.u32 %v9329_v62, %v556_v47  ;;  %v9323_v47 = vshrl.u32 %v7346_v5, 16 }
  0x49   : > { %1269 = vmatprep.subr.bf16.mxu1 %v6346_v14  ;;  %1495 = vmatprep.subr.bf16.mxu0 %v6348_v15  ;;  %v7367_v14 = vsel %vm501_vm0, %v544_v0, %v548_v1  ;;  %v6395_v15 = vld [vmem:[%s9306_s2 + $0x3fc] ss:$24 sps:$4 sm:$0xff]  }
  0x4c   : > { %1270 = vmatpush1.bf16.msra.mxu1 %v6350_v16  ;;  %1496 = vmatpush1.bf16.msra.mxu0 %v6351_v19  ;;  %v9327_v16 = vshrl.u32 %v7294_v43, 16  ;;  %v9322_v19 = vshll.u32 %v7346_v5, 16 }
  0x4d   : > { %1352 = vmatprep.subr.bf16.mxu1 %v6359_v23  ;;  %2074 = vmatprep.subr.bf16.mxu0 %v6362_v24  ;;  %v6396_v23 = vld [vmem:[%s9306_s2 + $0xf0] ss:$24 sps:$4 sm:$0xff]   ;;  %v7386_v24 = vsel %vm501_vm0, %v568_v10, %v572_v11  ;;  %v6422_v10 = vld [vmem:[%s9306_s2 + $0x184] ss:$24 sps:$4 sm:$0xff]  }
  0x4e   : > { %v6417_v11 = vld [vmem:[%s9306_s2 + $0x488] ss:$24 sps:$4 sm:$0xff]  }
  0x4f   : > { %1272 = vmatmul.mubr.bf16.vlgmr.msra.gmra.mrb[0].mxu1 %v7260_v29  ;;  %1498 = vmatmul.mubr.bf16.vlgmr.msra.gmra.mrb[0].mxu0 %v7260_v29 }
  0x50   : > { %1353 = vmatpush1.bf16.msra.mxu1 %v6357_v25  ;;  %2075 = vmatpush1.bf16.msra.mxu0 %v6360_v30  ;;  %v6404_v25 = vld [vmem:[%s9306_s2 + $0x42c] ss:$24 sps:$4 sm:$0xff]   ;;  %v560_v30 = vor.u32 %v9327_v16, %v548_v1  ;;  %v6411_v1 = vld [vmem:[%s9306_s2 + $0x150] ss:$24 sps:$4 sm:$0xff]  }
  0x51   : > { %1354 = vmatprep.subr.bf16.mxu1 %v6365_v33  ;;  %2076 = vmatprep.subr.bf16.mxu0 %v6368_v34  ;;  %v564_v33 = vrot.slane %v9322_v19, 1  ;;  %v7398_v34 = vld [vmem:[%s7146_s29 + $0x50] ss:$8 sps:$4 sm:$0xff]   ;;  %v6729_v19 = vld [vmem:[%s9306_s2 + $0x7f4] ss:$24 sps:$4 sm:$0xff]  }
  0x52   : > { %1281 = vmatprep.mubr.bf16.mxu1 %v7282_v37  ;;  %1507 = vmatprep.mubr.bf16.mxu0 %v7282_v37 }
  0x54   : > { %1355 = vmatpush1.bf16.msra.mxu1 %v6363_v35  ;;  %2077 = vmatpush1.bf16.msra.mxu0 %v6366_v36  ;;  %v6407_v35 = vld [vmem:[%s9306_s2 + $0x124] ss:$24 sps:$4 sm:$0xff]   ;;  %v6402_v36 = vld [vmem:[%s9306_s2 + $0x428] ss:$24 sps:$4 sm:$0xff]  }
  0x55   : > { %1356 = vmatprep.subr.bf16.mxu1 %v6374_v42  ;;  %2078 = vmatprep.subr.bf16.mxu0 %v6377_v44  ;;  %v588_v42 = vrot.slane %v9318_v27, 1  ;;  %v7416_v44 = vld [vmem:[%s7146_s29 + $0x64] ss:$8 sps:$4 sm:$0xff]  }
  0x56   : > { %v9311_v0 = vshll.u32 %v7416_v44, 16 }
  0x57   : > { %1282 = vmatmul.mubr.bf16.gmra.mrb[4].mxu1 %v7312_v49  ;;  %1508 = vmatmul.mubr.bf16.gmra.mrb[4].mxu0 %v7312_v49 }
  0x58   : > { %1357 = vmatpush1.bf16.msra.mxu1 %v6372_v45  ;;  %2079 = vmatpush1.bf16.msra.mxu0 %v6375_v52  ;;  %v7419_v45 = vsel %vm501_vm0, %v560_v30, %v564_v33  ;;  %v9312_v52 = vshll.u32 %v7398_v34, 16  ;;  %v6425_v30 = vld [vmem:[%s9306_s2 + $0x4bc] ss:$24 sps:$4 sm:$0xff]  }
  0x59   : > { %1358 = vmatprep.subr.bf16.mxu1 %v6380_v55  ;;  %2080 = vmatprep.subr.bf16.mxu0 %v6383_v57  ;;  %v6413_v55 = vld [vmem:[%s9306_s2 + $0x154] ss:$24 sps:$4 sm:$0xff]   ;;  %v6408_v57 = vld [vmem:[%s9306_s2 + $0x458] ss:$24 sps:$4 sm:$0xff]  }
  0x5a   : > { %1291 = vmatprep.mubr.bf16.mxu1 %v7334_v60  ;;  %1517 = vmatprep.mubr.bf16.mxu0 %v7334_v60 }
  0x5c   : > { %1359 = vmatpush1.bf16.msra.mxu1 %v6378_v58  ;;  %2081 = vmatpush1.bf16.msra.mxu0 %v6381_v59  ;;  %v7435_v58 = vsel %vm501_vm0, %v584_v41, %v588_v42  ;;  %v9319_v59 = vshrl.u32 %v7364_v12, 16  ;;  %v6426_v41 = vld [vmem:[%s9306_s2 + $0x1b0] ss:$24 sps:$4 sm:$0xff]  }
  0x5d   : > { %1360 = vmatprep.subr.bf16.mxu1 %v6389_v2  ;;  %2082 = vmatprep.subr.bf16.mxu0 %v6392_v6  ;;  %v576_v2 = vor.u32 %v9323_v47, %v564_v33  ;;  %v580_v6 = vrot.slane %v9312_v52, 1  ;;  %v9315_v33 = vshrl.u32 %v7398_v34, 16 }
  0x5f   : > { %1292 = vmatmul.mubr.bf16.gmra.mrb[8].mxu1 %v7367_v14  ;;  %1518 = vmatmul.mubr.bf16.gmra.mrb[8].mxu0 %v7367_v14 }
  0x60   : > { %1361 = vmatpush1.bf16.msra.mxu1 %v6387_v7  ;;  %2083 = vmatpush1.bf16.msra.mxu0 %v6390_v8  ;;  %v7447_v7 = vld [vmem:[%s7146_s29 + $0x60] ss:$8 sps:$4 sm:$0xff]   ;;  %v6419_v8 = vld [vmem:[%s9306_s2 + $0x48c] ss:$24 sps:$4 sm:$0xff]  }
  0x61   : > { %1362 = vmatprep.subr.bf16.mxu1 %v6395_v15  ;;  %2084 = vmatprep.subr.bf16.mxu0 %v6398_v20  ;;  %v6420_v15 = vld [vmem:[%s9306_s2 + $0x180] ss:$24 sps:$4 sm:$0xff]   ;;  %v600_v20 = vor.u32 %v9319_v59, %v588_v42 }
  0x62   : > { %1301 = vmatprep.mubr.bf16.mxu1 %v7386_v24  ;;  %1527 = vmatprep.mubr.bf16.mxu0 %v7386_v24 }
  0x64   : > { %1363 = vmatpush1.bf16.msra.mxu1 %v6393_v21  ;;  %2085 = vmatpush1.bf16.msra.mxu0 %v6396_v23  ;;  %v604_v21 = vrot.slane %v9311_v0, 1  ;;  %v7469_v23 = vld [vmem:[%s7146_s29 + $0x74] ss:$8 sps:$4 sm:$0xff]   ;;  %v9317_v0 = vshrl.u32 %v7447_v7, 16 }
  0x65   : > { %1364 = vmatprep.subr.bf16.mxu1 %v6404_v25  ;;  %2086 = vmatprep.subr.bf16.mxu0 %v6407_v35  ;;  %v7472_v25 = vsel %vm501_vm0, %v576_v2, %v580_v6  ;;  %v9310_v35 = vshll.u32 %v7447_v7, 16  ;;  %v7505_v2 = vld [vmem:[%s7146_s29 + $0x70] ss:$8 sps:$4 sm:$0xff]  }
  0x66   : > { %v7496_v42 = vsel %vm501_vm0, %v600_v20, %v604_v21  ;;  %v9316_v52 = vshll.u32 %v7505_v2, 16  ;;  %v9320_v27 = vshrl.u32 %v7505_v2, 16 }
  0x67   : > { %1302 = vmatmul.mubr.bf16.gmra.mrb[12].mxu1 %v7419_v45  ;;  %1528 = vmatmul.mubr.bf16.gmra.mrb[12].mxu0 %v7419_v45 }
  0x68   : > { %1365 = vmatpush1.bf16.msra.mxu1 %v6402_v36  ;;  %2087 = vmatpush1.bf16.msra.mxu0 %v6405_v40  ;;  %v6428_v36 = vld [vmem:[%s9306_s2 + $0x1b4] ss:$24 sps:$4 sm:$0xff]   ;;  %v6423_v40 = vld [vmem:[%s9306_s2 + $0x4b8] ss:$24 sps:$4 sm:$0xff]  }
  0x69   : > { %1366 = vmatprep.subr.bf16.mxu1 %v6410_v46  ;;  %2088 = vmatprep.subr.bf16.mxu0 %v6413_v55  ;;  %v9314_v46 = vshrl.u32 %v7416_v44, 16  ;;  %v9313_v55 = vshll.u32 %v7469_v23, 16 }
  0x6a   : > { %1311 = vmatprep.mubr.bf16.mxu1 %v7435_v58  ;;  %1537 = vmatprep.mubr.bf16.mxu0 %v7435_v58 }
  0x6b   : > { %v620_v20 = vrot.slane %v9313_v55, 1  ;;  %v6441_v55 = vld [vmem:[%s9306_s2 + $0x210] ss:$24 sps:$4 sm:$0xff]  }
  0x6c   : > { %1367 = vmatpush1.bf16.msra.mxu1 %v6408_v57  ;;  %2089 = vmatpush1.bf16.msra.mxu0 %v6411_v1  ;;  %v592_v57 = vor.u32 %v9315_v33, %v580_v6  ;;  %v596_v1 = vrot.slane %v9310_v35, 1  ;;  %v6432_v6 = vld [vmem:[%s9306_s2 + $0x4e8] ss:$24 sps:$4 sm:$0xff]  }
  0x6d   : > { %1368 = vmatprep.subr.bf16.mxu1 %v6419_v8  ;;  %2090 = vmatprep.subr.bf16.mxu0 %v6422_v10  ;;  %v436_v8 = vld [vmem:[%s7485_s28] sm:$0x11] }
  0x6e   : > { %v6434_v10 = vld [vmem:[%s9306_s2 + $0x4ec] ss:$24 sps:$4 sm:$0xff]   ;;  %v6435_v35 = vld [vmem:[%s9306_s2 + $0x1e0] ss:$24 sps:$4 sm:$0xff]   ;;  %v7556_v33 = vcombine.low %v436_v8, %v436_v8 }
  0x6f   : > { %1312 = vmatmul.mubr.bf16.gmra.mrb[16].mxu1 %v7472_v25  ;;  %1538 = vmatmul.mubr.bf16.gmra.mrb[16].mxu0 %v7472_v25 }
  0x70   : > { %1369 = vmatpush1.bf16.msra.mxu1 %v6417_v11  ;;  %2091 = vmatpush1.bf16.msra.mxu0 %v6420_v15  ;;  %v6437_v11 = vld [vmem:[%s9306_s2 + $0x1e4] ss:$24 sps:$4 sm:$0xff]   ;;  %v616_v15 = vor.u32 %v9314_v46, %v604_v21  ;;  %v608_v46 = vor.u32 %v9317_v0, %v596_v1  ;;  %v650_v59 = vshll.u32 %v7556_v33, 16  ;;  %v6472_v0 = vld [vmem:[%s9306_s2 + $0x2d4] ss:$24 sps:$4 sm:$0xff]  }
  0x71   : > { %1370 = vmatprep.subr.bf16.mxu1 %v6425_v30  ;;  %2092 = vmatprep.subr.bf16.mxu0 %v6428_v36  ;;  %v7523_v30 = vcombine.high %v436_v8, %v436_v8  ;;  %v7526_v36 = vsel %vm501_vm0, %v592_v57, %v596_v1  ;;  %v6440_v21 = vld [vmem:[%s9306_s2 + $0x51c] ss:$24 sps:$4 sm:$0xff]   ;;  %v9321_v57 = vshrl.u32 %v7469_v23, 16  ;;  %v6447_v1 = vld [vmem:[%s9306_s2 + $0x548] ss:$24 sps:$4 sm:$0xff]  }
  0x72   : > { %1321 = vmatprep.mubr.bf16.mxu1 %v7496_v42  ;;  %1547 = vmatprep.mubr.bf16.mxu0 %v7496_v42 }
  0x73   : > { %v627_v8 = vor.u32 %v9321_v57, %v620_v20 }
  0x74   : > { %1371 = vmatpush1.bf16.msra.mxu1 %v6423_v40  ;;  %2093 = vmatpush1.bf16.msra.mxu0 %v6426_v41  ;;  %v6443_v40 = vld [vmem:[%s9306_s2 + $0x214] ss:$24 sps:$4 sm:$0xff]   ;;  %v7542_v41 = vsel %vm501_vm0, %v616_v15, %v620_v20  ;;  %v612_v15 = vrot.slane %v9316_v52, 1  ;;  %v6450_v52 = vld [vmem:[%s9306_s2 + $0x240] ss:$24 sps:$4 sm:$0xff]  }
  0x75   : > { %1372 = vmatprep.subr.bf16.mxu1 %v6434_v10  ;;  %2094 = vmatprep.subr.bf16.mxu0 %v6437_v11  ;;  %v654_v10 = vshll.u32 %v7523_v30, 16  ;;  %v6438_v11 = vld [vmem:[%s9306_s2 + $0x518] ss:$24 sps:$4 sm:$0xff]  }
  0x77   : > { %1322 = vmatmul.mubr.bf16.gmra.mrb[20].mxu1 %v7526_v36  ;;  %1548 = vmatmul.mubr.bf16.gmra.mrb[20].mxu0 %v7526_v36 }
  0x78   : > { %1373 = vmatpush1.bf16.msra.mxu1 %v6432_v6  ;;  %2095 = vmatpush1.bf16.msra.mxu0 %v6435_v35  ;;  %v6449_v35 = vld [vmem:[%s9306_s2 + $0x54c] ss:$24 sps:$4 sm:$0xff]  }
  0x79   : > { %1374 = vmatprep.subr.bf16.mxu1 %v6440_v21  ;;  %2096 = vmatprep.subr.bf16.mxu0 %v6443_v40  ;;  %v6452_v6 = vld [vmem:[%s9306_s2 + $0x244] ss:$24 sps:$4 sm:$0xff]   ;;  %v656_v21 = vrot.slane %v654_v10, 1  ;;  %v7572_v40 = vsel %vm501_vm0, %v608_v46, %v612_v15  ;;  %v6453_v10 = vld [vmem:[%s9306_s2 + $0x578] ss:$24 sps:$4 sm:$0xff]  }
  0x7a   : > { %1331 = vmatprep.mubr.bf16.mxu1 %v7542_v41  ;;  %1557 = vmatprep.mubr.bf16.mxu0 %v7542_v41  ;;  %v6455_v46 = vld [vmem:[%s9306_s2 + $0x57c] ss:$24 sps:$4 sm:$0xff]  }
  0x7b   : > { %v7594_v20 = vsel %vm7578_vm2, %v627_v8, %v656_v21  ;;  %v6463_v8 = vld [vmem:[%s9306_s2 + $0x5ac] ss:$24 sps:$4 sm:$0xff]   ;;  %v6469_v21 = vld [vmem:[%s9306_s2 + $0x5dc] ss:$24 sps:$4 sm:$0xff]  }
  0x7c   : > { %1375 = vmatpush1.bf16.msra.mxu1 %v6438_v11  ;;  %2097 = vmatpush1.bf16.msra.mxu0 %v6441_v55  ;;  %v6458_v55 = vld [vmem:[%s9306_s2 + $0x274] ss:$24 sps:$4 sm:$0xff]   ;;  %v6456_v11 = vld [vmem:[%s9306_s2 + $0x270] ss:$24 sps:$4 sm:$0xff]  }
  0x7d   : > { %1376 = vmatprep.subr.bf16.mxu1 %v6449_v35  ;;  %2098 = vmatprep.subr.bf16.mxu0 %v6452_v6  ;;  %v624_v35 = vor.u32 %v9320_v27, %v612_v15  ;;  %v652_v6 = vrot.slane %v650_v59, 1  ;;  %v6461_v59 = vld [vmem:[%s9306_s2 + $0x5a8] ss:$24 sps:$4 sm:$0xff]  }
  0x7f   : > { %1332 = vmatmul.mubr.bf16.gmra.mrb[24].mxu1 %v7572_v40  ;;  %1558 = vmatmul.mubr.bf16.gmra.mrb[24].mxu0 %v7572_v40  ;;  %v7614_v15 = vsel %vm7578_vm2, %v624_v35, %v652_v6  ;;  %v6473_v35 = vld [vmem:[%s9306_s2 + $0x8] ss:$24 sps:$4 sm:$0xff]  }
  0x80   : > { %1377 = vmatpush1.bf16.msra.mxu1 %v6447_v1  ;;  %2099 = vmatpush1.bf16.msra.mxu0 %v6450_v52  ;;  %v6466_v52 = vld [vmem:[%s9306_s2 + $0x2a4] ss:$24 sps:$4 sm:$0xff]   ;;  %v6464_v1 = vld [vmem:[%s9306_s2 + $0x2a0] ss:$24 sps:$4 sm:$0xff]   ;;  %v6476_v6 = vld [vmem:[%s9306_s2 + $0x10] ss:$24 sps:$4 sm:$0xff]  }
  0x81   : > { %1378 = vmatprep.subr.bf16.mxu1 %v6455_v46  ;;  %2100 = vmatprep.subr.bf16.mxu0 %v6458_v55  ;;  %v6467_v46 = vld [vmem:[%s9306_s2 + $0x5d8] ss:$24 sps:$4 sm:$0xff]  }
  0x82   : > { %1341 = vmatprep.mubr.bf16.mxu1 %v7594_v20  ;;  %1567 = vmatprep.mubr.bf16.mxu0 %v7594_v20  ;;  %v6470_v55 = vld [vmem:[%s9306_s2 + $0x2d0] ss:$24 sps:$4 sm:$0xff]  }
  0x84   : > { %1379 = vmatpush1.bf16.msra.mxu1 %v6453_v10  ;;  %2101 = vmatpush1.bf16.msra.mxu0 %v6456_v11  ;;  %v6475_v10 = vld [vmem:[%s9306_s2 + $0xc] ss:$24 sps:$4 sm:$0xff]  }
  0x85   : > { %1380 = vmatprep.subr.bf16.mxu1 %v6463_v8  ;;  %2102 = vmatprep.subr.bf16.mxu0 %v6466_v52  ;;  %v6478_v11 = vld [vmem:[%s9306_s2 + $0x14] ss:$24 sps:$4 sm:$0xff]   ;;  %v6479_v52 = vld [vmem:[%s9306_s2 + $0x38] ss:$24 sps:$4 sm:$0xff]  }
  0x86   : > { %v6481_v8 = vld [vmem:[%s9306_s2 + $0x3c] ss:$24 sps:$4 sm:$0xff]  }
  0x87   : > { %1342 = vmatmul.mubr.bf16.gmra.mrb[28].mxu1 %v7614_v15  ;;  %1568 = vmatmul.mubr.bf16.gmra.mrb[28].mxu0 %v7614_v15 }
  0x88   : > { %1381 = vmatpush1.bf16.msra.mxu1 %v6461_v59  ;;  %2103 = vmatpush1.bf16.msra.mxu0 %v6464_v1  ;;  %v6482_v59 = vld [vmem:[%s9306_s2 + $0x40] ss:$24 sps:$4 sm:$0xff]   ;;  %v6487_v1 = vld [vmem:[%s9306_s2 + $0x6c] ss:$24 sps:$4 sm:$0xff]  }
  0x89   : > { %1382 = vmatprep.subr.bf16.mxu1 %v6469_v21  ;;  %2104 = vmatprep.subr.bf16.mxu0 %v6472_v0  ;;  %v6485_v21 = vld [vmem:[%s9306_s2 + $0x68] ss:$24 sps:$4 sm:$0xff]  }
  0x8a   : > { %1384 = vmatprep.mubr.bf16.mxu1 %v7199_v3  ;;  %2106 = vmatprep.mubr.bf16.mxu0 %v7162_v50  ;;  %v6484_v3 = vld [vmem:[%s9306_s2 + $0x44] ss:$24 sps:$4 sm:$0xff]   ;;  %v6488_v0 = vld [vmem:[%s9306_s2 + $0x70] ss:$24 sps:$4 sm:$0xff]  }
  0x8c   : > { %1383 = vmatpush1.bf16.msra.mxu1 %v6467_v46  ;;  %2105 = vmatpush1.bf16.msra.mxu0 %v6470_v55  ;;  %v6493_v46 = vld [vmem:[%s9306_s2 + $0x9c] ss:$24 sps:$4 sm:$0xff]   ;;  %v6491_v55 = vld [vmem:[%s9306_s2 + $0x98] ss:$24 sps:$4 sm:$0xff]  }
  0x8d   : > { %2187 = vmatprep.subr.bf16.mxu1 %v6475_v10  ;;  %2300 = vmatprep.subr.bf16.mxu0 %v6478_v11  ;;  %v6494_v10 = vld [vmem:[%s9306_s2 + $0xa0] ss:$24 sps:$4 sm:$0xff]   ;;  %v6499_v11 = vld [vmem:[%s9306_s2 + $0xcc] ss:$24 sps:$4 sm:$0xff]  }
  0x8f   : > { %1385 = vmatmul.mubr.bf16.vlgmr.msra.gmra.mrb[32].mxu1 %v7260_v29  ;;  %2107 = vmatmul.mubr.bf16.vlgmr.msra.gmra.mrb[32].mxu0 %v7184_v61  ;;  %v6490_v29 = vld [vmem:[%s9306_s2 + $0x74] ss:$24 sps:$4 sm:$0xff]  }
  0x90   : > { %2188 = vmatpush1.bf16.msra.mxu1 %v6473_v35  ;;  %2301 = vmatpush1.bf16.msra.mxu0 %v6476_v6  ;;  %v6497_v35 = vld [vmem:[%s9306_s2 + $0xc8] ss:$24 sps:$4 sm:$0xff]  }
  0x91   : > { %2189 = vmatprep.subr.bf16.mxu1 %v6481_v8  ;;  %2302 = vmatprep.subr.bf16.mxu0 %v6484_v3  ;;  %v6500_v6 = vld [vmem:[%s9306_s2 + $0xd0] ss:$24 sps:$4 sm:$0xff]   ;;  %v6505_v8 = vld [vmem:[%s9306_s2 + $0xfc] ss:$24 sps:$4 sm:$0xff]  }
  0x92   : > { %1394 = vmatprep.mubr.bf16.mxu1 %v7282_v37  ;;  %2116 = vmatprep.mubr.bf16.mxu0 %v7165_v51  ;;  %v6496_v37 = vld [vmem:[%s9306_s2 + $0xa4] ss:$24 sps:$4 sm:$0xff]   ;;  %v6503_v3 = vld [vmem:[%s9306_s2 + $0xf8] ss:$24 sps:$4 sm:$0xff]   ;;  %v6753_v51 = vld [vmem:[%s9306_s2 + $0x8b4] ss:$24 sps:$4 sm:$0xff]  }
  0x94   : > { %2190 = vmatpush1.bf16.msra.mxu1 %v6479_v52  ;;  %2303 = vmatpush1.bf16.msra.mxu0 %v6482_v59  ;;  %v6506_v52 = vld [vmem:[%s9306_s2 + $0x100] ss:$24 sps:$4 sm:$0xff]   ;;  %v6511_v59 = vld [vmem:[%s9306_s2 + $0x12c] ss:$24 sps:$4 sm:$0xff]  }
  0x95   : > { %2191 = vmatprep.subr.bf16.mxu1 %v6487_v1  ;;  %2304 = vmatprep.subr.bf16.mxu0 %v6490_v29  ;;  %v6509_v1 = vld [vmem:[%s9306_s2 + $0x128] ss:$24 sps:$4 sm:$0xff]  }
  0x96   : > { %v6512_v29 = vld [vmem:[%s9306_s2 + $0x130] ss:$24 sps:$4 sm:$0xff]  }
  0x97   : > { %1395 = vmatmul.mubr.bf16.gmra.mrb[36].mxu1 %v7312_v49  ;;  %2117 = vmatmul.mubr.bf16.gmra.mrb[36].mxu0 %v7202_v4  ;;  %v6502_v49 = vld [vmem:[%s9306_s2 + $0xd4] ss:$24 sps:$4 sm:$0xff]   ;;  %v6569_v4 = vld [vmem:[%s9306_s2 + $0x600] ss:$24 sps:$4 sm:$0xff]  }
  0x98   : > { %2192 = vmatpush1.bf16.msra.mxu1 %v6485_v21  ;;  %2305 = vmatpush1.bf16.msra.mxu0 %v6488_v0  ;;  %v6517_v21 = vld [vmem:[%s9306_s2 + $0x15c] ss:$24 sps:$4 sm:$0xff]   ;;  %v6515_v0 = vld [vmem:[%s9306_s2 + $0x158] ss:$24 sps:$4 sm:$0xff]  }
  0x99   : > { %2193 = vmatprep.subr.bf16.mxu1 %v6493_v46  ;;  %2306 = vmatprep.subr.bf16.mxu0 %v6496_v37  ;;  %v6518_v46 = vld [vmem:[%s9306_s2 + $0x160] ss:$24 sps:$4 sm:$0xff]   ;;  %v6523_v37 = vld [vmem:[%s9306_s2 + $0x18c] ss:$24 sps:$4 sm:$0xff]  }
  0x9a   : > { %1404 = vmatprep.mubr.bf16.mxu1 %v7334_v60  ;;  %2126 = vmatprep.mubr.bf16.mxu0 %v7217_v9  ;;  %v6508_v60 = vld [vmem:[%s9306_s2 + $0x104] ss:$24 sps:$4 sm:$0xff]  }
  0x9c   : > { %2194 = vmatpush1.bf16.msra.mxu1 %v6491_v55  ;;  %2307 = vmatpush1.bf16.msra.mxu0 %v6494_v10  ;;  %v6521_v55 = vld [vmem:[%s9306_s2 + $0x188] ss:$24 sps:$4 sm:$0xff]  }
  0x9d   : > { %2195 = vmatprep.subr.bf16.mxu1 %v6499_v11  ;;  %2308 = vmatprep.subr.bf16.mxu0 %v6502_v49  ;;  %v6524_v10 = vld [vmem:[%s9306_s2 + $0x190] ss:$24 sps:$4 sm:$0xff]   ;;  %v6529_v11 = vld [vmem:[%s9306_s2 + $0x1bc] ss:$24 sps:$4 sm:$0xff]  }
  0x9e   : > { %v6527_v49 = vld [vmem:[%s9306_s2 + $0x1b8] ss:$24 sps:$4 sm:$0xff]  }
  0x9f   : > { %1405 = vmatmul.mubr.bf16.gmra.mrb[40].mxu1 %v7367_v14  ;;  %2127 = vmatmul.mubr.bf16.gmra.mrb[40].mxu0 %v7241_v22  ;;  %v6514_v14 = vld [vmem:[%s9306_s2 + $0x134] ss:$24 sps:$4 sm:$0xff]  }
  0xa0   : > { %2196 = vmatpush1.bf16.msra.mxu1 %v6497_v35  ;;  %2309 = vmatpush1.bf16.msra.mxu0 %v6500_v6  ;;  %v6530_v35 = vld [vmem:[%s9306_s2 + $0x1c0] ss:$24 sps:$4 sm:$0xff]   ;;  %v6535_v6 = vld [vmem:[%s9306_s2 + $0x1ec] ss:$24 sps:$4 sm:$0xff]  }
  0xa1   : > { %2197 = vmatprep.subr.bf16.mxu1 %v6505_v8  ;;  %2310 = vmatprep.subr.bf16.mxu0 %v6508_v60  ;;  %v6533_v8 = vld [vmem:[%s9306_s2 + $0x1e8] ss:$24 sps:$4 sm:$0xff]  }
  0xa2   : > { %1414 = vmatprep.mubr.bf16.mxu1 %v7386_v24  ;;  %2136 = vmatprep.mubr.bf16.mxu0 %v7257_v28  ;;  %v6520_v24 = vld [vmem:[%s9306_s2 + $0x164] ss:$24 sps:$4 sm:$0xff]   ;;  %v6536_v60 = vld [vmem:[%s9306_s2 + $0x1f0] ss:$24 sps:$4 sm:$0xff]  }
  0xa4   : > { %2198 = vmatpush1.bf16.msra.mxu1 %v6503_v3  ;;  %2311 = vmatpush1.bf16.msra.mxu0 %v6506_v52  ;;  %v6541_v3 = vld [vmem:[%s9306_s2 + $0x21c] ss:$24 sps:$4 sm:$0xff]   ;;  %v6539_v52 = vld [vmem:[%s9306_s2 + $0x218] ss:$24 sps:$4 sm:$0xff]  }
  0xa5   : > { %2199 = vmatprep.subr.bf16.mxu1 %v6511_v59  ;;  %2312 = vmatprep.subr.bf16.mxu0 %v6514_v14  ;;  %v6542_v59 = vld [vmem:[%s9306_s2 + $0x220] ss:$24 sps:$4 sm:$0xff]   ;;  %v6547_v14 = vld [vmem:[%s9306_s2 + $0x24c] ss:$24 sps:$4 sm:$0xff]  }
  0xa7   : > { %1415 = vmatmul.mubr.bf16.gmra.mrb[44].mxu1 %v7419_v45  ;;  %2137 = vmatmul.mubr.bf16.gmra.mrb[44].mxu0 %v7294_v43  ;;  %v6526_v45 = vld [vmem:[%s9306_s2 + $0x194] ss:$24 sps:$4 sm:$0xff]  }
  0xa8   : > { %2200 = vmatpush1.bf16.msra.mxu1 %v6509_v1  ;;  %2313 = vmatpush1.bf16.msra.mxu0 %v6512_v29  ;;  %v6545_v1 = vld [vmem:[%s9306_s2 + $0x248] ss:$24 sps:$4 sm:$0xff]  }
  0xa9   : > { %2201 = vmatprep.subr.bf16.mxu1 %v6517_v21  ;;  %2314 = vmatprep.subr.bf16.mxu0 %v6520_v24  ;;  %v6548_v29 = vld [vmem:[%s9306_s2 + $0x250] ss:$24 sps:$4 sm:$0xff]   ;;  %v6553_v21 = vld [vmem:[%s9306_s2 + $0x27c] ss:$24 sps:$4 sm:$0xff]  }
  0xaa   : > { %1424 = vmatprep.mubr.bf16.mxu1 %v7435_v58  ;;  %2146 = vmatprep.mubr.bf16.mxu0 %v7309_v48  ;;  %v6532_v58 = vld [vmem:[%s9306_s2 + $0x1c4] ss:$24 sps:$4 sm:$0xff]   ;;  %v6551_v24 = vld [vmem:[%s9306_s2 + $0x278] ss:$24 sps:$4 sm:$0xff]  }
  0xac   : > { %2202 = vmatpush1.bf16.msra.mxu1 %v6515_v0  ;;  %2315 = vmatpush1.bf16.msra.mxu0 %v6518_v46  ;;  %v6554_v0 = vld [vmem:[%s9306_s2 + $0x280] ss:$24 sps:$4 sm:$0xff]   ;;  %v6559_v46 = vld [vmem:[%s9306_s2 + $0x2ac] ss:$24 sps:$4 sm:$0xff]  }
  0xad   : > { %2203 = vmatprep.subr.bf16.mxu1 %v6523_v37  ;;  %2316 = vmatprep.subr.bf16.mxu0 %v6526_v45  ;;  %v6557_v37 = vld [vmem:[%s9306_s2 + $0x2a8] ss:$24 sps:$4 sm:$0xff]  }
  0xae   : > { %v6560_v45 = vld [vmem:[%s9306_s2 + $0x2b0] ss:$24 sps:$4 sm:$0xff]  }
  0xaf   : > { %1425 = vmatmul.mubr.bf16.gmra.mrb[48].mxu1 %v7472_v25  ;;  %2147 = vmatmul.mubr.bf16.gmra.mrb[48].mxu0 %v7346_v5  ;;  %v6538_v25 = vld [vmem:[%s9306_s2 + $0x1f4] ss:$24 sps:$4 sm:$0xff]  }
  0xb0   : > { %2204 = vmatpush1.bf16.msra.mxu1 %v6521_v55  ;;  %2317 = vmatpush1.bf16.msra.mxu0 %v6524_v10  ;;  %v6565_v55 = vld [vmem:[%s9306_s2 + $0x2dc] ss:$24 sps:$4 sm:$0xff]   ;;  %v3497_v10 = vrot.slane %v510_v13, 2 }
  0xb1   : > { %2205 = vmatprep.subr.bf16.mxu1 %v6529_v11  ;;  %2318 = vmatprep.subr.bf16.mxu0 %v6532_v58  ;;  %v6563_v11 = vld [vmem:[%s9306_s2 + $0x2d8] ss:$24 sps:$4 sm:$0xff]   ;;  %v3496_v58 = vrot.slane %v526_v31, 1  ;;  %v6571_v13 = vld [vmem:[%s9306_s2 + $0x604] ss:$24 sps:$4 sm:$0xff]  }
  0xb2   : > { %1434 = vmatprep.mubr.bf16.mxu1 %v7496_v42  ;;  %2156 = vmatprep.mubr.bf16.mxu0 %v7364_v12  ;;  %v6544_v42 = vld [vmem:[%s9306_s2 + $0x224] ss:$24 sps:$4 sm:$0xff]   ;;  %v6572_v31 = vld [vmem:[%s9306_s2 + $0x608] ss:$24 sps:$4 sm:$0xff]  }
  0xb4   : > { %2206 = vmatpush1.bf16.msra.mxu1 %v6527_v49  ;;  %2319 = vmatpush1.bf16.msra.mxu0 %v6530_v35  ;;  %v6566_v49 = vld [vmem:[%s9306_s2 + $0x2e0] ss:$24 sps:$4 sm:$0xff]   ;;  %v6577_v35 = vld [vmem:[%s9306_s2 + $0x634] ss:$24 sps:$4 sm:$0xff]  }
  0xb5   : > { %2207 = vmatprep.subr.bf16.mxu1 %v6535_v6  ;;  %2320 = vmatprep.subr.bf16.mxu0 %v6538_v25  ;;  %v7881_v6 = vor.u32 %v3497_v10, %v3496_v58  ;;  %v6575_v25 = vld [vmem:[%s9306_s2 + $0x630] ss:$24 sps:$4 sm:$0xff]   ;;  %v6607_v10 = vld [vmem:[%s9306_s2 + $0x724] ss:$24 sps:$4 sm:$0xff]  }
  0xb6   : > { %v7969_v58 = vld [vmem:[%s7146_s29 + $0x34] ss:$8 sps:$4 sm:$0xff]  }
  0xb7   : > { %1435 = vmatmul.mubr.bf16.gmra.mrb[52].mxu1 %v7526_v36  ;;  %2157 = vmatmul.mubr.bf16.gmra.mrb[52].mxu0 %v7398_v34  ;;  %v6550_v36 = vld [vmem:[%s9306_s2 + $0x254] ss:$24 sps:$4 sm:$0xff]  }
  0xb8   : > { %2208 = vmatpush1.bf16.msra.mxu1 %v6533_v8  ;;  %2321 = vmatpush1.bf16.msra.mxu0 %v6536_v60  ;;  %v6578_v8 = vld [vmem:[%s9306_s2 + $0x638] ss:$24 sps:$4 sm:$0xff]   ;;  %v6583_v60 = vld [vmem:[%s9306_s2 + $0x664] ss:$24 sps:$4 sm:$0xff]  }
  0xb9   : > { %2209 = vmatprep.subr.bf16.mxu1 %v6541_v3  ;;  %2322 = vmatprep.subr.bf16.mxu0 %v6544_v42  ;;  %v7901_v3 = vld [vmem:[%s7146_s29 + $0x14] ss:$8 sps:$4 sm:$0xff]   ;;  %v6581_v42 = vld [vmem:[%s9306_s2 + $0x660] ss:$24 sps:$4 sm:$0xff]  }
  0xba   : > { %1444 = vmatprep.mubr.bf16.mxu1 %v7542_v41  ;;  %2166 = vmatprep.mubr.bf16.mxu0 %v7416_v44  ;;  %v6556_v41 = vld [vmem:[%s9306_s2 + $0x284] ss:$24 sps:$4 sm:$0xff]  }
  0xbc   : > { %2210 = vmatpush1.bf16.msra.mxu1 %v6539_v52  ;;  %2323 = vmatpush1.bf16.msra.mxu0 %v6542_v59  ;;  %v6584_v52 = vld [vmem:[%s9306_s2 + $0x668] ss:$24 sps:$4 sm:$0xff]   ;;  %v6589_v59 = vld [vmem:[%s9306_s2 + $0x694] ss:$24 sps:$4 sm:$0xff]  }
  0xbd   : > { %2211 = vmatprep.subr.bf16.mxu1 %v6547_v14  ;;  %2324 = vmatprep.subr.bf16.mxu0 %v6550_v36  ;;  %v6592_v14 = vld [vmem:[%s9306_s2 + $0x69c] ss:$24 sps:$4 sm:$0xff]   ;;  %v7918_v36 = vld [vmem:[%s7146_s29 + $0x10] ss:$8 sps:$4 sm:$0xff]  }
  0xbf   : > { %1445 = vmatmul.mubr.bf16.gmra.mrb[56].mxu1 %v7572_v40  ;;  %2167 = vmatmul.mubr.bf16.gmra.mrb[56].mxu0 %v7447_v7  ;;  %v6562_v40 = vld [vmem:[%s9306_s2 + $0x2b4] ss:$24 sps:$4 sm:$0xff]  }
  0xc0   : > { %2212 = vmatpush1.bf16.msra.mxu1 %v6545_v1  ;;  %2325 = vmatpush1.bf16.msra.mxu0 %v6548_v29  ;;  %v6587_v1 = vld [vmem:[%s9306_s2 + $0x690] ss:$24 sps:$4 sm:$0xff]  }
  0xc1   : > { %2213 = vmatprep.subr.bf16.mxu1 %v6553_v21  ;;  %2326 = vmatprep.subr.bf16.mxu0 %v6556_v41  ;;  %v6590_v29 = vld [vmem:[%s9306_s2 + $0x698] ss:$24 sps:$4 sm:$0xff]   ;;  %v6595_v21 = vld [vmem:[%s9306_s2 + $0x6c4] ss:$24 sps:$4 sm:$0xff]  }
  0xc2   : > { %1454 = vmatprep.mubr.bf16.mxu1 %v7594_v20  ;;  %2176 = vmatprep.mubr.bf16.mxu0 %v7469_v23  ;;  %v6568_v20 = vld [vmem:[%s9306_s2 + $0x2e4] ss:$24 sps:$4 sm:$0xff]  }
  0xc3   : > { %v6598_v41 = vld [vmem:[%s9306_s2 + $0x6cc] ss:$24 sps:$4 sm:$0xff]  }
  0xc4   : > { %2214 = vmatpush1.bf16.msra.mxu1 %v6551_v24  ;;  %2327 = vmatpush1.bf16.msra.mxu0 %v6554_v0  ;;  %v7935_v24 = vld [vmem:[%s7146_s29 + $0x24] ss:$8 sps:$4 sm:$0xff]   ;;  %v6593_v0 = vld [vmem:[%s9306_s2 + $0x6c0] ss:$24 sps:$4 sm:$0xff]  }
  0xc5   : > { %2215 = vmatprep.subr.bf16.mxu1 %v6559_v46  ;;  %2328 = vmatprep.subr.bf16.mxu0 %v6562_v40  ;;  %v6596_v46 = vld [vmem:[%s9306_s2 + $0x6c8] ss:$24 sps:$4 sm:$0xff]   ;;  %v6601_v40 = vld [vmem:[%s9306_s2 + $0x6f4] ss:$24 sps:$4 sm:$0xff]  }
  0xc7   : > { %1455 = vmatmul.mubr.bf16.gmra.mrb[60].mxu1 %v7614_v15  ;;  %2177 = vmatmul.mubr.bf16.gmra.mrb[60].mxu0 %v7505_v2  ;;  %v6574_v15 = vld [vmem:[%s9306_s2 + $0x60c] ss:$24 sps:$4 sm:$0xff]  }
  0xc8   : > { %2216 = vmatpush1.bf16.msra.mxu1 %v6557_v37  ;;  %2329 = vmatpush1.bf16.msra.mxu0 %v6560_v45  ;;  %v6604_v37 = vld [vmem:[%s9306_s2 + $0x6fc] ss:$24 sps:$4 sm:$0xff]   ;;  %v7952_v45 = vld [vmem:[%s7146_s29 + $0x20] ss:$8 sps:$4 sm:$0xff]  }
  0xc9   : > { %2217 = vmatprep.subr.bf16.mxu1 %v6565_v55  ;;  %2330 = vmatprep.subr.bf16.mxu0 %v6568_v20  ;;  %v6599_v55 = vld [vmem:[%s9306_s2 + $0x6f0] ss:$24 sps:$4 sm:$0xff]  }
  0xca   : > { %2219 = vmatprep.mubr.bf16.mxu1 %v7162_v50  ;;  %2332 = vmatprep.mubr.bf16.mxu0 %v7162_v50  ;;  %v6580_v50 = vld [vmem:[%s9306_s2 + $0x63c] ss:$24 sps:$4 sm:$0xff]   ;;  %v6602_v20 = vld [vmem:[%s9306_s2 + $0x6f8] ss:$24 sps:$4 sm:$0xff]  }
  0xcc   : > { %2218 = vmatpush1.bf16.msra.mxu1 %v6563_v11  ;;  %2331 = vmatpush1.bf16.msra.mxu0 %v6566_v49  ;;  %v6610_v11 = vld [vmem:[%s9306_s2 + $0x72c] ss:$24 sps:$4 sm:$0xff]   ;;  %v6605_v49 = vld [vmem:[%s9306_s2 + $0x720] ss:$24 sps:$4 sm:$0xff]  }
  0xcd   : > { %3051 = vmatprep.subr.bf16.mxu0 %v6571_v13  ;;  %3164 = vmatprep.subr.bf16.mxu1 %v6574_v15  ;;  %v6608_v13 = vld [vmem:[%s9306_s2 + $0x728] ss:$24 sps:$4 sm:$0xff]   ;;  %v6613_v15 = vld [vmem:[%s9306_s2 + $0x754] ss:$24 sps:$4 sm:$0xff]  }
  0xcf   : > { %2220 = vmatmul.mubr.bf16.vlgmr.msra.gmra.mrb[32].mxu1 %v7184_v61  ;;  %2333 = vmatmul.mubr.bf16.vlgmr.msra.gmra.mrb[0].mxu0 %v7184_v61  ;;  %v6586_v61 = vld [vmem:[%s9306_s2 + $0x66c] ss:$24 sps:$4 sm:$0xff]  }
  0xd0   : > { %3052 = vmatpush1.bf16.msra.mxu0 %v6569_v4  ;;  %3165 = vmatpush1.bf16.msra.mxu1 %v6572_v31  ;;  %v6616_v4 = vld [vmem:[%s9306_s2 + $0x75c] ss:$24 sps:$4 sm:$0xff]   ;;  %v7986_v31 = vld [vmem:[%s7146_s29 + $0x30] ss:$8 sps:$4 sm:$0xff]  }
  0xd1   : > { %3053 = vmatprep.subr.bf16.mxu0 %v6577_v35  ;;  %3166 = vmatprep.subr.bf16.mxu1 %v6580_v50  ;;  %v6611_v35 = vld [vmem:[%s9306_s2 + $0x750] ss:$24 sps:$4 sm:$0xff]  }
  0xd2   : > { %2229 = vmatprep.mubr.bf16.mxu1 %v7901_v3  ;;  %2342 = vmatprep.mubr.bf16.mxu0 %v7901_v3  ;;  %v6614_v50 = vld [vmem:[%s9306_s2 + $0x758] ss:$24 sps:$4 sm:$0xff]  }
  0xd4   : > { %3054 = vmatpush1.bf16.msra.mxu0 %v6575_v25  ;;  %3167 = vmatpush1.bf16.msra.mxu1 %v6578_v8  ;;  %v6619_v25 = vld [vmem:[%s9306_s2 + $0x784] ss:$24 sps:$4 sm:$0xff]  }
  0xd5   : > { %3055 = vmatprep.subr.bf16.mxu0 %v6583_v60  ;;  %3168 = vmatprep.subr.bf16.mxu1 %v6586_v61  ;;  %v6622_v8 = vld [vmem:[%s9306_s2 + $0x78c] ss:$24 sps:$4 sm:$0xff]   ;;  %v6617_v61 = vld [vmem:[%s9306_s2 + $0x780] ss:$24 sps:$4 sm:$0xff]  }
  0xd6   : > { %v8003_v60 = vld [vmem:[%s7146_s29 + $0x44] ss:$8 sps:$4 sm:$0xff]  }
  0xd7   : > { %2230 = vmatmul.mubr.bf16.gmra.mrb[36].mxu1 %v7918_v36  ;;  %2343 = vmatmul.mubr.bf16.gmra.mrb[4].mxu0 %v7918_v36 }
  0xd8   : > { %3056 = vmatpush1.bf16.msra.mxu0 %v6581_v42  ;;  %3169 = vmatpush1.bf16.msra.mxu1 %v6584_v52  ;;  %v6620_v42 = vld [vmem:[%s9306_s2 + $0x788] ss:$24 sps:$4 sm:$0xff]   ;;  %v6625_v52 = vld [vmem:[%s9306_s2 + $0x7b4] ss:$24 sps:$4 sm:$0xff]  }
  0xd9   : > { %3057 = vmatprep.subr.bf16.mxu0 %v6589_v59  ;;  %3170 = vmatprep.subr.bf16.mxu1 %v6592_v14  ;;  %v6628_v59 = vld [vmem:[%s9306_s2 + $0x7bc] ss:$24 sps:$4 sm:$0xff]   ;;  %v8020_v14 = vld [vmem:[%s7146_s29 + $0x40] ss:$8 sps:$4 sm:$0xff]  }
  0xda   : > { %2239 = vmatprep.mubr.bf16.mxu1 %v7935_v24  ;;  %2352 = vmatprep.mubr.bf16.mxu0 %v7935_v24 }
  0xdc   : > { %3058 = vmatpush1.bf16.msra.mxu0 %v6587_v1  ;;  %3171 = vmatpush1.bf16.msra.mxu1 %v6590_v29  ;;  %v6623_v1 = vld [vmem:[%s9306_s2 + $0x7b0] ss:$24 sps:$4 sm:$0xff]  }
  0xdd   : > { %3059 = vmatprep.subr.bf16.mxu0 %v6595_v21  ;;  %3172 = vmatprep.subr.bf16.mxu1 %v6598_v41  ;;  %v6626_v29 = vld [vmem:[%s9306_s2 + $0x7b8] ss:$24 sps:$4 sm:$0xff]   ;;  %v6631_v21 = vld [vmem:[%s9306_s2 + $0x7e4] ss:$24 sps:$4 sm:$0xff]  }
  0xde   : > { %v6634_v41 = vld [vmem:[%s9306_s2 + $0x7ec] ss:$24 sps:$4 sm:$0xff]  }
  0xdf   : > { %2240 = vmatmul.mubr.bf16.gmra.mrb[40].mxu1 %v7952_v45  ;;  %2353 = vmatmul.mubr.bf16.gmra.mrb[8].mxu0 %v7952_v45 }
  0xe0   : > { %3060 = vmatpush1.bf16.msra.mxu0 %v6593_v0  ;;  %3173 = vmatpush1.bf16.msra.mxu1 %v6596_v46  ;;  %v8037_v0 = vld [vmem:[%s7146_s29 + $0x54] ss:$8 sps:$4 sm:$0xff]   ;;  %v6629_v46 = vld [vmem:[%s9306_s2 + $0x7e0] ss:$24 sps:$4 sm:$0xff]  }
  0xe1   : > { %3061 = vmatprep.subr.bf16.mxu0 %v6601_v40  ;;  %3174 = vmatprep.subr.bf16.mxu1 %v6604_v37  ;;  %v6632_v40 = vld [vmem:[%s9306_s2 + $0x7e8] ss:$24 sps:$4 sm:$0xff]   ;;  %v6637_v37 = vld [vmem:[%s9306_s2 + $0x814] ss:$24 sps:$4 sm:$0xff]  }
  0xe2   : > { %2249 = vmatprep.mubr.bf16.mxu1 %v7969_v58  ;;  %2362 = vmatprep.mubr.bf16.mxu0 %v7969_v58 }
  0xe4   : > { %3062 = vmatpush1.bf16.msra.mxu0 %v6599_v55  ;;  %3175 = vmatpush1.bf16.msra.mxu1 %v6602_v20  ;;  %v6640_v55 = vld [vmem:[%s9306_s2 + $0x81c] ss:$24 sps:$4 sm:$0xff]   ;;  %v8054_v20 = vld [vmem:[%s7146_s29 + $0x50] ss:$8 sps:$4 sm:$0xff]  }
  0xe5   : > { %3063 = vmatprep.subr.bf16.mxu0 %v6607_v10  ;;  %3176 = vmatprep.subr.bf16.mxu1 %v6610_v11  ;;  %v6635_v10 = vld [vmem:[%s9306_s2 + $0x810] ss:$24 sps:$4 sm:$0xff]  }
  0xe6   : > { %v6638_v11 = vld [vmem:[%s9306_s2 + $0x818] ss:$24 sps:$4 sm:$0xff]  }
  0xe7   : > { %2250 = vmatmul.mubr.bf16.gmra.mrb[44].mxu1 %v7986_v31  ;;  %2363 = vmatmul.mubr.bf16.gmra.mrb[12].mxu0 %v7986_v31 }
  0xe8   : > { %3064 = vmatpush1.bf16.msra.mxu0 %v6605_v49  ;;  %3177 = vmatpush1.bf16.msra.mxu1 %v6608_v13  ;;  %v6643_v49 = vld [vmem:[%s9306_s2 + $0x844] ss:$24 sps:$4 sm:$0xff]  }
  0xe9   : > { %3065 = vmatprep.subr.bf16.mxu0 %v6613_v15  ;;  %3178 = vmatprep.subr.bf16.mxu1 %v6616_v4  ;;  %v6646_v13 = vld [vmem:[%s9306_s2 + $0x84c] ss:$24 sps:$4 sm:$0xff]   ;;  %v6641_v4 = vld [vmem:[%s9306_s2 + $0x840] ss:$24 sps:$4 sm:$0xff]  }
  0xea   : > { %2259 = vmatprep.mubr.bf16.mxu1 %v8003_v60  ;;  %2372 = vmatprep.mubr.bf16.mxu0 %v8003_v60  ;;  %v8071_v15 = vld [vmem:[%s7146_s29 + $0x64] ss:$8 sps:$4 sm:$0xff]  }
  0xec   : > { %3066 = vmatpush1.bf16.msra.mxu0 %v6611_v35  ;;  %3179 = vmatpush1.bf16.msra.mxu1 %v6614_v50  ;;  %v6644_v35 = vld [vmem:[%s9306_s2 + $0x848] ss:$24 sps:$4 sm:$0xff]   ;;  %v6649_v50 = vld [vmem:[%s9306_s2 + $0x874] ss:$24 sps:$4 sm:$0xff]  }
  0xed   : > { %3067 = vmatprep.subr.bf16.mxu0 %v6619_v25  ;;  %3180 = vmatprep.subr.bf16.mxu1 %v6622_v8  ;;  %v2413_v25 = vld [vmem:[%s7146_s29] sm:$0xee]  ;;  %v6652_v8 = vld [vmem:[%s9306_s2 + $0x87c] ss:$24 sps:$4 sm:$0xff]  }
  0xef   : > { %2260 = vmatmul.mubr.bf16.gmra.mrb[48].mxu1 %v8020_v14  ;;  %2373 = vmatmul.mubr.bf16.gmra.mrb[16].mxu0 %v8020_v14 }
  0xf0   : > { %3068 = vmatpush1.bf16.msra.mxu0 %v6617_v61  ;;  %3181 = vmatpush1.bf16.msra.mxu1 %v6620_v42  ;;  %v8089_v61 = vld [vmem:[%s7146_s29 + $0x60] ss:$8 sps:$4 sm:$0xff]  }
  0xf1   : > { %3069 = vmatprep.subr.bf16.mxu0 %v6625_v52  ;;  %3182 = vmatprep.subr.bf16.mxu1 %v6628_v59  ;;  %v6647_v42 = vld [vmem:[%s9306_s2 + $0x870] ss:$24 sps:$4 sm:$0xff]  }
  0xf2   : > { %2269 = vmatprep.mubr.bf16.mxu1 %v8037_v0  ;;  %2382 = vmatprep.mubr.bf16.mxu0 %v8037_v0  ;;  %v6929_v52 = vld [vmem:[%s7146_s29 + $0x8] sm:$0xff] }
  0xf3   : > { %v8097_v59 = vcombine.high %v2413_v25, %v6929_v52 }
  0xf4   : > { %3070 = vmatpush1.bf16.msra.mxu0 %v6623_v1  ;;  %3183 = vmatpush1.bf16.msra.mxu1 %v6626_v29  ;;  %v6650_v1 = vld [vmem:[%s9306_s2 + $0x878] ss:$24 sps:$4 sm:$0xff]   ;;  %v6655_v29 = vld [vmem:[%s9306_s2 + $0x8a4] ss:$24 sps:$4 sm:$0xff]  }
  0xf5   : > { %3071 = vmatprep.subr.bf16.mxu0 %v6631_v21  ;;  %3184 = vmatprep.subr.bf16.mxu1 %v6634_v41  ;;  %v6658_v21 = vld [vmem:[%s9306_s2 + $0x8ac] ss:$24 sps:$4 sm:$0xff]   ;;  %v8109_v41 = vld [vmem:[%s7146_s29 + $0x74] ss:$8 sps:$4 sm:$0xff]  }
  0xf7   : > { %2270 = vmatmul.mubr.bf16.gmra.mrb[52].mxu1 %v8054_v20  ;;  %2383 = vmatmul.mubr.bf16.gmra.mrb[20].mxu0 %v8054_v20 }
  0xf8   : > { %3072 = vmatpush1.bf16.msra.mxu0 %v6629_v46  ;;  %3185 = vmatpush1.bf16.msra.mxu1 %v6632_v40  ;;  %v6653_v46 = vld [vmem:[%s9306_s2 + $0x8a0] ss:$24 sps:$4 sm:$0xff]  }
  0xf9   : > { %3073 = vmatprep.subr.bf16.mxu0 %v6637_v37  ;;  %3186 = vmatprep.subr.bf16.mxu1 %v6640_v55  ;;  %v6656_v40 = vld [vmem:[%s9306_s2 + $0x8a8] ss:$24 sps:$4 sm:$0xff]   ;;  %v2423_v37 = vrot.slane %v8097_v59, 1  ;;  %v2424_v55 = vrot.slane %v7901_v3, 1  ;;  %v6662_v3 = vld [vmem:[%s9306_s2 + $0x8d8] ss:$24 sps:$4 sm:$0xff]  }
  0xfa   : > { %2279 = vmatprep.mubr.bf16.mxu1 %v8071_v15  ;;  %2392 = vmatprep.mubr.bf16.mxu0 %v8071_v15 }
  0xfc   : > { %3074 = vmatpush1.bf16.msra.mxu0 %v6635_v10  ;;  %3187 = vmatpush1.bf16.msra.mxu1 %v6638_v11  ;;  %v6661_v10 = vld [vmem:[%s9306_s2 + $0x8d4] ss:$24 sps:$4 sm:$0xff]   ;;  %v8124_v11 = vcombine.low %v2413_v25, %v6929_v52  ;;  %v6670_v52 = vld [vmem:[%s9306_s2 + $0x908] ss:$24 sps:$4 sm:$0xff]  }
  0xfd   : > { %3075 = vmatprep.subr.bf16.mxu0 %v6643_v49  ;;  %3188 = vmatprep.subr.bf16.mxu1 %v6646_v13  ;;  %v6664_v49 = vld [vmem:[%s9306_s2 + $0x8dc] ss:$24 sps:$4 sm:$0xff]   ;;  %v6659_v13 = vld [vmem:[%s9306_s2 + $0x8d0] ss:$24 sps:$4 sm:$0xff]  }
  0xfe   : > { %v2420_v25 = vrot.slane %v8124_v11, 1  ;;  %v3489_v18 = vshrl.u32 %v8124_v11, 16 }
  0xff   : > { %2280 = vmatmul.mubr.bf16.gmra.mrb[56].mxu1 %v8089_v61  ;;  %2393 = vmatmul.mubr.bf16.gmra.mrb[24].mxu0 %v8089_v61 }
 0x100   : > { %3076 = vmatpush1.bf16.msra.mxu0 %v6641_v4  ;;  %3189 = vmatpush1.bf16.msra.mxu1 %v6644_v35  ;;  %v8136_v4 = vld [vmem:[%s7146_s29 + $0x70] ss:$8 sps:$4 sm:$0xff]   ;;  %v8141_v35 = vsel %vm2419_vm3, %v2423_v37, %v2424_v55 }
 0x101   : > { %3077 = vmatprep.subr.bf16.mxu0 %v6649_v50  ;;  %3190 = vmatprep.subr.bf16.mxu1 %v6652_v8  ;;  %v2421_v50 = vrot.slane %v7918_v36, 1  ;;  %v6669_v8 = vld [vmem:[%s9306_s2 + $0x614] ss:$24 sps:$4 sm:$0xff]   ;;  %v6667_v36 = vld [vmem:[%s9306_s2 + $0x610] ss:$24 sps:$4 sm:$0xff]   ;;  %v2446_v26 = vrot.slane %v8136_v4, 1 }
 0x102   : > { %2289 = vmatprep.mubr.bf16.mxu1 %v8109_v41  ;;  %2402 = vmatprep.mubr.bf16.mxu0 %v8109_v41  ;;  %v6676_v37 = vld [vmem:[%s9306_s2 + $0x938] ss:$24 sps:$4 sm:$0xff]  }
 0x104   : > { %3078 = vmatpush1.bf16.msra.mxu0 %v6647_v42  ;;  %3191 = vmatpush1.bf16.msra.mxu1 %v6650_v1  ;;  %v6672_v42 = vld [vmem:[%s9306_s2 + $0x90c] ss:$24 sps:$4 sm:$0xff]  }
 0x105   : > { %3079 = vmatprep.subr.bf16.mxu0 %v6655_v29  ;;  %3192 = vmatprep.subr.bf16.mxu1 %v6658_v21  ;;  %v6675_v1 = vld [vmem:[%s9306_s2 + $0x644] ss:$24 sps:$4 sm:$0xff]   ;;  %v2428_v29 = vrot.slane %v7935_v24, 1  ;;  %v8164_v21 = vsel %vm2419_vm3, %v2420_v25, %v2421_v50  ;;  %v2426_v24 = vrot.slane %v7952_v45, 1  ;;  %v6681_v25 = vld [vmem:[%s9306_s2 + $0x674] ss:$24 sps:$4 sm:$0xff]  }
 0x106   : > { %v6684_v45 = vld [vmem:[%s9306_s2 + $0x96c] ss:$24 sps:$4 sm:$0xff]  }
 0x107   : > { %2290 = vmatmul.mubr.bf16.gmra.mrb[60].mxu1 %v8136_v4  ;;  %2403 = vmatmul.mubr.bf16.gmra.mrb[28].mxu0 %v8136_v4  ;;  %v3504_v4 = vshll.u32 %v8097_v59, 16 }
 0x108   : > { %3080 = vmatpush1.bf16.msra.mxu0 %v6653_v46  ;;  %3193 = vmatpush1.bf16.msra.mxu1 %v6656_v40  ;;  %v6678_v46 = vld [vmem:[%s9306_s2 + $0x93c] ss:$24 sps:$4 sm:$0xff]   ;;  %v6673_v40 = vld [vmem:[%s9306_s2 + $0x640] ss:$24 sps:$4 sm:$0xff]  }
 0x109   : > { %3081 = vmatprep.subr.bf16.mxu0 %v6661_v10  ;;  %3194 = vmatprep.subr.bf16.mxu1 %v6664_v49  ;;  %v8179_v10 = vsel %vm2419_vm3, %v2424_v55, %v2428_v29  ;;  %v2432_v49 = vrot.slane %v7969_v58, 1  ;;  %v6679_v58 = vld [vmem:[%s9306_s2 + $0x670] ss:$24 sps:$4 sm:$0xff]   ;;  %v6687_v55 = vld [vmem:[%s9306_s2 + $0x6a4] ss:$24 sps:$4 sm:$0xff]  }
 0x10a   : > { %3083 = vmatprep.mubr.bf16.mxu0 %v8141_v35  ;;  %3196 = vmatprep.mubr.bf16.mxu1 %v8141_v35 }
 0x10c   : > { %3082 = vmatpush1.bf16.msra.mxu0 %v6659_v13  ;;  %3195 = vmatpush1.bf16.msra.mxu1 %v6662_v3  ;;  %v2430_v13 = vrot.slane %v7986_v31, 1  ;;  %v2436_v3 = vrot.slane %v8003_v60, 1  ;;  %v6682_v31 = vld [vmem:[%s9306_s2 + $0x968] ss:$24 sps:$4 sm:$0xff]   ;;  %v6717_v60 = vld [vmem:[%s9306_s2 + $0x794] ss:$24 sps:$4 sm:$0xff]  }
 0x10d   : > { %3277 = vmatprep.subr.bf16.mxu0 %v6669_v8  ;;  %4291 = vmatprep.subr.bf16.mxu1 %v6672_v42  ;;  %v2434_v8 = vrot.slane %v8020_v14, 1  ;;  %v8203_v42 = vsel %vm2419_vm3, %v2421_v50, %v2426_v24  ;;  %v8217_v50 = vsel %vm2419_vm3, %v2428_v29, %v2432_v49  ;;  %v6691_v29 = vld [vmem:[%s9306_s2 + $0x6d0] ss:$24 sps:$4 sm:$0xff]   ;;  %v6726_v14 = vld [vmem:[%s9306_s2 + $0xabc] ss:$24 sps:$4 sm:$0xff]  }
 0x10f   : > { %3084 = vmatmul.mubr.bf16.vlgmr.msra.gmra.mrb[32].mxu0 %v8164_v21  ;;  %3197 = vmatmul.mubr.bf16.vlgmr.msra.gmra.mrb[32].mxu1 %v8164_v21 }
 0x110   : > { %3278 = vmatpush1.bf16.msra.mxu0 %v6667_v36  ;;  %4292 = vmatpush1.bf16.msra.mxu1 %v6670_v52  ;;  %v6690_v36 = vld [vmem:[%s9306_s2 + $0x99c] ss:$24 sps:$4 sm:$0xff]   ;;  %v6685_v52 = vld [vmem:[%s9306_s2 + $0x6a0] ss:$24 sps:$4 sm:$0xff]  }
 0x111   : > { %3279 = vmatprep.subr.bf16.mxu0 %v6675_v1  ;;  %4293 = vmatprep.subr.bf16.mxu1 %v6678_v46  ;;  %v6688_v1 = vld [vmem:[%s9306_s2 + $0x998] ss:$24 sps:$4 sm:$0xff]   ;;  %v6693_v46 = vld [vmem:[%s9306_s2 + $0x6d4] ss:$24 sps:$4 sm:$0xff]  }
 0x112   : > { %3093 = vmatprep.mubr.bf16.mxu0 %v8179_v10  ;;  %3206 = vmatprep.mubr.bf16.mxu1 %v8179_v10 }
 0x114   : > { %3280 = vmatpush1.bf16.msra.mxu0 %v6673_v40  ;;  %4294 = vmatpush1.bf16.msra.mxu1 %v6676_v37  ;;  %v6696_v40 = vld [vmem:[%s9306_s2 + $0x9cc] ss:$24 sps:$4 sm:$0xff]   ;;  %v6694_v37 = vld [vmem:[%s9306_s2 + $0x9c8] ss:$24 sps:$4 sm:$0xff]  }
 0x115   : > { %3281 = vmatprep.subr.bf16.mxu0 %v6681_v25  ;;  %4295 = vmatprep.subr.bf16.mxu1 %v6684_v45  ;;  %v6699_v25 = vld [vmem:[%s9306_s2 + $0x704] ss:$24 sps:$4 sm:$0xff]   ;;  %v8237_v45 = vsel %vm2419_vm3, %v2426_v24, %v2430_v13  ;;  %v8253_v24 = vsel %vm2419_vm3, %v2432_v49, %v2436_v3  ;;  %v6703_v49 = vld [vmem:[%s9306_s2 + $0x730] ss:$24 sps:$4 sm:$0xff]  }
 0x117   : > { %3094 = vmatmul.mubr.bf16.gmra.mrb[36].mxu0 %v8203_v42  ;;  %3207 = vmatmul.mubr.bf16.gmra.mrb[36].mxu1 %v8203_v42 }
 0x118   : > { %3282 = vmatpush1.bf16.msra.mxu0 %v6679_v58  ;;  %4296 = vmatpush1.bf16.msra.mxu1 %v6682_v31  ;;  %v6702_v58 = vld [vmem:[%s9306_s2 + $0x9fc] ss:$24 sps:$4 sm:$0xff]   ;;  %v6697_v31 = vld [vmem:[%s9306_s2 + $0x700] ss:$24 sps:$4 sm:$0xff]  }
 0x119   : > { %3283 = vmatprep.subr.bf16.mxu0 %v6687_v55  ;;  %4297 = vmatprep.subr.bf16.mxu1 %v6690_v36  ;;  %v6700_v55 = vld [vmem:[%s9306_s2 + $0x9f8] ss:$24 sps:$4 sm:$0xff]   ;;  %v6705_v36 = vld [vmem:[%s9306_s2 + $0x734] ss:$24 sps:$4 sm:$0xff]  }
 0x11a   : > { %3103 = vmatprep.mubr.bf16.mxu0 %v8217_v50  ;;  %3216 = vmatprep.mubr.bf16.mxu1 %v8217_v50 }
 0x11c   : > { %3284 = vmatpush1.bf16.msra.mxu0 %v6685_v52  ;;  %4298 = vmatpush1.bf16.msra.mxu1 %v6688_v1  ;;  %v6708_v52 = vld [vmem:[%s9306_s2 + $0xa2c] ss:$24 sps:$4 sm:$0xff]  }
 0x11d   : > { %3285 = vmatprep.subr.bf16.mxu0 %v6693_v46  ;;  %4299 = vmatprep.subr.bf16.mxu1 %v6696_v40  ;;  %v2440_v46 = vrot.slane %v8037_v0, 1  ;;  %v6711_v0 = vld [vmem:[%s9306_s2 + $0x764] ss:$24 sps:$4 sm:$0xff]  }
 0x11f   : > { %3104 = vmatmul.mubr.bf16.gmra.mrb[40].mxu0 %v8237_v45  ;;  %3217 = vmatmul.mubr.bf16.gmra.mrb[40].mxu1 %v8237_v45 }
 0x120   : > { %3286 = vmatpush1.bf16.msra.mxu0 %v6691_v29  ;;  %4300 = vmatpush1.bf16.msra.mxu1 %v6694_v37  ;;  %v8274_v29 = vsel %vm2419_vm3, %v2430_v13, %v2434_v8  ;;  %v6706_v37 = vld [vmem:[%s9306_s2 + $0xa28] ss:$24 sps:$4 sm:$0xff]   ;;  %v8294_v13 = vsel %vm2419_vm3, %v2436_v3, %v2440_v46  ;;  %v6720_v3 = vld [vmem:[%s9306_s2 + $0xa8c] ss:$24 sps:$4 sm:$0xff]  }
 0x121   : > { %3287 = vmatprep.subr.bf16.mxu0 %v6699_v25  ;;  %4301 = vmatprep.subr.bf16.mxu1 %v6702_v58  ;;  %v6714_v58 = vld [vmem:[%s9306_s2 + $0xa5c] ss:$24 sps:$4 sm:$0xff]  }
 0x122   : > { %3113 = vmatprep.mubr.bf16.mxu0 %v8253_v24  ;;  %3226 = vmatprep.mubr.bf16.mxu1 %v8253_v24  ;;  %v8266_v1 = vpop.f32.mrb[0].mxu1 }
 0x123   : > { %v8269_v40 = vpop.f32.mrb[1].mxu1 }
 0x124   : > { %3288 = vmatpush1.bf16.msra.mxu0 %v6697_v31  ;;  %4302 = vmatpush1.bf16.msra.mxu1 %v6700_v55  ;;  %v8279_v25 = vpop.f32.mrb[2].mxu1  ;;  %v6709_v55 = vld [vmem:[%s9306_s2 + $0x760] ss:$24 sps:$4 sm:$0xff]  }
 0x125   : > { %3289 = vmatprep.subr.bf16.mxu0 %v6705_v36  ;;  %4303 = vmatprep.subr.bf16.mxu1 %v6708_v52  ;;  %v8287_v31 = vpop.f32.mrb[3].mxu1  ;;  %v6712_v36 = vld [vmem:[%s9306_s2 + $0xa58] ss:$24 sps:$4 sm:$0xff]   ;;  %v2438_v52 = vrot.slane %v8054_v20, 1 }
 0x127   : > { %3114 = vmatmul.mubr.bf16.gmra.mrb[44].mxu0 %v8274_v29  ;;  %3227 = vmatmul.mubr.bf16.gmra.mrb[44].mxu1 %v8274_v29  ;;  %v8319_v20 = vsel %vm2419_vm3, %v2434_v8, %v2438_v52 }
 0x128   : > { %3290 = vmatpush1.bf16.msra.mxu0 %v6703_v49  ;;  %4304 = vmatpush1.bf16.msra.mxu1 %v6706_v37  ;;  %v2444_v37 = vrot.slane %v8071_v15, 1  ;;  %v6723_v15 = vld [vmem:[%s9306_s2 + $0x7c4] ss:$24 sps:$4 sm:$0xff]  }
 0x129   : > { %3291 = vmatprep.subr.bf16.mxu0 %v6711_v0  ;;  %4305 = vmatprep.subr.bf16.mxu1 %v6714_v58  ;;  %v6715_v0 = vld [vmem:[%s9306_s2 + $0x790] ss:$24 sps:$4 sm:$0xff]  }
 0x12a   : > { %3123 = vmatprep.mubr.bf16.mxu0 %v8294_v13  ;;  %3236 = vmatprep.mubr.bf16.mxu1 %v8294_v13  ;;  %v8311_v49 = vpop.f32.mrb[4].mxu1  ;;  %v6718_v58 = vld [vmem:[%s9306_s2 + $0xa88] ss:$24 sps:$4 sm:$0xff]  }
 0x12b   : > { %v8314_v27 = vpop.f32.mrb[5].mxu1 }
 0x12c   : > { %3292 = vmatpush1.bf16.msra.mxu0 %v6709_v55  ;;  %4306 = vmatpush1.bf16.msra.mxu1 %v6712_v36  ;;  %v8327_v57 = vpop.f32.mrb[6].mxu1  ;;  %v8340_v55 = vsel %vm2419_vm3, %v2440_v46, %v2444_v37  ;;  %v6721_v36 = vld [vmem:[%s9306_s2 + $0x7c0] ss:$24 sps:$4 sm:$0xff]   ;;  %v6732_v46 = vld [vmem:[%s9306_s2 + $0xaec] ss:$24 sps:$4 sm:$0xff]  }
 0x12d   : > { %3293 = vmatprep.subr.bf16.mxu0 %v6717_v60  ;;  %4307 = vmatprep.subr.bf16.mxu1 %v6720_v3  ;;  %v8335_v8 = vpop.f32.mrb[7].mxu1  ;;  %v6724_v60 = vld [vmem:[%s9306_s2 + $0xab8] ss:$24 sps:$4 sm:$0xff]   ;;  %v2442_v3 = vrot.slane %v8089_v61, 1 }
 0x12f   : > { %3124 = vmatmul.mubr.bf16.gmra.mrb[48].mxu0 %v8319_v20  ;;  %3237 = vmatmul.mubr.bf16.gmra.mrb[48].mxu1 %v8319_v20  ;;  %v8363_v61 = vsel %vm2419_vm3, %v2438_v52, %v2442_v3  ;;  %v6738_v52 = vld [vmem:[%s9306_s2 + $0xb1c] ss:$24 sps:$4 sm:$0xff]  }
 0x130   : > { %3294 = vmatpush1.bf16.msra.mxu0 %v6715_v0  ;;  %4308 = vmatpush1.bf16.msra.mxu1 %v6718_v58  ;;  %v2448_v58 = vrot.slane %v8109_v41, 1  ;;  %v6735_v41 = vld [vmem:[%s9306_s2 + $0x824] ss:$24 sps:$4 sm:$0xff]  }
 0x131   : > { %3295 = vmatprep.subr.bf16.mxu0 %v6723_v15  ;;  %4309 = vmatprep.subr.bf16.mxu1 %v6726_v14  ;;  %v6727_v15 = vld [vmem:[%s9306_s2 + $0x7f0] ss:$24 sps:$4 sm:$0xff]  }
 0x132   : > { %3133 = vmatprep.mubr.bf16.mxu0 %v8340_v55  ;;  %3246 = vmatprep.mubr.bf16.mxu1 %v8340_v55  ;;  %v8357_v0 = vpop.f32.mrb[8].mxu1  ;;  %v6730_v14 = vld [vmem:[%s9306_s2 + $0xae8] ss:$24 sps:$4 sm:$0xff]  }
 0x133   : > { %v8360_v47 = vpop.f32.mrb[9].mxu1 }
 0x134   : > { %3296 = vmatpush1.bf16.msra.mxu0 %v6721_v36  ;;  %4310 = vmatpush1.bf16.msra.mxu1 %v6724_v60  ;;  %v8371_v63 = vpop.f32.mrb[10].mxu1  ;;  %v8384_v60 = vsel %vm2419_vm3, %v2444_v37, %v2448_v58  ;;  %v6744_v37 = vld [vmem:[%s9306_s2 + $0xb4c] ss:$24 sps:$4 sm:$0xff]  }
 0x135   : > { %3297 = vmatprep.subr.bf16.mxu0 %v6729_v19  ;;  %4311 = vmatprep.subr.bf16.mxu1 %v6732_v46  ;;  %v8379_v36 = vpop.f32.mrb[11].mxu1  ;;  %v6733_v19 = vld [vmem:[%s9306_s2 + $0x820] ss:$24 sps:$4 sm:$0xff]  }
 0x136   : > { %v6736_v46 = vld [vmem:[%s9306_s2 + $0xb18] ss:$24 sps:$4 sm:$0xff]  }
 0x137   : > { %3134 = vmatmul.mubr.bf16.gmra.mrb[52].mxu0 %v8363_v61  ;;  %3247 = vmatmul.mubr.bf16.gmra.mrb[52].mxu1 %v8363_v61 }
 0x138   : > { %3298 = vmatpush1.bf16.msra.mxu0 %v6727_v15  ;;  %4312 = vmatpush1.bf16.msra.mxu1 %v6730_v14  ;;  %v2465_v15 = vrot.slane %v7523_v30, 1  ;;  %v3501_v14 = vshrl.u32 %v8097_v59, 16  ;;  %v6742_v30 = vld [vmem:[%s9306_s2 + $0xb48] ss:$24 sps:$4 sm:$0xff]   ;;  %v6747_v59 = vld [vmem:[%s9306_s2 + $0x884] ss:$24 sps:$4 sm:$0xff]  }
 0x139   : > { %3299 = vmatprep.subr.bf16.mxu0 %v6735_v41  ;;  %4313 = vmatprep.subr.bf16.mxu1 %v6738_v52  ;;  %v8409_v52 = vsel %vm2419_vm3, %v2442_v3, %v2446_v26  ;;  %v6750_v3 = vld [vmem:[%s9306_s2 + $0xb7c] ss:$24 sps:$4 sm:$0xff]  }
 0x13a   : > { %3143 = vmatprep.mubr.bf16.mxu0 %v8384_v60  ;;  %3256 = vmatprep.mubr.bf16.mxu1 %v8384_v60  ;;  %v8403_v16 = vpop.f32.mrb[12].mxu1  ;;  %v3503_v32 = vrot.slane %v3501_v14, 1  ;;  %v2464_v14 = vrot.slane %v7556_v33, 1 }
 0x13b   : > { %v8406_v41 = vpop.f32.mrb[13].mxu1 }
 0x13c   : > { %3300 = vmatpush1.bf16.msra.mxu0 %v6733_v19  ;;  %4314 = vmatpush1.bf16.msra.mxu1 %v6736_v46  ;;  %v8417_v62 = vpop.f32.mrb[14].mxu1  ;;  %v8428_v46 = vsel %vm2419_vm3, %v2448_v58, %v2465_v15  ;;  %v6745_v58 = vld [vmem:[%s9306_s2 + $0x880] ss:$24 sps:$4 sm:$0xff]  }
 0x13d   : > { %3301 = vmatprep.subr.bf16.mxu0 %v6741_v54  ;;  %4315 = vmatprep.subr.bf16.mxu1 %v6744_v37  ;;  %v8425_v19 = vpop.f32.mrb[15].mxu1  ;;  %v3506_v54 = vrot.slane %v3504_v4, 2  ;;  %v3508_v37 = vrot.slane %v534_v17, 1  ;;  %v6748_v15 = vld [vmem:[%s9306_s2 + $0xb78] ss:$24 sps:$4 sm:$0xff]   ;;  %v3492_v4 = vshll.u32 %v8124_v11, 16 }
 0x13e   : > { %9336 = vst [vmem:[#allocation2_spill] sm:$0xff] %v8425_v19  ;;  %v3491_v11 = vrot.slane %v3489_v18, 1  ;;  %v6759_v18 = vld [vmem:[%s9306_s2 + $0x8e4] ss:$24 sps:$4 sm:$0xff]  }
 0x13f   : > { %3144 = vmatmul.mubr.bf16.gmra.mrb[56].mxu0 %v8409_v52  ;;  %3257 = vmatmul.mubr.bf16.gmra.mrb[56].mxu1 %v8409_v52  ;;  %v3510_v33 = vor.u32 %v3509_v53, %v3508_v37  ;;  %v9339_v37 = vshll.u32 %v7217_v9, 16 }
 0x140   : > { %3302 = vmatpush1.bf16.msra.mxu0 %v6739_v39  ;;  %4316 = vmatpush1.bf16.msra.mxu1 %v6742_v30  ;;  %v3507_v39 = vor.u32 %v3506_v54, %v3503_v32  ;;  %v6762_v32 = vld [vmem:[%s9306_s2 + $0xbdc] ss:$24 sps:$4 sm:$0xff]  }
 0x141   : > { %3303 = vmatprep.subr.bf16.mxu0 %v6747_v59  ;;  %4317 = vmatprep.subr.bf16.mxu1 %v6750_v3  ;;  %v8458_v59 = vsel %vm2419_vm3, %v2446_v26, %v2464_v14  ;;  %v6751_v3 = vld [vmem:[%s9306_s2 + $0x8b0] ss:$24 sps:$4 sm:$0xff]   ;;  %v9338_v26 = vshrl.u32 %v7217_v9, 16  ;;  %v6757_v14 = vld [vmem:[%s9306_s2 + $0x8e0] ss:$24 sps:$4 sm:$0xff]  }
 0x142   : > { %3153 = vmatprep.mubr.bf16.mxu0 %v8428_v46  ;;  %3266 = vmatprep.mubr.bf16.mxu1 %v8428_v46  ;;  %v8453_v17 = vpop.f32.mrb[16].mxu1  ;;  %v6765_v9 = vld [vmem:[%s9306_s2 + $0x904] ss:$24 sps:$4 sm:$0xff]  }
 0x143   : > { %9337 = vst [vmem:[#allocation3_spill] sm:$0xff] %v8453_v17  ;;  %v8455_v30 = vpop.f32.mrb[17].mxu1  ;;  %v3494_v17 = vrot.slane %v3492_v4, 2  ;;  %v3516_v54 = vrot.slane %v9338_v26, 1  ;;  %v6760_v4 = vld [vmem:[%s9306_s2 + $0xbd8] ss:$24 sps:$4 sm:$0xff]  }
 0x144   : > { %3304 = vmatpush1.bf16.msra.mxu0 %v6745_v58  ;;  %4318 = vmatpush1.bf16.msra.mxu1 %v6748_v15  ;;  %v8466_v19 = vpop.f32.mrb[18].mxu1  ;;  %v3517_v58 = vrot.slane %v9339_v37, 2  ;;  %v8483_v15 = vsel %vm3487_vm4, %v3507_v39, %v3510_v33 }
 0x145   : > { %3305 = vmatprep.subr.bf16.mxu0 %v6753_v51  ;;  %4319 = vmatprep.subr.bf16.mxu1 %v6756_v56  ;;  %v8474_v53 = vpop.f32.mrb[19].mxu1  ;;  %v3495_v51 = vor.u32 %v3494_v17, %v3491_v11  ;;  %v6763_v17 = vld [vmem:[%s9306_s2 + $0x900] ss:$24 sps:$4 sm:$0xff]  }
 0x147   : > { %3154 = vmatmul.mubr.bf16.gmra.mrb[60].mxu0 %v8458_v59  ;;  %3267 = vmatmul.mubr.bf16.gmra.mrb[60].mxu1 %v8458_v59  ;;  %v8505_v11 = vsel %vm3487_vm4, %v3495_v51, %v7881_v6  ;;  %v9343_v51 = vshll.u32 %v7257_v28, 16 }
 0x148   : > { %3306 = vmatpush1.bf16.msra.mxu0 %v6751_v3  ;;  %4320 = vmatpush1.bf16.msra.mxu1 %v6754_v38  ;;  %v3518_v38 = vor.u32 %v3517_v58, %v3516_v54  ;;  %v9340_v3 = vshrl.u32 %v7241_v22, 16  ;;  %v6768_v54 = vld [vmem:[%s9306_s2 + $0x934] ss:$24 sps:$4 sm:$0xff]  }
 0x149   : > { %3307 = vmatprep.subr.bf16.mxu0 %v6759_v18  ;;  %4321 = vmatprep.subr.bf16.mxu1 %v6762_v32  ;;  %v9341_v18 = vshll.u32 %v7241_v22, 16  ;;  %v6766_v22 = vld [vmem:[%s9306_s2 + $0x930] ss:$24 sps:$4 sm:$0xff]  }
 0x14a   : > { %3309 = vmatprep.mubr.bf16.mxu0 %v8141_v35  ;;  %4323 = vmatprep.mubr.bf16.mxu1 %v8483_v15  ;;  %v8496_v56 = vpop.f32.mrb[20].mxu1  ;;  %v3512_v35 = vrot.slane %v9340_v3, 1  ;;  %v8519_v58 = vsel %vm3487_vm4, %v3510_v33, %v3518_v38  ;;  %v3525_v3 = vrot.slane %v9343_v51, 2  ;;  %v6774_v51 = vld [vmem:[%s9306_s2 + $0x994] ss:$24 sps:$4 sm:$0xff]  }
 0x14b   : > { %v8498_v39 = vpop.f32.mrb[21].mxu1  ;;  %v3513_v32 = vrot.slane %v9341_v18, 2 }
 0x14c   : > { %3308 = vmatpush1.bf16.msra.mxu0 %v6757_v14  ;;  %4322 = vmatpush1.bf16.msra.mxu1 %v6760_v4  ;;  %v8511_v26 = vpop.f32.mrb[22].mxu1  ;;  %v9342_v14 = vshrl.u32 %v7257_v28, 16  ;;  %v6771_v28 = vld [vmem:[%s9306_s2 + $0x964] ss:$24 sps:$4 sm:$0xff]  }
 0x14d   : > { %4178 = vmatprep.subr.bf16.mxu0 %v6765_v9  ;;  %v8516_v37 = vpop.f32.mrb[23].mxu1  ;;  %v3514_v9 = vor.u32 %v3513_v32, %v3512_v35  ;;  %v9346_v35 = vshrl.u32 %v7294_v43, 16 }
 0x14e   : > { %v3524_v4 = vrot.slane %v9342_v14, 1 }
 0x14f   : > { %3310 = vmatmul.mubr.bf16.vlgmr.msra.gmra.mrb[0].mxu0 %v8164_v21  ;;  %4324 = vmatmul.mubr.bf16.vlgmr.msra.gmra.mrb[32].mxu1 %v8505_v11  ;;  %v3520_v32 = vrot.slane %v9346_v35, 1  ;;  %v9349_v35 = vshll.u32 %v7309_v48, 16 }
 0x150   : > { %4179 = vmatpush1.bf16.msra.mxu0 %v6763_v17  ;;  %3319 = vmatprep.mubr.bf16.mxu0 %v8179_v10  ;;  %v3526_v33 = vor.u32 %v3525_v3, %v3524_v4  ;;  %v6769_v17 = vld [vmem:[%s9306_s2 + $0x960] ss:$24 sps:$4 sm:$0xff]   ;;  %v8544_v10 = vsel %vm3487_vm4, %v7881_v6, %v3514_v9  ;;  %v9348_v6 = vshrl.u32 %v7309_v48, 16  ;;  %v6777_v48 = vld [vmem:[%s9306_s2 + $0x9c4] ss:$24 sps:$4 sm:$0xff]  }
 0x151   : > { %4180 = vmatprep.subr.bf16.mxu0 %v6768_v54  ;;  %4333 = vmatprep.mubr.bf16.mxu1 %v8519_v58  ;;  %v9347_v54 = vshll.u32 %v7294_v43, 16  ;;  %v6772_v43 = vld [vmem:[%s9306_s2 + $0x990] ss:$24 sps:$4 sm:$0xff]  }
 0x152   : > { %v8535_v18 = vpop.f32.mrb[24].mxu1 }
 0x153   : > { %9344 = vst [vmem:[#allocation4_spill] sm:$0xff] %v8535_v18  ;;  %v8537_v21 = vpop.f32.mrb[25].mxu1  ;;  %v3521_v14 = vrot.slane %v9347_v54, 2  ;;  %v3533_v18 = vrot.slane %v9349_v35, 2 }
 0x154   : > { %9345 = vst [vmem:[#allocation5_spill] sm:$0xff] %v8537_v21  ;;  %4181 = vmatpush1.bf16.msra.mxu0 %v6766_v22  ;;  %v8550_v4 = vpop.f32.mrb[26].mxu1  ;;  %v8558_v22 = vsel %vm3487_vm4, %v3518_v38, %v3526_v33  ;;  %v3532_v21 = vrot.slane %v9348_v6, 1 }
 0x155   : > { %4182 = vmatprep.subr.bf16.mxu0 %v6771_v28  ;;  %v8555_v3 = vpop.f32.mrb[27].mxu1  ;;  %v3522_v28 = vor.u32 %v3521_v14, %v3520_v32  ;;  %v9352_v32 = vshrl.u32 %v7346_v5, 16 }
 0x156   : > { %v3534_v38 = vor.u32 %v3533_v18, %v3532_v21  ;;  %v6780_v18 = vld [vmem:[%s9306_s2 + $0x9f4] ss:$24 sps:$4 sm:$0xff]  }
 0x157   : > { %3320 = vmatmul.mubr.bf16.gmra.mrb[4].mxu0 %v8203_v42  ;;  %4334 = vmatmul.mubr.bf16.gmra.mrb[36].mxu1 %v8544_v10  ;;  %v3528_v14 = vrot.slane %v9352_v32, 1  ;;  %v9355_v32 = vshll.u32 %v7364_v12, 16 }
 0x158   : > { %4183 = vmatpush1.bf16.msra.mxu0 %v6769_v17  ;;  %3329 = vmatprep.mubr.bf16.mxu0 %v8217_v50  ;;  %v6775_v17 = vld [vmem:[%s9306_s2 + $0x9c0] ss:$24 sps:$4 sm:$0xff]   ;;  %v8582_v50 = vsel %vm3487_vm4, %v3514_v9, %v3522_v28  ;;  %v9354_v9 = vshrl.u32 %v7364_v12, 16  ;;  %v6783_v12 = vld [vmem:[%s9306_s2 + $0xa24] ss:$24 sps:$4 sm:$0xff]  }
 0x159   : > { %4184 = vmatprep.subr.bf16.mxu0 %v6774_v51  ;;  %4343 = vmatprep.mubr.bf16.mxu1 %v8558_v22  ;;  %v9353_v51 = vshll.u32 %v7346_v5, 16  ;;  %v6778_v5 = vld [vmem:[%s9306_s2 + $0x9f0] ss:$24 sps:$4 sm:$0xff]  }
 0x15a   : > { %v8574_v54 = vpop.f32.mrb[28].mxu1 }
 0x15b   : > { %9350 = vst [vmem:[#allocation6_spill] sm:$0xff] %v8574_v54  ;;  %v8576_v42 = vpop.f32.mrb[29].mxu1  ;;  %v3529_v6 = vrot.slane %v9353_v51, 2  ;;  %v3541_v54 = vrot.slane %v9355_v32, 2  ;;  %v9356_v51 = vshrl.u32 %v7398_v34, 16 }
 0x15c   : > { %9351 = vst [vmem:[#allocation7_spill] sm:$0xff] %v8576_v42  ;;  %4185 = vmatpush1.bf16.msra.mxu0 %v6772_v43  ;;  %v8588_v35 = vpop.f32.mrb[30].mxu1  ;;  %v8596_v43 = vsel %vm3487_vm4, %v3526_v33, %v3534_v38  ;;  %v3540_v42 = vrot.slane %v9354_v9, 1 }
 0x15d   : > { %4186 = vmatprep.subr.bf16.mxu0 %v6777_v48  ;;  %v8593_v21 = vpop.f32.mrb[31].mxu1  ;;  %v3530_v48 = vor.u32 %v3529_v6, %v3528_v14  ;;  %v9357_v14 = vshll.u32 %v7398_v34, 16  ;;  %v6784_v34 = vld [vmem:[%s9306_s2 + $0xa50] ss:$24 sps:$4 sm:$0xff]  }
 0x15e   : > { %v3542_v33 = vor.u32 %v3541_v54, %v3540_v42  ;;  %v6786_v54 = vld [vmem:[%s9306_s2 + $0xa54] ss:$24 sps:$4 sm:$0xff]  }
 0x15f   : > { %3330 = vmatmul.mubr.bf16.gmra.mrb[8].mxu0 %v8237_v45  ;;  %4344 = vmatmul.mubr.bf16.gmra.mrb[40].mxu1 %v8582_v50  ;;  %v6781_v45 = vld [vmem:[%s9306_s2 + $0xa20] ss:$24 sps:$4 sm:$0xff]   ;;  %v3537_v6 = vrot.slane %v9357_v14, 2 }
 0x160   : > { %4187 = vmatpush1.bf16.msra.mxu0 %v6775_v17  ;;  %3339 = vmatprep.mubr.bf16.mxu0 %v8253_v24  ;;  %v8616_v17 = vsel %vm3487_vm4, %v3522_v28, %v3530_v48  ;;  %v3536_v24 = vrot.slane %v9356_v51, 1  ;;  %v8626_v42 = vsel %vm3487_vm4, %v3534_v38, %v3542_v33  ;;  %v9359_v28 = vshll.u32 %v7416_v44, 16 }
 0x161   : > { %4188 = vmatprep.subr.bf16.mxu0 %v6780_v18  ;;  %4353 = vmatprep.mubr.bf16.mxu1 %v8596_v43  ;;  %v9358_v18 = vshrl.u32 %v7416_v44, 16  ;;  %v6789_v44 = vld [vmem:[%s9306_s2 + $0xa84] ss:$24 sps:$4 sm:$0xff]  }
 0x162   : > { %v3549_v32 = vrot.slane %v9359_v28, 2 }
 0x163   : > { %v3548_v9 = vrot.slane %v9358_v18, 1  ;;  %v9362_v18 = vshrl.u32 %v7469_v23, 16 }
 0x164   : > { %4189 = vmatpush1.bf16.msra.mxu0 %v6778_v5  ;;  %v3538_v5 = vor.u32 %v3537_v6, %v3536_v24  ;;  %v9361_v24 = vshll.u32 %v7447_v7, 16  ;;  %v6792_v6 = vld [vmem:[%s9306_s2 + $0xab4] ss:$24 sps:$4 sm:$0xff]  }
 0x165   : > { %4190 = vmatprep.subr.bf16.mxu0 %v6783_v12  ;;  %v3550_v38 = vor.u32 %v3549_v32, %v3548_v9  ;;  %v3486_v12 = vld [vmem:[%s7485_s28] sm:$0x33]  ;;  %v3556_v9 = vrot.slane %v9362_v18, 1  ;;  %v6798_v18 = vld [vmem:[%s9306_s2 + $0xb14] ss:$24 sps:$4 sm:$0xff]  }
 0x166   : > { %v3545_v14 = vrot.slane %v9361_v24, 2  ;;  %v5705_v32 = vcombine.high %v3486_v12, %v3486_v12  ;;  %v9365_v24 = vshll.u32 %v7505_v2, 16 }
 0x167   : > { %3340 = vmatmul.mubr.bf16.gmra.mrb[12].mxu0 %v8274_v29  ;;  %4354 = vmatmul.mubr.bf16.gmra.mrb[44].mxu1 %v8616_v17  ;;  %v6787_v29 = vld [vmem:[%s9306_s2 + $0xa80] ss:$24 sps:$4 sm:$0xff]  }
 0x168   : > { %4191 = vmatpush1.bf16.msra.mxu0 %v6781_v45  ;;  %3349 = vmatprep.mubr.bf16.mxu0 %v8294_v13  ;;  %v8647_v45 = vsel %vm3487_vm4, %v3530_v48, %v3538_v5  ;;  %v9360_v13 = vshrl.u32 %v7447_v7, 16  ;;  %v9363_v48 = vshll.u32 %v7469_v23, 16  ;;  %v6790_v7 = vld [vmem:[%s9306_s2 + $0xab0] ss:$24 sps:$4 sm:$0xff]   ;;  %v6795_v23 = vld [vmem:[%s9306_s2 + $0xae4] ss:$24 sps:$4 sm:$0xff]  }
 0x169   : > { %4192 = vmatprep.subr.bf16.mxu0 %v6786_v54  ;;  %4363 = vmatprep.mubr.bf16.mxu1 %v8626_v42  ;;  %v8657_v54 = vsel %vm3487_vm4, %v3542_v33, %v3550_v38 }
 0x16a   : > { %v3544_v51 = vrot.slane %v9360_v13, 1  ;;  %v3557_v28 = vrot.slane %v9363_v48, 2 }
 0x16c   : > { %4193 = vmatpush1.bf16.msra.mxu0 %v6784_v34  ;;  %v3546_v33 = vor.u32 %v3545_v14, %v3544_v51  ;;  %v3558_v34 = vor.u32 %v3557_v28, %v3556_v9  ;;  %v3553_v14 = vrot.slane %v9365_v24, 2 }
 0x16d   : > { %4194 = vmatprep.subr.bf16.mxu0 %v6789_v44  ;;  %v3590_v44 = vshrl.u32 %v5705_v32, 16 }
 0x16e   : > { %v8677_v13 = vsel %vm3487_vm4, %v3538_v5, %v3546_v33  ;;  %v8687_v9 = vsel %vm3487_vm4, %v3550_v38, %v3558_v34  ;;  %v6801_v38 = vld [vmem:[%s9306_s2 + $0xb44] ss:$24 sps:$4 sm:$0xff]  }
 0x16f   : > { %3350 = vmatmul.mubr.bf16.gmra.mrb[16].mxu0 %v8319_v20  ;;  %4364 = vmatmul.mubr.bf16.gmra.mrb[48].mxu1 %v8647_v45  ;;  %v3593_v20 = vshll.u32 %v5705_v32, 16  ;;  %v3592_v48 = vrot.slane %v3590_v44, 1 }
 0x170   : > { %4195 = vmatpush1.bf16.msra.mxu0 %v6787_v29  ;;  %3359 = vmatprep.mubr.bf16.mxu0 %v8340_v55  ;;  %v6793_v29 = vld [vmem:[%s9306_s2 + $0xae0] ss:$24 sps:$4 sm:$0xff]   ;;  %v9364_v55 = vshrl.u32 %v7505_v2, 16  ;;  %v6796_v2 = vld [vmem:[%s9306_s2 + $0xb10] ss:$24 sps:$4 sm:$0xff]  }
 0x171   : > { %4196 = vmatprep.subr.bf16.mxu0 %v6792_v6  ;;  %4373 = vmatprep.mubr.bf16.mxu1 %v8657_v54  ;;  %v5704_v6 = vcombine.low %v3486_v12, %v3486_v12  ;;  %v3595_v28 = vrot.slane %v3593_v20, 2 }
 0x172   : > { %v3552_v51 = vrot.slane %v9364_v55, 1 }
 0x173   : > { %v3582_v12 = vshrl.u32 %v5704_v6, 16  ;;  %v3585_v32 = vshll.u32 %v5704_v6, 16  ;;  %v6815_v6 = vld [vmem:[%s9306_s2 + $0x914] ss:$24 sps:$4 sm:$0xff]  }
 0x174   : > { %4197 = vmatpush1.bf16.msra.mxu0 %v6790_v7  ;;  %v3554_v5 = vor.u32 %v3553_v14, %v3552_v51  ;;  %v6810_v14 = vld [vmem:[%s9306_s2 + $0xbd0] ss:$24 sps:$4 sm:$0xff]   ;;  %v6828_v7 = vld [vmem:[%s9306_s2 + $0xa00] ss:$24 sps:$4 sm:$0xff]  }
 0x175   : > { %4198 = vmatprep.subr.bf16.mxu0 %v6795_v23  ;;  %v3584_v44 = vrot.slane %v3582_v12, 1  ;;  %v3587_v20 = vrot.slane %v3585_v32, 2  ;;  %v6822_v12 = vld [vmem:[%s9306_s2 + $0x9a0] ss:$24 sps:$4 sm:$0xff]   ;;  %v6827_v32 = vld [vmem:[%s9306_s2 + $0x9d4] ss:$24 sps:$4 sm:$0xff]  }
 0x176   : > { %v8709_v23 = vsel %vm3487_vm4, %v3546_v33, %v3554_v5  ;;  %v6802_v33 = vld [vmem:[%s9306_s2 + $0xb70] ss:$24 sps:$4 sm:$0xff]  }
 0x177   : > { %3360 = vmatmul.mubr.bf16.gmra.mrb[20].mxu0 %v8363_v61  ;;  %4374 = vmatmul.mubr.bf16.gmra.mrb[52].mxu1 %v8677_v13  ;;  %v3596_v61 = vor.u32 %v3595_v28, %v3592_v48  ;;  %v3588_v51 = vor.u32 %v3587_v20, %v3584_v44  ;;  %v6816_v48 = vld [vmem:[%s9306_s2 + $0x940] ss:$24 sps:$4 sm:$0xff]   ;;  %v6821_v28 = vld [vmem:[%s9306_s2 + $0x974] ss:$24 sps:$4 sm:$0xff]   ;;  %v6831_v44 = vld [vmem:[%s9306_s2 + $0xa30] ss:$24 sps:$4 sm:$0xff]  }
 0x178   : > { %4199 = vmatpush1.bf16.msra.mxu0 %v6793_v29  ;;  %3369 = vmatprep.mubr.bf16.mxu0 %v8384_v60  ;;  %v6799_v60 = vld [vmem:[%s9306_s2 + $0xb40] ss:$24 sps:$4 sm:$0xff]   ;;  %v6804_v29 = vld [vmem:[%s9306_s2 + $0xb74] ss:$24 sps:$4 sm:$0xff]   ;;  %v6836_v20 = vld [vmem:[%s9306_s2 + $0xa64] ss:$24 sps:$4 sm:$0xff]  }
 0x179   : > { %4200 = vmatprep.subr.bf16.mxu0 %v6798_v18  ;;  %4383 = vmatprep.mubr.bf16.mxu1 %v8687_v9  ;;  %v8716_v55 = vsel %vm8701_vm5, %v3558_v34, %v3596_v61  ;;  %v6808_v34 = vld [vmem:[%s9306_s2 + $0xba4] ss:$24 sps:$4 sm:$0xff]   ;;  %v8733_v24 = vsel %vm8701_vm5, %v3554_v5, %v3588_v51  ;;  %v6813_v18 = vld [vmem:[%s9306_s2 + $0x910] ss:$24 sps:$4 sm:$0xff]  }
 0x17a   : > { %v6824_v5 = vld [vmem:[%s9306_s2 + $0x9a4] ss:$24 sps:$4 sm:$0xff]   ;;  %v6837_v51 = vld [vmem:[%s9306_s2 + $0xa90] ss:$24 sps:$4 sm:$0xff]  }
 0x17b   : > { %v6830_v61 = vld [vmem:[%s9306_s2 + $0xa04] ss:$24 sps:$4 sm:$0xff]  }
 0x17c   : > { %4201 = vmatpush1.bf16.msra.mxu0 %v6796_v2  ;;  %v6819_v2 = vld [vmem:[%s9306_s2 + $0x970] ss:$24 sps:$4 sm:$0xff]  }
 0x17d   : > { %4202 = vmatprep.subr.bf16.mxu0 %v6801_v38  ;;  %v6825_v38 = vld [vmem:[%s9306_s2 + $0x9d0] ss:$24 sps:$4 sm:$0xff]  }
 0x17f   : > { %3370 = vmatmul.mubr.bf16.gmra.mrb[24].mxu0 %v8409_v52  ;;  %4384 = vmatmul.mubr.bf16.gmra.mrb[56].mxu1 %v8709_v23  ;;  %v6806_v52 = vld [vmem:[%s9306_s2 + $0xba0] ss:$24 sps:$4 sm:$0xff]  }
 0x180   : > { %4203 = vmatpush1.bf16.msra.mxu0 %v6799_v60  ;;  %3379 = vmatprep.mubr.bf16.mxu0 %v8428_v46  ;;  %v6812_v46 = vld [vmem:[%s9306_s2 + $0xbd4] ss:$24 sps:$4 sm:$0xff]  }
 0x181   : > { %4204 = vmatprep.subr.bf16.mxu0 %v6804_v29  ;;  %4393 = vmatprep.mubr.bf16.mxu1 %v8716_v55  ;;  %v6833_v60 = vld [vmem:[%s9306_s2 + $0xa34] ss:$24 sps:$4 sm:$0xff]   ;;  %v6834_v29 = vld [vmem:[%s9306_s2 + $0xa60] ss:$24 sps:$4 sm:$0xff]  }
 0x184   : > { %4205 = vmatpush1.bf16.msra.mxu0 %v6802_v33  ;;  %v6839_v33 = vld [vmem:[%s9306_s2 + $0xa94] ss:$24 sps:$4 sm:$0xff]  }
 0x185   : > { %4206 = vmatprep.subr.bf16.mxu0 %v6808_v34  ;;  %v6842_v34 = vld [vmem:[%s9306_s2 + $0xac4] ss:$24 sps:$4 sm:$0xff]  }
 0x187   : > { %3380 = vmatmul.mubr.bf16.gmra.mrb[28].mxu0 %v8458_v59  ;;  %4394 = vmatmul.mubr.bf16.gmra.mrb[60].mxu1 %v8733_v24  ;;  %v6818_v59 = vld [vmem:[%s9306_s2 + $0x944] ss:$24 sps:$4 sm:$0xff]  }
 0x188   : > { %4207 = vmatpush1.bf16.msra.mxu0 %v6806_v52  ;;  %4210 = vmatprep.mubr.bf16.mxu0 %v8483_v15  ;;  %v6840_v52 = vld [vmem:[%s9306_s2 + $0xac0] ss:$24 sps:$4 sm:$0xff]  }
 0x189   : > { %4208 = vmatprep.subr.bf16.mxu0 %v6812_v46  ;;  %v6845_v46 = vld [vmem:[%s9306_s2 + $0xaf4] ss:$24 sps:$4 sm:$0xff]  }
 0x18c   : > { %4209 = vmatpush1.bf16.msra.mxu0 %v6810_v14  ;;  %v6843_v14 = vld [vmem:[%s9306_s2 + $0xaf0] ss:$24 sps:$4 sm:$0xff]  }
 0x18d   : > { %4404 = vmatprep.subr.bf16.mxu0 %v6815_v6  ;;  %v6848_v6 = vld [vmem:[%s9306_s2 + $0xb24] ss:$24 sps:$4 sm:$0xff]  }
 0x18f   : > { %4211 = vmatmul.mubr.bf16.vlgmr.msra.gmra.mrb[32].mxu0 %v8505_v11 }
 0x190   : > { %4405 = vmatpush1.bf16.msra.mxu0 %v6813_v18  ;;  %4220 = vmatprep.mubr.bf16.mxu0 %v8519_v58  ;;  %v6846_v18 = vld [vmem:[%s9306_s2 + $0xb20] ss:$24 sps:$4 sm:$0xff]  }
 0x191   : > { %4406 = vmatprep.subr.bf16.mxu0 %v6818_v59  ;;  %v6851_v59 = vld [vmem:[%s9306_s2 + $0xb54] ss:$24 sps:$4 sm:$0xff]  }
 0x194   : > { %4407 = vmatpush1.bf16.msra.mxu0 %v6816_v48  ;;  %v6849_v48 = vld [vmem:[%s9306_s2 + $0xb50] ss:$24 sps:$4 sm:$0xff]  }
 0x195   : > { %4408 = vmatprep.subr.bf16.mxu0 %v6821_v28  ;;  %v6854_v28 = vld [vmem:[%s9306_s2 + $0xb84] ss:$24 sps:$4 sm:$0xff]  }
 0x197   : > { %4221 = vmatmul.mubr.bf16.gmra.mrb[36].mxu0 %v8544_v10 }
 0x198   : > { %4409 = vmatpush1.bf16.msra.mxu0 %v6819_v2  ;;  %4230 = vmatprep.mubr.bf16.mxu0 %v8558_v22  ;;  %v6852_v2 = vld [vmem:[%s9306_s2 + $0xb80] ss:$24 sps:$4 sm:$0xff]  }
 0x199   : > { %4410 = vmatprep.subr.bf16.mxu0 %v6824_v5  ;;  %v6857_v5 = vld [vmem:[%s9306_s2 + $0xbb4] ss:$24 sps:$4 sm:$0xff]  }
 0x19c   : > { %4411 = vmatpush1.bf16.msra.mxu0 %v6822_v12  ;;  %v6855_v12 = vld [vmem:[%s9306_s2 + $0xbb0] ss:$24 sps:$4 sm:$0xff]  }
 0x19d   : > { %4412 = vmatprep.subr.bf16.mxu0 %v6827_v32  ;;  %v6860_v32 = vld [vmem:[%s9306_s2 + $0xbe4] ss:$24 sps:$4 sm:$0xff]  }
 0x19f   : > { %4231 = vmatmul.mubr.bf16.gmra.mrb[40].mxu0 %v8582_v50 }
 0x1a0   : > { %4413 = vmatpush1.bf16.msra.mxu0 %v6825_v38  ;;  %4240 = vmatprep.mubr.bf16.mxu0 %v8596_v43  ;;  %v6858_v38 = vld [vmem:[%s9306_s2 + $0xbe0] ss:$24 sps:$4 sm:$0xff]  }
 0x1a1   : > { %4414 = vmatprep.subr.bf16.mxu0 %v6830_v61 }
 0x1a4   : > { %4415 = vmatpush1.bf16.msra.mxu0 %v6828_v7 }
 0x1a5   : > { %4416 = vmatprep.subr.bf16.mxu0 %v6833_v60  ;;  %v6875_v60 = vld [vmem:[%s9307_s3 + $0x78] sm:$0xff]  }
 0x1a7   : > { %4241 = vmatmul.mubr.bf16.gmra.mrb[44].mxu0 %v8616_v17 }
 0x1a8   : > { %4417 = vmatpush1.bf16.msra.mxu0 %v6831_v44  ;;  %4250 = vmatprep.mubr.bf16.mxu0 %v8626_v42  ;;  %v6876_v44 = vld [vmem:[%s9307_s3 + $0x38] sm:$0xff]  }
 0x1a9   : > { %4418 = vmatprep.subr.bf16.mxu0 %v6836_v20 }
 0x1ac   : > { %4419 = vmatpush1.bf16.msra.mxu0 %v6834_v29 }
 0x1ad   : > { %4420 = vmatprep.subr.bf16.mxu0 %v6839_v33 }
 0x1af   : > { %4251 = vmatmul.mubr.bf16.gmra.mrb[48].mxu0 %v8647_v45 }
 0x1b0   : > { %4421 = vmatpush1.bf16.msra.mxu0 %v6837_v51  ;;  %4260 = vmatprep.mubr.bf16.mxu0 %v8657_v54 }
 0x1b1   : > { %4422 = vmatprep.subr.bf16.mxu0 %v6842_v34  ;;  %v8930_v34 = vld [vmem:[%s9307_s3 + $0x80] sm:$0xff]  }
 0x1b4   : > { %4423 = vmatpush1.bf16.msra.mxu0 %v6840_v52 }
 0x1b5   : > { %4424 = vmatprep.subr.bf16.mxu0 %v6845_v46 }
 0x1b7   : > { %4261 = vmatmul.mubr.bf16.gmra.mrb[52].mxu0 %v8677_v13 }
 0x1b8   : > { %4425 = vmatpush1.bf16.msra.mxu0 %v6843_v14  ;;  %4270 = vmatprep.mubr.bf16.mxu0 %v8687_v9 }
 0x1b9   : > { %4426 = vmatprep.subr.bf16.mxu0 %v6848_v6 }
 0x1bc   : > { %4427 = vmatpush1.bf16.msra.mxu0 %v6846_v18 }
 0x1bd   : > { %4428 = vmatprep.subr.bf16.mxu0 %v6851_v59 }
 0x1bf   : > { %4271 = vmatmul.mubr.bf16.gmra.mrb[56].mxu0 %v8709_v23 }
 0x1c0   : > { %4429 = vmatpush1.bf16.msra.mxu0 %v6849_v48  ;;  %4280 = vmatprep.mubr.bf16.mxu0 %v8716_v55 }
 0x1c1   : > { %4430 = vmatprep.subr.bf16.mxu0 %v6854_v28 }
 0x1c4   : > { %4431 = vmatpush1.bf16.msra.mxu0 %v6852_v2 }
 0x1c5   : > { %4432 = vmatprep.subr.bf16.mxu0 %v6857_v5 }
 0x1c7   : > { %4281 = vmatmul.mubr.bf16.gmra.mrb[60].mxu0 %v8733_v24 }
 0x1c8   : > { %4433 = vmatpush1.bf16.msra.mxu0 %v6855_v12  ;;  %4436 = vmatprep.mubr.bf16.mxu0 %v8483_v15  ;;  %v6861_v15 = vld [vmem:[%s9307_s3 + $0x40] sm:$0xff]  }
 0x1c9   : > { %4434 = vmatprep.subr.bf16.mxu0 %v6860_v32  ;;  %5830 = vmatprep.subr.bf16.mxu1 %v6861_v15 }
 0x1cc   : > { %4435 = vmatpush1.bf16.msra.mxu0 %v6858_v38 }
 0x1cf   : > { %4437 = vmatmul.mubr.bf16.vlgmr.msra.gmra.mrb[0].mxu0 %v8505_v11  ;;  %v6862_v11 = vld [vmem:[%s9307_s3] sm:$0xff]  }
 0x1d0   : > { %4446 = vmatprep.mubr.bf16.mxu0 %v8519_v58  ;;  %5831 = vmatpush3.bf16.msra.mxu1 %v6862_v11  ;;  %v6863_v58 = vld [vmem:[%s9307_s3 + $0x48] sm:$0xff]  }
 0x1d1   : > { %5832 = vmatprep.subr.bf16.mxu1 %v6863_v58 }
 0x1d7   : > { %4447 = vmatmul.mubr.bf16.gmra.mrb[4].mxu0 %v8544_v10  ;;  %v6864_v10 = vld [vmem:[%s9307_s3 + $0x8] sm:$0xff]  }
 0x1d8   : > { %4456 = vmatprep.mubr.bf16.mxu0 %v8558_v22  ;;  %5833 = vmatpush3.bf16.msra.mxu1 %v6864_v10  ;;  %v6865_v22 = vld [vmem:[%s9307_s3 + $0x50] sm:$0xff]  }
 0x1d9   : > { %5834 = vmatprep.subr.bf16.mxu1 %v6865_v22 }
 0x1df   : > { %4457 = vmatmul.mubr.bf16.gmra.mrb[8].mxu0 %v8582_v50  ;;  %v6866_v50 = vld [vmem:[%s9307_s3 + $0x10] sm:$0xff]  }
 0x1e0   : > { %4466 = vmatprep.mubr.bf16.mxu0 %v8596_v43  ;;  %5835 = vmatpush3.bf16.msra.mxu1 %v6866_v50  ;;  %v6867_v43 = vld [vmem:[%s9307_s3 + $0x58] sm:$0xff]  }
 0x1e1   : > { %5836 = vmatprep.subr.bf16.mxu1 %v6867_v43 }
 0x1e7   : > { %4467 = vmatmul.mubr.bf16.gmra.mrb[12].mxu0 %v8616_v17  ;;  %v6868_v17 = vld [vmem:[%s9307_s3 + $0x18] sm:$0xff]  }
 0x1e8   : > { %4476 = vmatprep.mubr.bf16.mxu0 %v8626_v42  ;;  %5837 = vmatpush3.bf16.msra.mxu1 %v6868_v17  ;;  %v6869_v42 = vld [vmem:[%s9307_s3 + $0x60] sm:$0xff]  }
 0x1e9   : > { %5838 = vmatprep.subr.bf16.mxu1 %v6869_v42 }
 0x1ef   : > { %4477 = vmatmul.mubr.bf16.gmra.mrb[16].mxu0 %v8647_v45  ;;  %v6870_v45 = vld [vmem:[%s9307_s3 + $0x20] sm:$0xff]  }
 0x1f0   : > { %4486 = vmatprep.mubr.bf16.mxu0 %v8657_v54  ;;  %5839 = vmatpush3.bf16.msra.mxu1 %v6870_v45  ;;  %v6871_v54 = vld [vmem:[%s9307_s3 + $0x68] sm:$0xff]  }
 0x1f1   : > { %5840 = vmatprep.subr.bf16.mxu1 %v6871_v54 }
 0x1f7   : > { %4487 = vmatmul.mubr.bf16.gmra.mrb[20].mxu0 %v8677_v13  ;;  %v6872_v13 = vld [vmem:[%s9307_s3 + $0x28] sm:$0xff]  }
 0x1f8   : > { %4496 = vmatprep.mubr.bf16.mxu0 %v8687_v9  ;;  %5841 = vmatpush3.bf16.msra.mxu1 %v6872_v13  ;;  %v6873_v9 = vld [vmem:[%s9307_s3 + $0x70] sm:$0xff]  }
 0x1f9   : > { %5842 = vmatprep.subr.bf16.mxu1 %v6873_v9 }
 0x1ff   : > { %4497 = vmatmul.mubr.bf16.gmra.mrb[24].mxu0 %v8709_v23  ;;  %v6874_v23 = vld [vmem:[%s9307_s3 + $0x30] sm:$0xff]  }
 0x200   : > { %4506 = vmatprep.mubr.bf16.mxu0 %v8716_v55  ;;  %5843 = vmatpush3.bf16.msra.mxu1 %v6874_v23 }
 0x201   : > { %5844 = vmatprep.subr.bf16.mxu1 %v6875_v60 }
 0x204   : > { %5845 = vmatpush3.bf16.msra.mxu1 %v6876_v44 }
 0x205   : > { %5910 = vmatprep.subr.bf16.mxu1 %v8930_v34 }
 0x207   : > { %4507 = vmatmul.mubr.bf16.gmra.mrb[28].mxu0 %v8733_v24 }
 0x222   : > { %v8913_v55 = vpop.f32.mrb[32].mxu1 }
 0x223   : > { %v4327_v24 = vpop.f32.mrb[33].mxu1 }
 0x224   : > { %v8915_v61 = vpop.f32.mrb[34].mxu1 }
 0x225   : > { %v4331_v7 = vpop.f32.mrb[35].mxu1 }
 0x22a   : > { %v8923_v20 = vpop.f32.mrb[36].mxu1 }
 0x22b   : > { %v4337_v29 = vpop.f32.mrb[37].mxu1 }
 0x22c   : > { %v8925_v33 = vpop.f32.mrb[38].mxu1 }
 0x22d   : > { %v4341_v51 = vpop.f32.mrb[39].mxu1 }
 0x232   : > { %v8933_v52 = vpop.f32.mrb[40].mxu1 }
 0x233   : > { %v4347_v46 = vpop.f32.mrb[41].mxu1 }
 0x234   : > { %v8935_v14 = vpop.f32.mrb[42].mxu1 }
 0x235   : > { %v4351_v6 = vpop.f32.mrb[43].mxu1 }
 0x23a   : > { %v8937_v18 = vpop.f32.mrb[44].mxu1 }
 0x23b   : > { %v8939_v59 = vpop.f32.mrb[45].mxu1 }
 0x23c   : > { %v8941_v48 = vpop.f32.mrb[46].mxu1 }
 0x23d   : > { %9368 = vst [vmem:[#allocation8_spill] sm:$0xff] %v8941_v48  ;;  %v8943_v28 = vpop.f32.mrb[47].mxu1 }
 0x242   : > { %v8945_v2 = vpop.f32.mrb[48].mxu1 }
 0x243   : > { %9369 = vst [vmem:[#allocation9_spill] sm:$0xff] %v8945_v2  ;;  %v8947_v5 = vpop.f32.mrb[49].mxu1 }
 0x244   : > { %v8949_v12 = vpop.f32.mrb[50].mxu1 }
 0x245   : > { %9370 = vst [vmem:[#allocation10_spill] sm:$0xff] %v8949_v12  ;;  %v8951_v32 = vpop.f32.mrb[51].mxu1  ;;  %v4664_v12 = vmul.f32 %v4331_v7, %v4331_v7 }
 0x24a   : > { %v8953_v38 = vpop.f32.mrb[52].mxu1 }
 0x24b   : > { %9371 = vst [vmem:[#allocation11_spill] sm:$0xff] %v8953_v38  ;;  %v8955_v15 = vpop.f32.mrb[53].mxu1 }
 0x24c   : > { %v8957_v11 = vpop.f32.mrb[54].mxu1 }
 0x24d   : > { %9372 = vst [vmem:[#allocation12_spill] sm:$0xff] %v8957_v11  ;;  %v8959_v58 = vpop.f32.mrb[55].mxu1 }
 0x252   : > { %v8961_v10 = vpop.f32.mrb[56].mxu1 }
 0x253   : > { %9373 = vst [vmem:[#allocation13_spill] sm:$0xff] %v8961_v10  ;;  %v8963_v22 = vpop.f32.mrb[57].mxu1  ;;  %v4661_v10 = vmul.f32 %v4327_v24, %v4327_v24 }
 0x254   : > { %v8965_v50 = vpop.f32.mrb[58].mxu1 }
 0x255   : > { %9374 = vst [vmem:[#allocation14_spill] sm:$0xff] %v8965_v50  ;;  %v8967_v43 = vpop.f32.mrb[59].mxu1 }
 0x25a   : > { %v8969_v17 = vpop.f32.mrb[60].mxu1 }
 0x25b   : > { %9375 = vst [vmem:[#allocation15_spill] sm:$0xff] %v8969_v17  ;;  %v8971_v42 = vpop.f32.mrb[61].mxu1 }
 0x25c   : > { %v8973_v45 = vpop.f32.mrb[62].mxu1 }
 0x25d   : > { %9376 = vst [vmem:[#allocation16_spill] sm:$0xff] %v8973_v45  ;;  %v8975_v54 = vpop.f32.mrb[63].mxu1 }
 0x262   : > { %v4212_v13 = vpop.f32.mrb[32].mxu0 }
 0x263   : > { %v5942_v9 = vadd.f32 %v4212_v13, %v8266_v1  ;;  %v4214_v23 = vpop.f32.mrb[33].mxu0 }
 0x264   : > { %v8979_v60 = vadd.f32 %v4214_v23, %v8269_v40  ;;  %v4216_v44 = vpop.f32.mrb[34].mxu0  ;;  %v4667_v23 = vmul.f32 %v4337_v29, %v4337_v29 }
 0x265   : > { %v4613_v50 = vmul.f32 %v5942_v9, %v5942_v9  ;;  %v5944_v11 = vadd.f32 %v4216_v44, %v8279_v25  ;;  %v4218_v38 = vpop.f32.mrb[35].mxu0 }
 0x266   : > { %v8983_v17 = vadd.f32 %v4218_v38, %v8287_v31 }
 0x267   : > { %v8985_v45 = vadd.f32 %v4661_v10, %v4613_v50  ;;  %v4616_v2 = vmul.f32 %v5944_v11, %v5944_v11 }
 0x269   : > { %v8987_v48 = vadd.f32 %v4664_v12, %v4616_v2  ;;  %v4670_v2 = vmul.f32 %v4341_v51, %v4341_v51 }
 0x26a   : > { %v4222_v1 = vpop.f32.mrb[36].mxu0 }
 0x26b   : > { %v4757_v40 = vpack.c.bf16 %v8987_v48, %v8985_v45  ;;  %v5946_v13 = vadd.f32 %v4222_v1, %v8311_v49  ;;  %v4224_v24 = vpop.f32.mrb[37].mxu0  ;;  %v6879_v48 = vld [vmem:[%s9307_s3 + $0x90] sm:$0xff]  }
 0x26c   : > { %v8993_v9 = vadd.f32 %v4224_v24, %v8314_v27  ;;  %v4226_v25 = vpop.f32.mrb[38].mxu0 }
 0x26d   : > { %v4619_v31 = vmul.f32 %v5946_v13, %v5946_v13  ;;  %v5948_v7 = vadd.f32 %v4226_v25, %v8327_v57  ;;  %v4228_v38 = vpop.f32.mrb[39].mxu0  ;;  %v4673_v13 = vmul.f32 %v4347_v46, %v4347_v46 }
 0x26e   : > { %v8997_v11 = vadd.f32 %v4228_v38, %v8335_v8 }
 0x26f   : > { %v8999_v12 = vadd.f32 %v4667_v23, %v4619_v31  ;;  %v4622_v10 = vmul.f32 %v5948_v7, %v5948_v7  ;;  %v4676_v23 = vmul.f32 %v4351_v6, %v4351_v6 }
 0x271   : > { %v9001_v50 = vadd.f32 %v4670_v2, %v4622_v10 }
 0x272   : > { %v4232_v49 = vpop.f32.mrb[40].mxu0 }
 0x273   : > { %v5950_v44 = vadd.f32 %v4232_v49, %v8357_v0  ;;  %v4234_v27 = vpop.f32.mrb[41].mxu0  ;;  %v4760_v29 = vpack.c.bf16 %v9001_v50, %v8999_v12 }
 0x274   : > { %v9007_v1 = vadd.f32 %v4234_v27, %v8360_v47  ;;  %v4236_v57 = vpop.f32.mrb[42].mxu0  ;;  %v9377_v27 = vld [vmem:[#allocation2_spill] sm:$0xff] }
 0x275   : > { %v4625_v8 = vmul.f32 %v5950_v44, %v5950_v44  ;;  %v5952_v51 = vadd.f32 %v4236_v57, %v8371_v63  ;;  %v4238_v24 = vpop.f32.mrb[43].mxu0 }
 0x276   : > { %v9011_v25 = vadd.f32 %v4238_v24, %v8379_v36  ;;  %v4679_v36 = vmul.f32 %v8939_v59, %v8939_v59  ;;  %v9378_v24 = vld [vmem:[#allocation3_spill] sm:$0xff] }
 0x277   : > { %v9013_v31 = vadd.f32 %v4673_v13, %v4625_v8  ;;  %v4628_v0 = vmul.f32 %v5952_v51, %v5952_v51 }
 0x279   : > { %v9015_v7 = vadd.f32 %v4676_v23, %v4628_v0 }
 0x27a   : > { %v4242_v38 = vpop.f32.mrb[44].mxu0 }
 0x27b   : > { %v5954_v2 = vadd.f32 %v4242_v38, %v8403_v16  ;;  %v4244_v47 = vpop.f32.mrb[45].mxu0  ;;  %v4763_v46 = vpack.c.bf16 %v9015_v7, %v9013_v31  ;;  %v4682_v16 = vmul.f32 %v8943_v28, %v8943_v28 }
 0x27c   : > { %v9021_v10 = vadd.f32 %v4244_v47, %v8406_v41  ;;  %v4246_v63 = vpop.f32.mrb[46].mxu0 }
 0x27d   : > { %v4631_v6 = vmul.f32 %v5954_v2, %v5954_v2  ;;  %v5956_v49 = vadd.f32 %v4246_v63, %v8417_v62  ;;  %v4248_v44 = vpop.f32.mrb[47].mxu0  ;;  %v4685_v2 = vmul.f32 %v8947_v5, %v8947_v5 }
 0x27e   : > { %v9027_v57 = vadd.f32 %v4248_v44, %v9377_v27 }
 0x27f   : > { %v9031_v13 = vadd.f32 %v4679_v36, %v4631_v6  ;;  %v4634_v8 = vmul.f32 %v5956_v49, %v5956_v49  ;;  %v4688_v6 = vmul.f32 %v8951_v32, %v8951_v32 }
 0x281   : > { %v9033_v51 = vadd.f32 %v4682_v16, %v4634_v8 }
 0x282   : > { %v4252_v41 = vpop.f32.mrb[48].mxu0 }
 0x283   : > { %v5958_v23 = vadd.f32 %v4252_v41, %v9378_v24  ;;  %v4254_v0 = vpop.f32.mrb[49].mxu0  ;;  %v4766_v59 = vpack.c.bf16 %v9033_v51, %v9031_v13  ;;  %v4691_v41 = vmul.f32 %v8955_v15, %v8955_v15 }
 0x284   : > { %v9039_v62 = vadd.f32 %v4254_v0, %v8455_v30  ;;  %v4256_v38 = vpop.f32.mrb[50].mxu0 }
 0x285   : > { %v4637_v28 = vmul.f32 %v5958_v23, %v5958_v23  ;;  %v5960_v47 = vadd.f32 %v4256_v38, %v8466_v19  ;;  %v4258_v63 = vpop.f32.mrb[51].mxu0 }
 0x286   : > { %v9045_v36 = vadd.f32 %v4258_v63, %v8474_v53 }
 0x287   : > { %v9049_v49 = vadd.f32 %v4685_v2, %v4637_v28  ;;  %v4640_v44 = vmul.f32 %v5960_v47, %v5960_v47  ;;  %v9379_v47 = vld [vmem:[#allocation4_spill] sm:$0xff] }
 0x289   : > { %v9051_v27 = vadd.f32 %v4688_v6, %v4640_v44 }
 0x28a   : > { %v4262_v30 = vpop.f32.mrb[52].mxu0 }
 0x28b   : > { %v5962_v16 = vadd.f32 %v4262_v30, %v8496_v56  ;;  %v4264_v8 = vpop.f32.mrb[53].mxu0  ;;  %v4769_v5 = vpack.c.bf16 %v9051_v27, %v9049_v49  ;;  %v4694_v56 = vmul.f32 %v8959_v58, %v8959_v58  ;;  %v4697_v30 = vmul.f32 %v8963_v22, %v8963_v22 }
 0x28c   : > { %v9057_v19 = vadd.f32 %v4264_v8, %v8498_v39  ;;  %v4266_v53 = vpop.f32.mrb[54].mxu0 }
 0x28d   : > { %v4643_v32 = vmul.f32 %v5962_v16, %v5962_v16  ;;  %v5964_v24 = vadd.f32 %v4266_v53, %v8511_v26  ;;  %v4268_v23 = vpop.f32.mrb[55].mxu0  ;;  %v9380_v26 = vld [vmem:[#allocation5_spill] sm:$0xff] }
 0x28e   : > { %v9063_v0 = vadd.f32 %v4268_v23, %v8516_v37 }
 0x28f   : > { %v9067_v38 = vadd.f32 %v4691_v41, %v4643_v32  ;;  %v4646_v2 = vmul.f32 %v5964_v24, %v5964_v24  ;;  %v4700_v41 = vmul.f32 %v8967_v43, %v8967_v43 }
 0x291   : > { %v9069_v28 = vadd.f32 %v4694_v56, %v4646_v2  ;;  %v9381_v2 = vld [vmem:[#allocation6_spill] sm:$0xff] }
 0x292   : > { %v4272_v39 = vpop.f32.mrb[56].mxu0 }
 0x293   : > { %v5966_v63 = vadd.f32 %v4272_v39, %v9379_v47  ;;  %v4274_v6 = vpop.f32.mrb[57].mxu0  ;;  %v4772_v15 = vpack.c.bf16 %v9069_v28, %v9067_v38 }
 0x294   : > { %v9075_v44 = vadd.f32 %v4274_v6, %v9380_v26  ;;  %v4276_v37 = vpop.f32.mrb[58].mxu0  ;;  %v4703_v6 = vmul.f32 %v8971_v42, %v8971_v42 }
 0x295   : > { %v4649_v58 = vmul.f32 %v5966_v63, %v5966_v63  ;;  %v5968_v16 = vadd.f32 %v4276_v37, %v8550_v4  ;;  %v4278_v8 = vpop.f32.mrb[59].mxu0  ;;  %v9382_v4 = vld [vmem:[#allocation7_spill] sm:$0xff] }
 0x296   : > { %v9081_v53 = vadd.f32 %v4278_v8, %v8555_v3  ;;  %v4650_v49 = vmul.f32 %v9075_v44, %v9075_v44 }
 0x297   : > { %v9085_v32 = vadd.f32 %v4697_v30, %v4649_v58  ;;  %v4652_v24 = vmul.f32 %v5968_v16, %v5968_v16  ;;  %v4706_v58 = vmul.f32 %v8975_v54, %v8975_v54  ;;  %v4617_v54 = vmul.f32 %v8983_v17, %v8983_v17 }
 0x299   : > { %v9087_v23 = vadd.f32 %v4700_v41, %v4652_v24 }
 0x29a   : > { %v4282_v56 = vpop.f32.mrb[60].mxu0 }
 0x29b   : > { %v5970_v39 = vadd.f32 %v4282_v56, %v9381_v2  ;;  %v4284_v47 = vpop.f32.mrb[61].mxu0  ;;  %v4775_v22 = vpack.c.bf16 %v9087_v23, %v9085_v32  ;;  %v4614_v56 = vmul.f32 %v8979_v60, %v8979_v60 }
 0x29c   : > { %v9093_v63 = vadd.f32 %v4284_v47, %v9382_v4  ;;  %v4286_v3 = vpop.f32.mrb[62].mxu0 }
 0x29d   : > { %v4655_v43 = vmul.f32 %v5970_v39, %v5970_v39  ;;  %v5972_v26 = vadd.f32 %v4286_v3, %v8588_v35  ;;  %v4288_v37 = vpop.f32.mrb[63].mxu0 }
 0x29e   : > { %v9099_v30 = vadd.f32 %v4288_v37, %v8593_v21  ;;  %v4615_v21 = vmul.f32 %v8913_v55, %v8913_v55  ;;  %v6878_v55 = vld [vmem:[%s9307_s3 + $0x88] sm:$0xff]   ;;  %v4656_v38 = vmul.f32 %v9093_v63, %v9093_v63 }
 0x29f   : > { %v9103_v16 = vadd.f32 %v4703_v6, %v4655_v43  ;;  %v4658_v8 = vmul.f32 %v5972_v26, %v5972_v26  ;;  %v4618_v43 = vmul.f32 %v8915_v61, %v8915_v61 }
 0x2a1   : > { %v9105_v41 = vadd.f32 %v4706_v58, %v4658_v8 }
 0x2a2   : > { %v4438_v24 = vpop.f32.mrb[0].mxu0 }
 0x2a3   : > { %v4662_v42 = vmul.f32 %v4438_v24, %v4438_v24  ;;  %v4440_v2 = vpop.f32.mrb[1].mxu0  ;;  %v4778_v35 = vpack.c.bf16 %v9105_v41, %v9103_v16 }
 0x2a4   : > { %v4663_v39 = vmul.f32 %v4440_v2, %v4440_v2  ;;  %v4442_v47 = vpop.f32.mrb[2].mxu0  ;;  %v4621_v2 = vmul.f32 %v8923_v20, %v8923_v20 }
 0x2a5   : > { %v4710_v4 = vadd.f32 %v4662_v42, %v4614_v56  ;;  %v4665_v3 = vmul.f32 %v4442_v47, %v4442_v47  ;;  %v4444_v6 = vpop.f32.mrb[3].mxu0  ;;  %v4620_v56 = vmul.f32 %v8993_v9, %v8993_v9  ;;  %v4623_v47 = vmul.f32 %v8997_v11, %v8997_v11 }
 0x2a6   : > { %v9117_v60 = vadd.f32 %v4663_v39, %v4615_v21  ;;  %v4666_v26 = vmul.f32 %v4444_v6, %v4444_v6  ;;  %v4624_v9 = vmul.f32 %v8925_v33, %v8925_v33  ;;  %v6880_v33 = vld [vmem:[%s9307_s3 + $0x98] sm:$0xff]  }
 0x2a7   : > { %v4713_v37 = vadd.f32 %v4665_v3, %v4617_v54 }
 0x2a8   : > { %v9119_v58 = vadd.f32 %v4666_v26, %v4618_v43  ;;  %v4626_v26 = vmul.f32 %v9007_v1, %v9007_v1  ;;  %v4630_v1 = vmul.f32 %v8935_v14, %v8935_v14 }
 0x2a9   : > { %v4758_v8 = vpack.c.bf16 %v4713_v37, %v4710_v4 }
 0x2aa   : > { %v4448_v24 = vpop.f32.mrb[4].mxu0  ;;  %v4759_v17 = vpack.c.bf16 %v9119_v58, %v9117_v60 }
 0x2ab   : > { %v4668_v42 = vmul.f32 %v4448_v24, %v4448_v24  ;;  %v4450_v61 = vpop.f32.mrb[5].mxu0  ;;  %5005 = vmatprep.mubr.bf16.mxu1 %v4758_v8  ;;  %v4627_v24 = vmul.f32 %v8933_v52, %v8933_v52  ;;  %v6881_v52 = vld [vmem:[%s9307_s3 + $0xa0] sm:$0xff]  }
 0x2ac   : > { %v4669_v21 = vmul.f32 %v4450_v61, %v4450_v61  ;;  %v4452_v39 = vpop.f32.mrb[6].mxu0  ;;  %5006 = vmatmul.mubr.bf16.vlgmr.msra.gmra.mrb[64].mxu1 %v4757_v40 }
 0x2ad   : > { %v4716_v54 = vadd.f32 %v4668_v42, %v4620_v56  ;;  %v4671_v4 = vmul.f32 %v4452_v39, %v4452_v39  ;;  %v4454_v3 = vpop.f32.mrb[7].mxu0  ;;  %5911 = vmatpush3.bf16.msra.mxu1 %v8930_v34  ;;  %v4629_v42 = vmul.f32 %v9011_v25, %v9011_v25 }
 0x2ae   : > { %v9138_v6 = vadd.f32 %v4669_v21, %v4621_v2  ;;  %v4672_v20 = vmul.f32 %v4454_v3, %v4454_v3  ;;  %5912 = vmatprep.subr.bf16.mxu1 %v6878_v55 }
 0x2af   : > { %v4719_v45 = vadd.f32 %v4671_v4, %v4623_v47  ;;  %v4632_v4 = vmul.f32 %v9021_v10, %v9021_v10  ;;  %v9383_v10 = vld [vmem:[#allocation8_spill] sm:$0xff] }
 0x2b0   : > { %v9143_v40 = vadd.f32 %v4672_v20, %v4624_v9  ;;  %v4633_v20 = vmul.f32 %v8937_v18, %v8937_v18  ;;  %v6883_v18 = vld [vmem:[%s9307_s3 + $0xb0] sm:$0xff]  }
 0x2b1   : > { %v4761_v11 = vpack.c.bf16 %v4719_v45, %v4716_v54  ;;  %5913 = vmatpush3.bf16.msra.mxu1 %v6878_v55  ;;  %v6882_v54 = vld [vmem:[%s9307_s3 + $0xa8] sm:$0xff]  }
 0x2b2   : > { %v4762_v43 = vpack.c.bf16 %v9143_v40, %v9138_v6  ;;  %v4458_v34 = vpop.f32.mrb[8].mxu0  ;;  %5914 = vmatprep.subr.bf16.mxu1 %v6879_v48 }
 0x2b3   : > { %v4674_v37 = vmul.f32 %v4458_v34, %v4458_v34  ;;  %v4460_v8 = vpop.f32.mrb[9].mxu0  ;;  %5013 = vmatprep.mubr.bf16.mxu1 %v4761_v11  ;;  %v4635_v11 = vmul.f32 %v9027_v57, %v9027_v57 }
 0x2b4   : > { %v4675_v56 = vmul.f32 %v4460_v8, %v4460_v8  ;;  %v4462_v55 = vpop.f32.mrb[10].mxu0  ;;  %5014 = vmatmul.mubr.bf16.gmra.mrb[68].mxu1 %v4760_v29 }
 0x2b5   : > { %v4722_v61 = vadd.f32 %v4674_v37, %v4626_v26  ;;  %v4677_v2 = vmul.f32 %v4462_v55, %v4462_v55  ;;  %v4464_v21 = vpop.f32.mrb[11].mxu0  ;;  %5915 = vmatpush3.bf16.msra.mxu1 %v6879_v48  ;;  %v4636_v37 = vmul.f32 %v9383_v10, %v9383_v10 }
 0x2b6   : > { %v9161_v39 = vadd.f32 %v4675_v56, %v4627_v24  ;;  %v4678_v47 = vmul.f32 %v4464_v21, %v4464_v21  ;;  %5916 = vmatprep.subr.bf16.mxu1 %v6880_v33  ;;  %v6884_v56 = vld [vmem:[%s9307_s3 + $0xb8] sm:$0xff]  }
 0x2b7   : > { %v4725_v12 = vadd.f32 %v4677_v2, %v4629_v42  ;;  %v4638_v42 = vmul.f32 %v9039_v62, %v9039_v62  ;;  %v9384_v21 = vld [vmem:[#allocation9_spill] sm:$0xff]  ;;  %v9385_v62 = vld [vmem:[#allocation10_spill] sm:$0xff] }
 0x2b8   : > { %v9166_v50 = vadd.f32 %v4678_v47, %v4630_v1  ;;  %v4639_v1 = vmul.f32 %v9384_v21, %v9384_v21 }
 0x2b9   : > { %v4764_v29 = vpack.c.bf16 %v4725_v12, %v4722_v61  ;;  %5917 = vmatpush3.bf16.msra.mxu1 %v6880_v33  ;;  %v4641_v12 = vmul.f32 %v9045_v36, %v9045_v36 }
 0x2ba   : > { %v4468_v25 = vpop.f32.mrb[12].mxu0  ;;  %5918 = vmatprep.subr.bf16.mxu1 %v6881_v52  ;;  %v4765_v14 = vpack.c.bf16 %v9166_v50, %v9161_v39 }
 0x2bb   : > { %v4680_v3 = vmul.f32 %v4468_v25, %v4468_v25  ;;  %v4470_v9 = vpop.f32.mrb[13].mxu0  ;;  %5021 = vmatprep.mubr.bf16.mxu1 %v4764_v29 }
 0x2bc   : > { %v4681_v48 = vmul.f32 %v4470_v9, %v4470_v9  ;;  %v4472_v45 = vpop.f32.mrb[14].mxu0  ;;  %5022 = vmatmul.mubr.bf16.gmra.mrb[72].mxu1 %v4763_v46 }
 0x2bd   : > { %v4728_v34 = vadd.f32 %v4680_v3, %v4632_v4  ;;  %v4683_v33 = vmul.f32 %v4472_v45, %v4472_v45  ;;  %v4474_v26 = vpop.f32.mrb[15].mxu0  ;;  %5919 = vmatpush3.bf16.msra.mxu1 %v6881_v52  ;;  %v4642_v4 = vmul.f32 %v9385_v62, %v9385_v62 }
 0x2be   : > { %v9184_v8 = vadd.f32 %v4681_v48, %v4633_v20  ;;  %v4684_v24 = vmul.f32 %v4474_v26, %v4474_v26  ;;  %5920 = vmatprep.subr.bf16.mxu1 %v6882_v54 }
 0x2bf   : > { %v4731_v31 = vadd.f32 %v4683_v33, %v4635_v11 }
 0x2c0   : > { %v9189_v7 = vadd.f32 %v4684_v24, %v4636_v37  ;;  %v4647_v37 = vmul.f32 %v9063_v0, %v9063_v0  ;;  %v9388_v0 = vld [vmem:[#allocation13_spill] sm:$0xff] }
 0x2c1   : > { %v4767_v46 = vpack.c.bf16 %v4731_v31, %v4728_v34  ;;  %5921 = vmatpush3.bf16.msra.mxu1 %v6882_v54  ;;  %v9386_v34 = vld [vmem:[#allocation11_spill] sm:$0xff] }
 0x2c2   : > { %v4478_v57 = vpop.f32.mrb[16].mxu0  ;;  %5922 = vmatprep.subr.bf16.mxu1 %v6883_v18  ;;  %v4768_v55 = vpack.c.bf16 %v9189_v7, %v9184_v8  ;;  %v4645_v33 = vmul.f32 %v9386_v34, %v9386_v34 }
 0x2c3   : > { %v4686_v61 = vmul.f32 %v4478_v57, %v4478_v57  ;;  %v4480_v2 = vpop.f32.mrb[17].mxu0  ;;  %5029 = vmatprep.mubr.bf16.mxu1 %v4767_v46  ;;  %v9387_v46 = vld [vmem:[#allocation12_spill] sm:$0xff] }
 0x2c4   : > { %v4687_v47 = vmul.f32 %v4480_v2, %v4480_v2  ;;  %v4482_v52 = vpop.f32.mrb[18].mxu0  ;;  %5030 = vmatmul.mubr.bf16.gmra.mrb[76].mxu1 %v4766_v59  ;;  %v4644_v59 = vmul.f32 %v9057_v19, %v9057_v19  ;;  %v4648_v19 = vmul.f32 %v9387_v46, %v9387_v46 }
 0x2c5   : > { %v4734_v29 = vadd.f32 %v4686_v61, %v4638_v42  ;;  %v4689_v25 = vmul.f32 %v4482_v52, %v4482_v52  ;;  %v4484_v54 = vpop.f32.mrb[19].mxu0  ;;  %5923 = vmatpush3.bf16.msra.mxu1 %v6883_v18 }
 0x2c6   : > { %v9207_v3 = vadd.f32 %v4687_v47, %v4639_v1  ;;  %v4690_v9 = vmul.f32 %v4484_v54, %v4484_v54  ;;  %5924 = vmatprep.subr.bf16.mxu1 %v6884_v56  ;;  %v4651_v47 = vmul.f32 %v9388_v0, %v9388_v0 }
 0x2c7   : > { %v4737_v20 = vadd.f32 %v4689_v25, %v4641_v12 }
 0x2c8   : > { %v9209_v48 = vadd.f32 %v4690_v9, %v4642_v4  ;;  %v9389_v4 = vld [vmem:[#allocation14_spill] sm:$0xff] }
 0x2c9   : > { %v4770_v45 = vpack.c.bf16 %v4737_v20, %v4734_v29  ;;  %5925 = vmatpush3.bf16.msra.mxu1 %v6884_v56  ;;  %v4653_v29 = vmul.f32 %v9081_v53, %v9081_v53  ;;  %v4654_v44 = vmul.f32 %v9389_v4, %v9389_v4  ;;  %v9390_v53 = vld [vmem:[#allocation15_spill] sm:$0xff] }
 0x2ca   : > { %v4488_v13 = vpop.f32.mrb[20].mxu0  ;;  %v4771_v51 = vpack.c.bf16 %v9209_v48, %v9207_v3  ;;  %v4657_v34 = vmul.f32 %v9390_v53, %v9390_v53 }
 0x2cb   : > { %v4692_v36 = vmul.f32 %v4488_v13, %v4488_v13  ;;  %v4490_v11 = vpop.f32.mrb[21].mxu0  ;;  %5037 = vmatprep.mubr.bf16.mxu1 %v4770_v45 }
 0x2cc   : > { %v4693_v26 = vmul.f32 %v4490_v11, %v4490_v11  ;;  %v4492_v10 = vpop.f32.mrb[22].mxu0  ;;  %5038 = vmatmul.mubr.bf16.gmra.mrb[80].mxu1 %v4769_v5 }
 0x2cd   : > { %v4740_v24 = vadd.f32 %v4692_v36, %v4644_v59  ;;  %v4695_v18 = vmul.f32 %v4492_v10, %v4492_v10  ;;  %v4494_v31 = vpop.f32.mrb[23].mxu0  ;;  %v4659_v10 = vmul.f32 %v9099_v30, %v9099_v30 }
 0x2ce   : > { %v4741_v57 = vadd.f32 %v4693_v26, %v4645_v33  ;;  %v4696_v56 = vmul.f32 %v4494_v31, %v4494_v31  ;;  %v9391_v31 = vld [vmem:[#allocation16_spill] sm:$0xff] }
 0x2cf   : > { %v4743_v42 = vadd.f32 %v4695_v18, %v4647_v37  ;;  %v4660_v63 = vmul.f32 %v9391_v31, %v9391_v31 }
 0x2d0   : > { %v4744_v61 = vadd.f32 %v4696_v56, %v4648_v19 }
 0x2d1   : > { %v4773_v2 = vpack.c.bf16 %v4743_v42, %v4740_v24 }
 0x2d2   : > { %v4498_v21 = vpop.f32.mrb[24].mxu0  ;;  %v4774_v1 = vpack.c.bf16 %v4744_v61, %v4741_v57 }
 0x2d3   : > { %v4698_v27 = vmul.f32 %v4498_v21, %v4498_v21  ;;  %v4500_v5 = vpop.f32.mrb[25].mxu0  ;;  %5045 = vmatprep.mubr.bf16.mxu1 %v4773_v2 }
 0x2d4   : > { %v4699_v52 = vmul.f32 %v4500_v5, %v4500_v5  ;;  %v4502_v12 = vpop.f32.mrb[26].mxu0  ;;  %5046 = vmatmul.mubr.bf16.gmra.mrb[84].mxu1 %v4772_v15 }
 0x2d5   : > { %v4746_v25 = vadd.f32 %v4698_v27, %v4650_v49  ;;  %v4701_v54 = vmul.f32 %v4502_v12, %v4502_v12  ;;  %v4504_v62 = vpop.f32.mrb[27].mxu0 }
 0x2d6   : > { %v4747_v9 = vadd.f32 %v4699_v52, %v4651_v47  ;;  %v4702_v20 = vmul.f32 %v4504_v62, %v4504_v62 }
 0x2d7   : > { %v4749_v45 = vadd.f32 %v4701_v54, %v4653_v29 }
 0x2d8   : > { %v4750_v13 = vadd.f32 %v4702_v20, %v4654_v44 }
 0x2d9   : > { %v4776_v59 = vpack.c.bf16 %v4749_v45, %v4746_v25 }
 0x2da   : > { %v4508_v36 = vpop.f32.mrb[28].mxu0  ;;  %v4777_v11 = vpack.c.bf16 %v4750_v13, %v4747_v9 }
 0x2db   : > { %v4704_v28 = vmul.f32 %v4508_v36, %v4508_v36  ;;  %v4510_v15 = vpop.f32.mrb[29].mxu0  ;;  %5053 = vmatprep.mubr.bf16.mxu1 %v4776_v59 }
 0x2dc   : > { %v4705_v33 = vmul.f32 %v4510_v15, %v4510_v15  ;;  %v4512_v26 = vpop.f32.mrb[30].mxu0  ;;  %5054 = vmatmul.mubr.bf16.gmra.mrb[88].mxu1 %v4775_v22 }
 0x2dd   : > { %v4752_v37 = vadd.f32 %v4704_v28, %v4656_v38  ;;  %v4707_v24 = vmul.f32 %v4512_v26, %v4512_v26  ;;  %v4514_v18 = vpop.f32.mrb[31].mxu0 }
 0x2de   : > { %v4753_v46 = vadd.f32 %v4705_v33, %v4657_v34  ;;  %v4708_v19 = vmul.f32 %v4514_v18, %v4514_v18 }
 0x2df   : > { %v4755_v57 = vadd.f32 %v4707_v24, %v4659_v10 }
 0x2e0   : > { %v4756_v56 = vadd.f32 %v4708_v19, %v4660_v63 }
 0x2e1   : > { %v4779_v42 = vpack.c.bf16 %v4755_v57, %v4752_v37 }
 0x2e2   : > { %v4780_v61 = vpack.c.bf16 %v4756_v56, %v4753_v46 }
 0x2e3   : > { %5061 = vmatprep.mubr.bf16.mxu1 %v4779_v42 }
 0x2e4   : > { %5062 = vmatmul.mubr.bf16.gmra.mrb[92].mxu1 %v4778_v35 }
 0x2e5   : > { %5926 = vmatprep.mubr.bf16.mxu1 %v4759_v17 }
 0x2ec   : > { %5927 = vmatmul.mubr.bf16.vlgmr.msra.gmra.mrb[96].mxu1 %v4762_v43 }
 0x2ed   : > { %5930 = vmatprep.mubr.bf16.mxu1 %v4765_v14 }
 0x2f4   : > { %5931 = vmatmul.mubr.bf16.gmra.mrb[100].mxu1 %v4768_v55 }
 0x2f5   : > { %5934 = vmatprep.mubr.bf16.mxu1 %v4771_v51 }
 0x2fc   : > { %5935 = vmatmul.mubr.bf16.gmra.mrb[104].mxu1 %v4774_v1 }
 0x2fd   : > { %5938 = vmatprep.mubr.bf16.mxu1 %v4777_v11 }
 0x304   : > { %5939 = vmatmul.mubr.bf16.gmra.mrb[108].mxu1 %v4780_v61 }
 0x37f   : > { %v5846_v32 = vpop.f32.mrb[64].mxu1 }
 0x380   : > { %v5847_v23 = vpop.f32.mrb[65].mxu1 }
 0x381   : > { %v5848_v22 = vadd.f32 %v5847_v23, %v5846_v32  ;;  %v5849_v30 = vpop.f32.mrb[66].mxu1 }
 0x382   : > { %v5850_v16 = vpop.f32.mrb[67].mxu1 }
 0x383   : > { %v5851_v41 = vadd.f32 %v5850_v16, %v5849_v30 }
 0x387   : > { %v5852_v35 = vpop.f32.mrb[68].mxu1 }
 0x388   : > { %v5853_v60 = vpop.f32.mrb[69].mxu1 }
 0x389   : > { %v5854_v58 = vadd.f32 %v5853_v60, %v5852_v35  ;;  %v5855_v17 = vpop.f32.mrb[70].mxu1 }
 0x38a   : > { %v5856_v6 = vpop.f32.mrb[71].mxu1 }
 0x38b   : > { %v5857_v40 = vadd.f32 %v5856_v6, %v5855_v17 }
 0x38f   : > { %v5858_v43 = vpop.f32.mrb[72].mxu1 }
 0x390   : > { %v5859_v39 = vpop.f32.mrb[73].mxu1 }
 0x391   : > { %v5860_v50 = vadd.f32 %v5859_v39, %v5858_v43  ;;  %v5861_v14 = vpop.f32.mrb[74].mxu1 }
 0x392   : > { %v5862_v8 = vpop.f32.mrb[75].mxu1 }
 0x393   : > { %v5863_v7 = vadd.f32 %v5862_v8, %v5861_v14 }
 0x397   : > { %v5864_v55 = vpop.f32.mrb[76].mxu1 }
 0x398   : > { %v5865_v3 = vpop.f32.mrb[77].mxu1 }
 0x399   : > { %v5866_v48 = vadd.f32 %v5865_v3, %v5864_v55  ;;  %v5867_v51 = vpop.f32.mrb[78].mxu1 }
 0x39a   : > { %v5868_v2 = vpop.f32.mrb[79].mxu1 }
 0x39b   : > { %v5869_v21 = vadd.f32 %v5868_v2, %v5867_v51 }
 0x39f   : > { %v5870_v1 = vpop.f32.mrb[80].mxu1 }
 0x3a0   : > { %v5871_v49 = vpop.f32.mrb[81].mxu1 }
 0x3a1   : > { %v5872_v27 = vadd.f32 %v5871_v49, %v5870_v1  ;;  %v5873_v5 = vpop.f32.mrb[82].mxu1 }
 0x3a2   : > { %v5874_v0 = vpop.f32.mrb[83].mxu1 }
 0x3a3   : > { %v5875_v47 = vadd.f32 %v5874_v0, %v5873_v5 }
 0x3a7   : > { %v5876_v52 = vpop.f32.mrb[84].mxu1 }
 0x3a8   : > { %v5877_v12 = vpop.f32.mrb[85].mxu1 }
 0x3a9   : > { %v5878_v29 = vadd.f32 %v5877_v12, %v5876_v52  ;;  %v5879_v25 = vpop.f32.mrb[86].mxu1 }
 0x3aa   : > { %v5880_v54 = vpop.f32.mrb[87].mxu1 }
 0x3ab   : > { %v5881_v62 = vadd.f32 %v5880_v54, %v5879_v25 }
 0x3af   : > { %v5882_v4 = vpop.f32.mrb[88].mxu1 }
 0x3b0   : > { %v5883_v44 = vpop.f32.mrb[89].mxu1 }
 0x3b1   : > { %v9264_v9 = vadd.f32 %v5883_v44, %v5882_v4  ;;  %v5885_v20 = vpop.f32.mrb[90].mxu1 }
 0x3b2   : > { %v5886_v45 = vpop.f32.mrb[91].mxu1 }
 0x3b3   : > { %v9266_v13 = vadd.f32 %v5886_v45, %v5885_v20 }
 0x3b7   : > { %v5888_v59 = vpop.f32.mrb[92].mxu1 }
 0x3b8   : > { %v5889_v36 = vpop.f32.mrb[93].mxu1 }
 0x3b9   : > { %v5890_v11 = vadd.f32 %v5889_v36, %v5888_v59  ;;  %v5891_v38 = vpop.f32.mrb[94].mxu1 }
 0x3ba   : > { %v5892_v28 = vpop.f32.mrb[95].mxu1 }
 0x3bb   : > { %v5893_v15 = vadd.f32 %v5892_v28, %v5891_v38 }
 0x3bf   : > { %v5928_v53 = vpop.f32.mrb[96].mxu1 }
 0x3c0   : > { %v5113_v34 = vadd.f32 %v5928_v53, %v5854_v58  ;;  %v5104_v33 = vpop.f32.mrb[97].mxu1 }
 0x3c1   : > { %v5105_v26 = vadd.f32 %v5848_v22, %v5104_v33  ;;  %v5929_v10 = vpop.f32.mrb[98].mxu1 }
 0x3c2   : > { %v5116_v37 = vadd.f32 %v5929_v10, %v5857_v40  ;;  %v5107_v24 = vpop.f32.mrb[99].mxu1  ;;  %v5169_v63 = vmax.f32 %v5113_v34, 1e-05 }
 0x3c3   : > { %v5167_v18 = vmax.f32 %v5105_v26, 1e-05  ;;  %v5108_v31 = vadd.f32 %v5851_v41, %v5107_v24  ;;  %v9271_v41 = vld [vmem:[%s9308_s4] ss:$0 sm:$0xff] }
 0x3c4   : > { %v5170_v42 = vmax.f32 %v5116_v37, 1e-05 }
 0x3c5   : > { %6885 = vlog2.f32 %v5167_v18  ;;  %v5168_v46 = vmax.f32 %v5108_v31, 1e-05 }
 0x3c7   : > { %6887 = vlog2.f32 %v5168_v46  ;;  %v5932_v19 = vpop.f32.mrb[100].mxu1 }
 0x3c8   : > { %v5129_v57 = vadd.f32 %v5932_v19, %v5866_v48  ;;  %v5120_v56 = vpop.f32.mrb[101].mxu1  ;;  %6889 = vlog2.f32 %v5169_v63 }
 0x3c9   : > { %v5121_v61 = vadd.f32 %v5860_v50, %v5120_v56  ;;  %v5933_v32 = vpop.f32.mrb[102].mxu1  ;;  %6891 = vlog2.f32 %v5170_v42 }
 0x3ca   : > { %v5132_v23 = vadd.f32 %v5933_v32, %v5869_v21  ;;  %v5123_v30 = vpop.f32.mrb[103].mxu1  ;;  %v5173_v51 = vmax.f32 %v5129_v57, 1e-05 }
 0x3cb   : > { %v5124_v16 = vadd.f32 %v5863_v7, %v5123_v30  ;;  %v5171_v22 = vmax.f32 %v5121_v61, 1e-05 }
 0x3cd   : > { %6893 = vlog2.f32 %v5171_v22  ;;  %v5172_v43 = vmax.f32 %v5124_v16, 1e-05 }
 0x3cf   : > { %v6886_v35 = vpop.eup %6885  ;;  %v5936_v60 = vpop.f32.mrb[104].mxu1  ;;  %6895 = vlog2.f32 %v5172_v43 }
 0x3d0   : > { %v5145_v58 = vadd.f32 %v5936_v60, %v5878_v29  ;;  %v5136_v17 = vpop.f32.mrb[105].mxu1  ;;  %v5184_v6 = vmul.f32 0.6931472, %v6886_v35  ;;  %6897 = vlog2.f32 %v5173_v51 }
 0x3d1   : > { %v6888_v40 = vpop.eup %6887  ;;  %v5137_v39 = vadd.f32 %v5872_v27, %v5136_v17  ;;  %v5937_v50 = vpop.f32.mrb[106].mxu1  ;;  %v5174_v27 = vmax.f32 %v5132_v23, 1e-05 }
 0x3d2   : > { %v5148_v14 = vadd.f32 %v5937_v50, %v5881_v62  ;;  %v5139_v8 = vpop.f32.mrb[107].mxu1  ;;  %v5222_v7 = vmul.f32 %v9271_v41, %v5184_v6  ;;  %v5186_v55 = vmul.f32 0.6931472, %v6888_v40  ;;  %v6890_v3 = vpop.eup %6889  ;;  %v5177_v28 = vmax.f32 %v5145_v58, 1e-05 }
 0x3d3   : > { %v5140_v48 = vadd.f32 %v5875_v47, %v5139_v8  ;;  %v5188_v21 = vmul.f32 0.6931472, %v6890_v3  ;;  %v6892_v1 = vpop.eup %6891  ;;  %6899 = vlog2.f32 %v5174_v27  ;;  %v5175_v44 = vmax.f32 %v5137_v39, 1e-05 }
 0x3d4   : > { %5238 = vxpose.xlu0.b32.start [1/16] (narrow) %v5222_v7, 80  ;;  %v5223_v2 = vmul.f32 %v9271_v41, %v5186_v55  ;;  %v5190_v54 = vmul.f32 0.6931472, %v6892_v1  ;;  %v5178_v34 = vmax.f32 %v5148_v14, 1e-05 }
 0x3d5   : > { %v5224_v47 = vmul.f32 %v9271_v41, %v5188_v21  ;;  %6901 = vlog2.f32 %v5175_v44  ;;  %v5176_v36 = vmax.f32 %v5140_v48, 1e-05 }
 0x3d6   : > { %v5225_v20 = vmul.f32 %v9271_v41, %v5190_v54 }
 0x3d7   : > { %v5940_v49 = vpop.f32.mrb[108].mxu1  ;;  %v6894_v62 = vpop.eup %6893  ;;  %6903 = vlog2.f32 %v5176_v36 }
 0x3d8   : > { %v5161_v5 = vadd.f32 %v5940_v49, %v5890_v11  ;;  %v5152_v0 = vpop.f32.mrb[109].mxu1  ;;  %5239 = vxpose.xlu0.b32.cont [2/16] (narrow) %v5223_v2, 80  ;;  %v5192_v45 = vmul.f32 0.6931472, %v6894_v62  ;;  %6905 = vlog2.f32 %v5177_v28 }
 0x3d9   : > { %v5153_v52 = vadd.f32 %v9264_v9, %v5152_v0  ;;  %v5941_v12 = vpop.f32.mrb[110].mxu1  ;;  %v6896_v59 = vpop.eup %6895  ;;  %6907 = vlog2.f32 %v5178_v34 }
 0x3da   : > { %v5164_v29 = vadd.f32 %v5941_v12, %v5893_v15  ;;  %v5155_v25 = vpop.f32.mrb[111].mxu1  ;;  %v5226_v9 = vmul.f32 %v9271_v41, %v5192_v45  ;;  %v5194_v11 = vmul.f32 0.6931472, %v6896_v59  ;;  %v6898_v38 = vpop.eup %6897  ;;  %v5181_v56 = vmax.f32 %v5161_v5, 1e-05 }
 0x3db   : > { %v5156_v4 = vadd.f32 %v9266_v13, %v5155_v25  ;;  %v5196_v13 = vmul.f32 0.6931472, %v6898_v38  ;;  %v5179_v37 = vmax.f32 %v5153_v52, 1e-05 }
 0x3dc   : > { %5240 = vxpose.xlu0.b32.cont [3/16] (narrow) %v5224_v47, 80  ;;  %v5227_v15 = vmul.f32 %v9271_v41, %v5194_v11  ;;  %v5182_v23 = vmax.f32 %v5164_v29, 1e-05 }
 0x3dd   : > { %v6900_v53 = vpop.eup %6899  ;;  %v5228_v33 = vmul.f32 %v9271_v41, %v5196_v13  ;;  %6909 = vlog2.f32 %v5179_v37  ;;  %v5180_v63 = vmax.f32 %v5156_v4, 1e-05 }
 0x3de   : > { %v5198_v26 = vmul.f32 0.6931472, %v6900_v53 }
 0x3df   : > { %v6902_v10 = vpop.eup %6901  ;;  %6911 = vlog2.f32 %v5180_v63 }
 0x3e0   : > { %5241 = vxpose.xlu0.b32.cont [4/16] (narrow) %v5225_v20, 80  ;;  %v5229_v24 = vmul.f32 %v9271_v41, %v5198_v26  ;;  %v5200_v18 = vmul.f32 0.6931472, %v6902_v10  ;;  %6913 = vlog2.f32 %v5181_v56 }
 0x3e1   : > { %v6904_v31 = vpop.eup %6903  ;;  %6915 = vlog2.f32 %v5182_v23 }
 0x3e2   : > { %v5230_v46 = vmul.f32 %v9271_v41, %v5200_v18  ;;  %v5202_v19 = vmul.f32 0.6931472, %v6904_v31  ;;  %v6906_v57 = vpop.eup %6905 }
 0x3e3   : > { %v5204_v61 = vmul.f32 0.6931472, %v6906_v57  ;;  %v6908_v32 = vpop.eup %6907 }
 0x3e4   : > { %5242 = vxpose.xlu0.b32.cont [5/16] (narrow) %v5226_v9, 80  ;;  %v5231_v42 = vmul.f32 %v9271_v41, %v5202_v19  ;;  %v5206_v16 = vmul.f32 0.6931472, %v6908_v32 }
 0x3e5   : > { %v5232_v30 = vmul.f32 %v9271_v41, %v5204_v61 }
 0x3e6   : > { %v5233_v35 = vmul.f32 %v9271_v41, %v5206_v16 }
 0x3e7   : > { %v6910_v22 = vpop.eup %6909 }
 0x3e8   : > { %5243 = vxpose.xlu0.b32.cont [6/16] (narrow) %v5227_v15, 80  ;;  %v5208_v60 = vmul.f32 0.6931472, %v6910_v22 }
 0x3e9   : > { %v6912_v58 = vpop.eup %6911 }
 0x3ea   : > { %v5234_v17 = vmul.f32 %v9271_v41, %v5208_v60  ;;  %v5210_v6 = vmul.f32 0.6931472, %v6912_v58  ;;  %v6914_v40 = vpop.eup %6913 }
 0x3eb   : > { %v5212_v39 = vmul.f32 0.6931472, %v6914_v40  ;;  %v6916_v50 = vpop.eup %6915 }
 0x3ec   : > { %5244 = vxpose.xlu0.b32.cont [7/16] (narrow) %v5228_v33, 80  ;;  %v5235_v43 = vmul.f32 %v9271_v41, %v5210_v6  ;;  %v5214_v8 = vmul.f32 0.6931472, %v6916_v50 }
 0x3ed   : > { %v5236_v14 = vmul.f32 %v9271_v41, %v5212_v39 }
 0x3ee   : > { %v5237_v7 = vmul.f32 %v9271_v41, %v5214_v8 }
 0x3f0   : > { %5245 = vxpose.xlu0.b32.cont [8/16] (narrow) %v5229_v24, 80 }
 0x3f4   : > { %5246 = vxpose.xlu0.b32.cont [9/16] (narrow) %v5230_v46, 80 }
 0x3f8   : > { %5247 = vxpose.xlu0.b32.cont [10/16] (narrow) %v5231_v42, 80 }
 0x3fc   : > { %5248 = vxpose.xlu0.b32.cont [11/16] (narrow) %v5232_v30, 80 }
 0x400   : > { %5249 = vxpose.xlu0.b32.cont [12/16] (narrow) %v5233_v35, 80 }
 0x404   : > { %5250 = vxpose.xlu0.b32.cont [13/16] (narrow) %v5234_v17, 80 }
 0x408   : > { %5251 = vxpose.xlu0.b32.cont [14/16] (narrow) %v5235_v43, 80 }
 0x40c   : > { %5252 = vxpose.xlu0.b32.cont [15/16] (narrow) %v5236_v14, 80 }
 0x410   : > { %5253 = vxpose.xlu0.b32.end [16/16] (narrow) %v5237_v7, 80 }
 0x454   : > { %v5254_v55 = vpop.trf.xlu0 }
 0x455   : > { %5270 = vst [vmem:[%s322_s11] sm:$0xff] %v5254_v55 }
 0x458   : > { %v5255_v3 = vpop.trf.xlu0 }
 0x459   : > { %5271 = vst [vmem:[%s322_s11 + $0x8] sm:$0xff] %v5255_v3 }
 0x45c   : > { %v5256_v48 = vpop.trf.xlu0 }
 0x45d   : > { %5272 = vst [vmem:[%s322_s11 + $0x10] sm:$0xff] %v5256_v48 }
 0x460   : > { %v5257_v51 = vpop.trf.xlu0 }
 0x461   : > { %5273 = vst [vmem:[%s322_s11 + $0x18] sm:$0xff] %v5257_v51 }
 0x464   : > { %v5258_v2 = vpop.trf.xlu0 }
 0x465   : > { %5274 = vst [vmem:[%s322_s11 + $0x20] sm:$0xff] %v5258_v2 }
 0x468   : > { %v5259_v21 = vpop.trf.xlu0 }
 0x469   : > { %5275 = vst [vmem:[%s322_s11 + $0x28] sm:$0xff] %v5259_v21 }
 0x46c   : > { %v5260_v1 = vpop.trf.xlu0 }
 0x46d   : > { %5276 = vst [vmem:[%s322_s11 + $0x30] sm:$0xff] %v5260_v1 }
 0x470   : > { %v5261_v41 = vpop.trf.xlu0 }
 0x471   : > { %5277 = vst [vmem:[%s322_s11 + $0x38] sm:$0xff] %v5261_v41 }
 0x474   : > { %v5262_v49 = vpop.trf.xlu0 }
 0x475   : > { %5278 = vst [vmem:[%s322_s11 + $0x40] sm:$0xff] %v5262_v49 }
 0x478   : > { %v5263_v5 = vpop.trf.xlu0 }
 0x479   : > { %5279 = vst [vmem:[%s322_s11 + $0x48] sm:$0xff] %v5263_v5 }
 0x47a PF: > { %s15_s20 = sadd.s32 1, %s6954_s20   ;;  %s9392_s18 = smov %s6950_s19 }
 0x47b   : > { %p12_p5 = scmp.ge.s32.totalorder %s15_s20, 4   ;;  %s9393_s19 = smov %s9395_s21 }
 0x47d   :  { %14 = sbr.rel (!%p12_p5) target bundleno = 2 (0x2), region = 73 }

</bundles_post_ra>
